<compile_context>
chip_gen: v7x
topology: tpu7x:2x2x1
jax: 0.10.0
libtpu: 0.0.40
codegen_flags: <defaults>
</compile_context>

<pallas_src>
import jax
import jax.numpy as jnp
import numpy as np
from jax.experimental import pallas as pl
from jax.experimental.pallas import tpu as pltpu

HO = WO = 20              # pooled spatial size (=> input spatial 40x40)
HW = HO * WO              # 400
C_OUT = 32
FC_IN = HW * C_OUT        # 12800
FC_HID = 128
C_GROUPS = 2              # FC1 contraction split: 2 groups of 16 channels => TK = 6400
C_PER_GROUP = C_OUT // C_GROUPS


# ---------------------------------------------------------------------------
# Fused kernel. Grid = (C_GROUPS,) over the FC1 contraction (channel groups).
#   patches: (B, 36, 400)   rows = pool_pos*9 + tap, cols = pooled pixel hw
#   wblk:    (128, 36)      block-diag conv weights -> one MXU matmul per batch
#   w1:      (32, 400, 128) bf16, w1[c, hw, h] == torch_w1[h, c*400 + hw]
# Step 0 computes conv+pool+bias+ReLU for the whole batch into VMEM scratch;
# every step accumulates 16 channels of Linear(12800,128); the last step applies
# bias+ReLU, the 128->1 head (VPU mul + lane reduce), and the sigmoid.
# ---------------------------------------------------------------------------
def convnet_kernel(p_ref, wblk_ref, bc_ref, w1_ref, b1_ref, w2_ref, b2_ref,
                   o_ref, feat_ref, acc_ref):
    g = pl.program_id(0)
    batch = p_ref.shape[0]

    @pl.when(g == 0)
    def _():
        acc_ref[...] = jnp.zeros_like(acc_ref)
        wb = wblk_ref[...]                                        # (128, 36)
        bc = bc_ref[...]                                          # (32, 1)
        for b in range(batch):
            s = jnp.dot(wb, p_ref[b],
                        preferred_element_type=jnp.float32)       # (128, 400) MXU
            m = s[0:C_OUT, :]                                     # max over 4 pool pos
            for p in range(1, 4):
                m = jnp.maximum(m, s[p * C_OUT:(p + 1) * C_OUT, :])
            act = jnp.maximum(m + bc, 0.0)                        # (32, 400) bias+ReLU
            for cg in range(C_GROUPS):
                feat_ref[cg, b, :, :] = act[cg * C_PER_GROUP:(cg + 1) * C_PER_GROUP, :]

    # Accumulate this channel group's contribution to Linear(12800, 128).
    xg = feat_ref[g]                                              # (B, 16, 400) f32
    partial = None
    for c in range(C_PER_GROUP):
        d = jnp.dot(xg[:, c, :].astype(jnp.bfloat16), w1_ref[c],
                    preferred_element_type=jnp.float32)           # (B, 128)
        partial = d if partial is None else partial + d
    acc_ref[...] += partial

    @pl.when(g == pl.num_programs(0) - 1)
    def _():
        h = jnp.maximum(acc_ref[...] + b1_ref[...], 0.0)                      # (B,128)
        z = jnp.sum(h * w2_ref[...], axis=-1, keepdims=True) + b2_ref[...]    # (B,1)
        o_ref[...] = 1.0 / (1.0 + jnp.exp(-z))


def convnet_pallas(patches, wblk, bc2d, w1g, b1r, w2r, b2r):
    b = patches.shape[0]
    return pl.pallas_call(
        convnet_kernel,
        out_shape=jax.ShapeDtypeStruct((b, 1), jnp.float32),
        grid=(C_GROUPS,),
        in_specs=[
            pl.BlockSpec((b, 36, HW), lambda g: (0, 0, 0)),            # patches
            pl.BlockSpec((4 * C_OUT, 36), lambda g: (0, 0)),           # wblk
            pl.BlockSpec((C_OUT, 1), lambda g: (0, 0)),                # conv bias
            pl.BlockSpec((C_PER_GROUP, HW, FC_HID), lambda g: (g, 0, 0)),  # w1 (bf16)
            pl.BlockSpec((1, FC_HID), lambda g: (0, 0)),               # b1
            pl.BlockSpec((1, FC_HID), lambda g: (0, 0)),               # w2 row
            pl.BlockSpec((1, 1), lambda g: (0, 0)),                    # b2
        ],
        out_specs=pl.BlockSpec((b, 1), lambda g: (0, 0)),
        scratch_shapes=[
            pltpu.VMEM((C_GROUPS, b, C_PER_GROUP, HW), jnp.float32),   # conv features
            pltpu.VMEM((b, FC_HID), jnp.float32),                      # FC1 accumulator
        ],
        compiler_params=pltpu.CompilerParams(
            dimension_semantics=("arbitrary",)),
    )(patches, wblk, bc2d, w1g, b1r, w2r, b2r)


# ---------------------------------------------------------------------------
# One-time weight preparation (outside the jitted forward): transposes, the
# block-diagonal conv packing, and the bf16 cast of w1 happen once, never per call.
# ---------------------------------------------------------------------------
def prepare_params(wc, bc, w1, b1, w2, b2):
    # wc: (32,1,3,3)  bc: (32,)  w1: (128,12800)  b1: (128,)  w2: (1,128)  b2: (1,)
    w9 = wc.reshape(C_OUT, 9).astype(jnp.float32)                     # (32, 9)
    wblk = jnp.kron(jnp.eye(4, dtype=jnp.float32), w9)                # (128, 36) block-diag
    # w1g[c, hw, h] = w1[h, c*400 + hw]  (torch CHW flatten order), stored bf16.
    w1g = w1.astype(jnp.float32).T.reshape(C_OUT, HW, FC_HID).astype(jnp.bfloat16)
    return (wblk,
            bc.reshape(C_OUT, 1).astype(jnp.float32),
            w1g,
            b1.reshape(1, FC_HID).astype(jnp.float32),
            w2.reshape(1, FC_HID).astype(jnp.float32),
            b2.reshape(1, 1).astype(jnp.float32))


# ---------------------------------------------------------------------------
# Full forward. XLA glue = pad + strided-slice im2col (lane-dense layout) only.
# ---------------------------------------------------------------------------
@jax.jit
def convnet_forward(x, wblk, bc2d, w1g, b1r, w2r, b2r):
    # x: (B, 1, 40, 40) NCHW
    b = x.shape[0]
    xp = jnp.pad(x[:, 0], ((0, 0), (1, 1), (1, 1)))                   # (B, 42, 42)

    # im2col: patches[b, p*9+k, i*20+j] = xp[b, 2i+ph+dh, 2j+pw+dw],  p = ph*2+pw
    rows = []
    for ph in range(2):
        for pw in range(2):
            for dh in range(3):
                for dw in range(3):
                    rows.append(
                        xp[:, ph + dh:ph + dh + 2 * HO:2,
                              pw + dw:pw + dw + 2 * WO:2].reshape(b, HW))
    patches = jnp.stack(rows, axis=1)                                 # (B, 36, 400)

    return convnet_pallas(patches, wblk, bc2d, w1g, b1r, w2r, b2r)    # (B, 1)


# Pure-JAX reference mimicking the PyTorch ops (for correctness check only).
def reference_forward(x, wc, bc, w1, b1, w2, b2):
    y = jax.lax.conv_general_dilated(
        x, wc, window_strides=(1, 1), padding=((1, 1), (1, 1)),
        dimension_numbers=("NCHW", "OIHW", "NCHW"))
    y = jnp.maximum(y + bc.reshape(1, C_OUT, 1, 1), 0.0)
    y = jax.lax.reduce_window(y, -jnp.inf, jax.lax.max,
                              (1, 1, 2, 2), (1, 1, 2, 2), "VALID")
    f = y.reshape(y.shape[0], -1)
    h = jnp.maximum(f @ w1.T + b1, 0.0)
    z = h @ w2.T + b2
    return 1.0 / (1.0 + jnp.exp(-z))


if __name__ == "__main__":
    key = jax.random.PRNGKey(0)
    kx, kcw, kcb, k1w, k1b, k2w, k2b = jax.random.split(key, 7)
    B = 2

    x = jax.random.normal(kx, (B, 1, 40, 40), jnp.float32)
    # deterministic synthetic params, torch-style shapes & rough torch init scales
    wc = jax.random.uniform(kcw, (C_OUT, 1, 3, 3), jnp.float32, -1 / 3, 1 / 3)
    bc = jax.random.uniform(kcb, (C_OUT,), jnp.float32, -1 / 3, 1 / 3)
    w1 = jax.random.uniform(k1w, (FC_HID, FC_IN), jnp.float32, -0.0088, 0.0088)
    b1 = jax.random.uniform(k1b, (FC_HID,), jnp.float32, -0.0088, 0.0088)
    w2 = jax.random.uniform(k2w, (1, FC_HID), jnp.float32, -0.088, 0.088)
    b2 = jax.random.uniform(k2b, (1,), jnp.float32, -0.088, 0.088)

    # weight prep once, outside the forward
    params = prepare_params(wc, bc, w1, b1, w2, b2)
    params = jax.block_until_ready(params)

    out = convnet_forward(x, *params)
    out = jax.block_until_ready(out)
    assert out.shape == (B, 1)

    ref = reference_forward(x, wc, bc, w1, b1, w2, b2)
    np.testing.assert_allclose(np.asarray(out), np.asarray(ref), rtol=5e-3, atol=5e-3)

    print("KERNEL_OK")
</pallas_src>

<mosaic_0001>
module attributes {stable_mosaic.version = 11 : i64} {
  func.func @convnet_kernel(%arg0: i32, %arg1: memref<2x36x400xf32, #tpu.memory_space<vmem>>, %arg2: memref<128x36xf32, #tpu.memory_space<vmem>>, %arg3: memref<32x1xf32, #tpu.memory_space<vmem>>, %arg4: memref<16x400x128xbf16, #tpu.memory_space<vmem>>, %arg5: memref<1x128xf32, #tpu.memory_space<vmem>>, %arg6: memref<1x128xf32, #tpu.memory_space<vmem>>, %arg7: memref<1x1xf32, #tpu.memory_space<vmem>>, %arg8: memref<2x1xf32, #tpu.memory_space<vmem>>, %arg9: memref<2x2x16x400xf32, #tpu.memory_space<vmem>>, %arg10: memref<2x128xf32, #tpu.memory_space<vmem>>) attributes {dimension_semantics = [#tpu.dimension_semantics<arbitrary>], iteration_bounds = array<i64: 2>, scalar_prefetch = 0 : i64, scratch_operands = 2 : i64, tpu.core_type = #tpu.core_type<tc>, window_params = [{pipeline_mode = #tpu.pipeline_mode<synchronous>, transform_indices = @transform_0, window_bounds = array<i64: 2, 36, 400>}, {pipeline_mode = #tpu.pipeline_mode<synchronous>, transform_indices = @transform_1, window_bounds = array<i64: 128, 36>}, {pipeline_mode = #tpu.pipeline_mode<synchronous>, transform_indices = @transform_2, window_bounds = array<i64: 32, 1>}, {transform_indices = @transform_3, window_bounds = array<i64: 16, 400, 128>}, {pipeline_mode = #tpu.pipeline_mode<synchronous>, transform_indices = @transform_4, window_bounds = array<i64: 1, 128>}, {pipeline_mode = #tpu.pipeline_mode<synchronous>, transform_indices = @transform_5, window_bounds = array<i64: 1, 128>}, {pipeline_mode = #tpu.pipeline_mode<synchronous>, transform_indices = @transform_6, window_bounds = array<i64: 1, 1>}, {pipeline_mode = #tpu.pipeline_mode<synchronous>, transform_indices = @transform_7, window_bounds = array<i64: 2, 1>}]} {
    %c0_i32 = arith.constant 0 : i32
    %0 = arith.cmpi eq, %arg0, %c0_i32 : i32
    %1 = arith.extui %0 : i1 to i32
    %c0_i32_0 = arith.constant 0 : i32
    %2 = arith.cmpi ne, %1, %c0_i32_0 : i32
    scf.if %2 {
      %cst_56 = arith.constant 0.000000e+00 : f32
      %123 = vector.broadcast %cst_56 : f32 to vector<2x128xf32>
      %c0_57 = arith.constant 0 : index
      %c0_58 = arith.constant 0 : index
      %124 = vector.load %arg10[%c0_57, %c0_58] : memref<2x128xf32, #tpu.memory_space<vmem>>, vector<2x128xf32>
      tpu.vector_store %arg10[%c0_57, %c0_58], %123 {strides = array<i32>} : memref<2x128xf32, #tpu.memory_space<vmem>>, vector<2x128xf32>,
      %c0_59 = arith.constant 0 : index
      %c0_60 = arith.constant 0 : index
      %125 = vector.load %arg2[%c0_59, %c0_60] : memref<128x36xf32, #tpu.memory_space<vmem>>, vector<128x36xf32>
      %c0_61 = arith.constant 0 : index
      %c0_62 = arith.constant 0 : index
      %126 = vector.load %arg3[%c0_61, %c0_62] : memref<32x1xf32, #tpu.memory_space<vmem>>, vector<32x1xf32>
      %c0_63 = arith.constant 0 : index
      %c0_64 = arith.constant 0 : index
      %c0_65 = arith.constant 0 : index
      %127 = vector.load %arg1[%c0_63, %c0_64, %c0_65] : memref<2x36x400xf32, #tpu.memory_space<vmem>>, vector<1x36x400xf32>
      %128 = vector.shape_cast %127 : vector<1x36x400xf32> to vector<36x400xf32>
      %cst_66 = arith.constant dense<0.000000e+00> : vector<128x400xf32>
      %129 = tpu.matmul %125, %128, %cst_66 {dimension_numbers = #tpu.dot_dimension_numbers<[1], [0], [0], [1], [0, 0, 1, 1], [], []>} : vector<128x36xf32>, vector<36x400xf32>, vector<128x400xf32> -> vector<128x400xf32>
      %130 = vector.extract_strided_slice %129 {offsets = [0, 0], sizes = [32, 400], strides = [1, 1]} : vector<128x400xf32> to vector<32x400xf32>
      %131 = vector.extract_strided_slice %129 {offsets = [32, 0], sizes = [32, 400], strides = [1, 1]} : vector<128x400xf32> to vector<32x400xf32>
      %132 = arith.maximumf %130, %131 : vector<32x400xf32>
      %133 = vector.extract_strided_slice %129 {offsets = [64, 0], sizes = [32, 400], strides = [1, 1]} : vector<128x400xf32> to vector<32x400xf32>
      %134 = arith.maximumf %132, %133 : vector<32x400xf32>
      %135 = vector.extract_strided_slice %129 {offsets = [96, 0], sizes = [32, 400], strides = [1, 1]} : vector<128x400xf32> to vector<32x400xf32>
      %136 = arith.maximumf %134, %135 : vector<32x400xf32>
      %137 = vector.broadcast %126 : vector<32x1xf32> to vector<32x400xf32>
      %138 = arith.addf %136, %137 : vector<32x400xf32>
      %cst_67 = arith.constant 0.000000e+00 : f32
      %139 = vector.broadcast %cst_67 : f32 to vector<32x400xf32>
      %140 = arith.maximumf %138, %139 : vector<32x400xf32>
      %141 = vector.extract_strided_slice %140 {offsets = [0, 0], sizes = [16, 400], strides = [1, 1]} : vector<32x400xf32> to vector<16x400xf32>
      %c0_68 = arith.constant 0 : index
      %c0_69 = arith.constant 0 : index
      %c0_70 = arith.constant 0 : index
      %c0_71 = arith.constant 0 : index
      %142 = vector.load %arg9[%c0_68, %c0_69, %c0_70, %c0_71] : memref<2x2x16x400xf32, #tpu.memory_space<vmem>>, vector<1x1x16x400xf32>
      %143 = vector.shape_cast %142 : vector<1x1x16x400xf32> to vector<16x400xf32>
      %144 = vector.shape_cast %141 : vector<16x400xf32> to vector<1x1x16x400xf32>
      tpu.vector_store %arg9[%c0_68, %c0_69, %c0_70, %c0_71], %144 {strides = array<i32>} : memref<2x2x16x400xf32, #tpu.memory_space<vmem>>, vector<1x1x16x400xf32>,
      %145 = vector.extract_strided_slice %140 {offsets = [16, 0], sizes = [16, 400], strides = [1, 1]} : vector<32x400xf32> to vector<16x400xf32>
      %c1_72 = arith.constant 1 : index
      %c0_73 = arith.constant 0 : index
      %c0_74 = arith.constant 0 : index
      %c0_75 = arith.constant 0 : index
      %146 = vector.load %arg9[%c1_72, %c0_73, %c0_74, %c0_75] : memref<2x2x16x400xf32, #tpu.memory_space<vmem>>, vector<1x1x16x400xf32>
      %147 = vector.shape_cast %146 : vector<1x1x16x400xf32> to vector<16x400xf32>
      %148 = vector.shape_cast %145 : vector<16x400xf32> to vector<1x1x16x400xf32>
      tpu.vector_store %arg9[%c1_72, %c0_73, %c0_74, %c0_75], %148 {strides = array<i32>} : memref<2x2x16x400xf32, #tpu.memory_space<vmem>>, vector<1x1x16x400xf32>,
      %c1_76 = arith.constant 1 : index
      %c0_77 = arith.constant 0 : index
      %c0_78 = arith.constant 0 : index
      %149 = vector.load %arg1[%c1_76, %c0_77, %c0_78] : memref<2x36x400xf32, #tpu.memory_space<vmem>>, vector<1x36x400xf32>
      %150 = vector.shape_cast %149 : vector<1x36x400xf32> to vector<36x400xf32>
      %cst_79 = arith.constant dense<0.000000e+00> : vector<128x400xf32>
      %151 = tpu.matmul %125, %150, %cst_79 {dimension_numbers = #tpu.dot_dimension_numbers<[1], [0], [0], [1], [0, 0, 1, 1], [], []>} : vector<128x36xf32>, vector<36x400xf32>, vector<128x400xf32> -> vector<128x400xf32>
      %152 = vector.extract_strided_slice %151 {offsets = [0, 0], sizes = [32, 400], strides = [1, 1]} : vector<128x400xf32> to vector<32x400xf32>
      %153 = vector.extract_strided_slice %151 {offsets = [32, 0], sizes = [32, 400], strides = [1, 1]} : vector<128x400xf32> to vector<32x400xf32>
      %154 = arith.maximumf %152, %153 : vector<32x400xf32>
      %155 = vector.extract_strided_slice %151 {offsets = [64, 0], sizes = [32, 400], strides = [1, 1]} : vector<128x400xf32> to vector<32x400xf32>
      %156 = arith.maximumf %154, %155 : vector<32x400xf32>
      %157 = vector.extract_strided_slice %151 {offsets = [96, 0], sizes = [32, 400], strides = [1, 1]} : vector<128x400xf32> to vector<32x400xf32>
      %158 = arith.maximumf %156, %157 : vector<32x400xf32>
      %159 = vector.broadcast %126 : vector<32x1xf32> to vector<32x400xf32>
      %160 = arith.addf %158, %159 : vector<32x400xf32>
      %cst_80 = arith.constant 0.000000e+00 : f32
      %161 = vector.broadcast %cst_80 : f32 to vector<32x400xf32>
      %162 = arith.maximumf %160, %161 : vector<32x400xf32>
      %163 = vector.extract_strided_slice %162 {offsets = [0, 0], sizes = [16, 400], strides = [1, 1]} : vector<32x400xf32> to vector<16x400xf32>
      %c0_81 = arith.constant 0 : index
      %c1_82 = arith.constant 1 : index
      %c0_83 = arith.constant 0 : index
      %c0_84 = arith.constant 0 : index
      %164 = vector.load %arg9[%c0_81, %c1_82, %c0_83, %c0_84] : memref<2x2x16x400xf32, #tpu.memory_space<vmem>>, vector<1x1x16x400xf32>
      %165 = vector.shape_cast %164 : vector<1x1x16x400xf32> to vector<16x400xf32>
      %166 = vector.shape_cast %163 : vector<16x400xf32> to vector<1x1x16x400xf32>
      tpu.vector_store %arg9[%c0_81, %c1_82, %c0_83, %c0_84], %166 {strides = array<i32>} : memref<2x2x16x400xf32, #tpu.memory_space<vmem>>, vector<1x1x16x400xf32>,
      %167 = vector.extract_strided_slice %162 {offsets = [16, 0], sizes = [16, 400], strides = [1, 1]} : vector<32x400xf32> to vector<16x400xf32>
      %c1_85 = arith.constant 1 : index
      %c1_86 = arith.constant 1 : index
      %c0_87 = arith.constant 0 : index
      %c0_88 = arith.constant 0 : index
      %168 = vector.load %arg9[%c1_85, %c1_86, %c0_87, %c0_88] : memref<2x2x16x400xf32, #tpu.memory_space<vmem>>, vector<1x1x16x400xf32>
      %169 = vector.shape_cast %168 : vector<1x1x16x400xf32> to vector<16x400xf32>
      %170 = vector.shape_cast %167 : vector<16x400xf32> to vector<1x1x16x400xf32>
      tpu.vector_store %arg9[%c1_85, %c1_86, %c0_87, %c0_88], %170 {strides = array<i32>} : memref<2x2x16x400xf32, #tpu.memory_space<vmem>>, vector<1x1x16x400xf32>,
    } else {
    }
    %3 = arith.index_cast %arg0 : i32 to index
    %c0 = arith.constant 0 : index
    %c0_1 = arith.constant 0 : index
    %c0_2 = arith.constant 0 : index
    %4 = vector.load %arg9[%3, %c0, %c0_1, %c0_2] : memref<2x2x16x400xf32, #tpu.memory_space<vmem>>, vector<1x2x16x400xf32>
    %5 = vector.shape_cast %4 : vector<1x2x16x400xf32> to vector<2x16x400xf32>
    %6 = vector.extract_strided_slice %5 {offsets = [0, 0, 0], sizes = [2, 1, 400], strides = [1, 1, 1]} : vector<2x16x400xf32> to vector<2x1x400xf32>
    %7 = vector.shape_cast %6 : vector<2x1x400xf32> to vector<2x400xf32>
    %8 = arith.truncf %7 : vector<2x400xf32> to vector<2x400xbf16>
    %c0_3 = arith.constant 0 : index
    %c0_4 = arith.constant 0 : index
    %c0_5 = arith.constant 0 : index
    %9 = vector.load %arg4[%c0_3, %c0_4, %c0_5] : memref<16x400x128xbf16, #tpu.memory_space<vmem>>, vector<1x400x128xbf16>
    %10 = vector.shape_cast %9 : vector<1x400x128xbf16> to vector<400x128xbf16>
    %cst = arith.constant dense<0.000000e+00> : vector<2x128xf32>
    %11 = tpu.matmul %8, %10, %cst {dimension_numbers = #tpu.dot_dimension_numbers<[1], [0], [0], [1], [0, 0, 1, 1], [], []>} : vector<2x400xbf16>, vector<400x128xbf16>, vector<2x128xf32> -> vector<2x128xf32>
    %12 = vector.extract_strided_slice %5 {offsets = [0, 1, 0], sizes = [2, 1, 400], strides = [1, 1, 1]} : vector<2x16x400xf32> to vector<2x1x400xf32>
    %13 = vector.shape_cast %12 : vector<2x1x400xf32> to vector<2x400xf32>
    %14 = arith.truncf %13 : vector<2x400xf32> to vector<2x400xbf16>
    %c1 = arith.constant 1 : index
    %c0_6 = arith.constant 0 : index
    %c0_7 = arith.constant 0 : index
    %15 = vector.load %arg4[%c1, %c0_6, %c0_7] : memref<16x400x128xbf16, #tpu.memory_space<vmem>>, vector<1x400x128xbf16>
    %16 = vector.shape_cast %15 : vector<1x400x128xbf16> to vector<400x128xbf16>
    %cst_8 = arith.constant dense<0.000000e+00> : vector<2x128xf32>
    %17 = tpu.matmul %14, %16, %cst_8 {dimension_numbers = #tpu.dot_dimension_numbers<[1], [0], [0], [1], [0, 0, 1, 1], [], []>} : vector<2x400xbf16>, vector<400x128xbf16>, vector<2x128xf32> -> vector<2x128xf32>
    %18 = arith.addf %11, %17 : vector<2x128xf32>
    %19 = vector.extract_strided_slice %5 {offsets = [0, 2, 0], sizes = [2, 1, 400], strides = [1, 1, 1]} : vector<2x16x400xf32> to vector<2x1x400xf32>
    %20 = vector.shape_cast %19 : vector<2x1x400xf32> to vector<2x400xf32>
    %21 = arith.truncf %20 : vector<2x400xf32> to vector<2x400xbf16>
    %c2 = arith.constant 2 : index
    %c0_9 = arith.constant 0 : index
    %c0_10 = arith.constant 0 : index
    %22 = vector.load %arg4[%c2, %c0_9, %c0_10] : memref<16x400x128xbf16, #tpu.memory_space<vmem>>, vector<1x400x128xbf16>
    %23 = vector.shape_cast %22 : vector<1x400x128xbf16> to vector<400x128xbf16>
    %cst_11 = arith.constant dense<0.000000e+00> : vector<2x128xf32>
    %24 = tpu.matmul %21, %23, %cst_11 {dimension_numbers = #tpu.dot_dimension_numbers<[1], [0], [0], [1], [0, 0, 1, 1], [], []>} : vector<2x400xbf16>, vector<400x128xbf16>, vector<2x128xf32> -> vector<2x128xf32>
    %25 = arith.addf %18, %24 : vector<2x128xf32>
    %26 = vector.extract_strided_slice %5 {offsets = [0, 3, 0], sizes = [2, 1, 400], strides = [1, 1, 1]} : vector<2x16x400xf32> to vector<2x1x400xf32>
    %27 = vector.shape_cast %26 : vector<2x1x400xf32> to vector<2x400xf32>
    %28 = arith.truncf %27 : vector<2x400xf32> to vector<2x400xbf16>
    %c3 = arith.constant 3 : index
    %c0_12 = arith.constant 0 : index
    %c0_13 = arith.constant 0 : index
    %29 = vector.load %arg4[%c3, %c0_12, %c0_13] : memref<16x400x128xbf16, #tpu.memory_space<vmem>>, vector<1x400x128xbf16>
    %30 = vector.shape_cast %29 : vector<1x400x128xbf16> to vector<400x128xbf16>
    %cst_14 = arith.constant dense<0.000000e+00> : vector<2x128xf32>
    %31 = tpu.matmul %28, %30, %cst_14 {dimension_numbers = #tpu.dot_dimension_numbers<[1], [0], [0], [1], [0, 0, 1, 1], [], []>} : vector<2x400xbf16>, vector<400x128xbf16>, vector<2x128xf32> -> vector<2x128xf32>
    %32 = arith.addf %25, %31 : vector<2x128xf32>
    %33 = vector.extract_strided_slice %5 {offsets = [0, 4, 0], sizes = [2, 1, 400], strides = [1, 1, 1]} : vector<2x16x400xf32> to vector<2x1x400xf32>
    %34 = vector.shape_cast %33 : vector<2x1x400xf32> to vector<2x400xf32>
    %35 = arith.truncf %34 : vector<2x400xf32> to vector<2x400xbf16>
    %c4 = arith.constant 4 : index
    %c0_15 = arith.constant 0 : index
    %c0_16 = arith.constant 0 : index
    %36 = vector.load %arg4[%c4, %c0_15, %c0_16] : memref<16x400x128xbf16, #tpu.memory_space<vmem>>, vector<1x400x128xbf16>
    %37 = vector.shape_cast %36 : vector<1x400x128xbf16> to vector<400x128xbf16>
    %cst_17 = arith.constant dense<0.000000e+00> : vector<2x128xf32>
    %38 = tpu.matmul %35, %37, %cst_17 {dimension_numbers = #tpu.dot_dimension_numbers<[1], [0], [0], [1], [0, 0, 1, 1], [], []>} : vector<2x400xbf16>, vector<400x128xbf16>, vector<2x128xf32> -> vector<2x128xf32>
    %39 = arith.addf %32, %38 : vector<2x128xf32>
    %40 = vector.extract_strided_slice %5 {offsets = [0, 5, 0], sizes = [2, 1, 400], strides = [1, 1, 1]} : vector<2x16x400xf32> to vector<2x1x400xf32>
    %41 = vector.shape_cast %40 : vector<2x1x400xf32> to vector<2x400xf32>
    %42 = arith.truncf %41 : vector<2x400xf32> to vector<2x400xbf16>
    %c5 = arith.constant 5 : index
    %c0_18 = arith.constant 0 : index
    %c0_19 = arith.constant 0 : index
    %43 = vector.load %arg4[%c5, %c0_18, %c0_19] : memref<16x400x128xbf16, #tpu.memory_space<vmem>>, vector<1x400x128xbf16>
    %44 = vector.shape_cast %43 : vector<1x400x128xbf16> to vector<400x128xbf16>
    %cst_20 = arith.constant dense<0.000000e+00> : vector<2x128xf32>
    %45 = tpu.matmul %42, %44, %cst_20 {dimension_numbers = #tpu.dot_dimension_numbers<[1], [0], [0], [1], [0, 0, 1, 1], [], []>} : vector<2x400xbf16>, vector<400x128xbf16>, vector<2x128xf32> -> vector<2x128xf32>
    %46 = arith.addf %39, %45 : vector<2x128xf32>
    %47 = vector.extract_strided_slice %5 {offsets = [0, 6, 0], sizes = [2, 1, 400], strides = [1, 1, 1]} : vector<2x16x400xf32> to vector<2x1x400xf32>
    %48 = vector.shape_cast %47 : vector<2x1x400xf32> to vector<2x400xf32>
    %49 = arith.truncf %48 : vector<2x400xf32> to vector<2x400xbf16>
    %c6 = arith.constant 6 : index
    %c0_21 = arith.constant 0 : index
    %c0_22 = arith.constant 0 : index
    %50 = vector.load %arg4[%c6, %c0_21, %c0_22] : memref<16x400x128xbf16, #tpu.memory_space<vmem>>, vector<1x400x128xbf16>
    %51 = vector.shape_cast %50 : vector<1x400x128xbf16> to vector<400x128xbf16>
    %cst_23 = arith.constant dense<0.000000e+00> : vector<2x128xf32>
    %52 = tpu.matmul %49, %51, %cst_23 {dimension_numbers = #tpu.dot_dimension_numbers<[1], [0], [0], [1], [0, 0, 1, 1], [], []>} : vector<2x400xbf16>, vector<400x128xbf16>, vector<2x128xf32> -> vector<2x128xf32>
    %53 = arith.addf %46, %52 : vector<2x128xf32>
    %54 = vector.extract_strided_slice %5 {offsets = [0, 7, 0], sizes = [2, 1, 400], strides = [1, 1, 1]} : vector<2x16x400xf32> to vector<2x1x400xf32>
    %55 = vector.shape_cast %54 : vector<2x1x400xf32> to vector<2x400xf32>
    %56 = arith.truncf %55 : vector<2x400xf32> to vector<2x400xbf16>
    %c7 = arith.constant 7 : index
    %c0_24 = arith.constant 0 : index
    %c0_25 = arith.constant 0 : index
    %57 = vector.load %arg4[%c7, %c0_24, %c0_25] : memref<16x400x128xbf16, #tpu.memory_space<vmem>>, vector<1x400x128xbf16>
    %58 = vector.shape_cast %57 : vector<1x400x128xbf16> to vector<400x128xbf16>
    %cst_26 = arith.constant dense<0.000000e+00> : vector<2x128xf32>
    %59 = tpu.matmul %56, %58, %cst_26 {dimension_numbers = #tpu.dot_dimension_numbers<[1], [0], [0], [1], [0, 0, 1, 1], [], []>} : vector<2x400xbf16>, vector<400x128xbf16>, vector<2x128xf32> -> vector<2x128xf32>
    %60 = arith.addf %53, %59 : vector<2x128xf32>
    %61 = vector.extract_strided_slice %5 {offsets = [0, 8, 0], sizes = [2, 1, 400], strides = [1, 1, 1]} : vector<2x16x400xf32> to vector<2x1x400xf32>
    %62 = vector.shape_cast %61 : vector<2x1x400xf32> to vector<2x400xf32>
    %63 = arith.truncf %62 : vector<2x400xf32> to vector<2x400xbf16>
    %c8 = arith.constant 8 : index
    %c0_27 = arith.constant 0 : index
    %c0_28 = arith.constant 0 : index
    %64 = vector.load %arg4[%c8, %c0_27, %c0_28] : memref<16x400x128xbf16, #tpu.memory_space<vmem>>, vector<1x400x128xbf16>
    %65 = vector.shape_cast %64 : vector<1x400x128xbf16> to vector<400x128xbf16>
    %cst_29 = arith.constant dense<0.000000e+00> : vector<2x128xf32>
    %66 = tpu.matmul %63, %65, %cst_29 {dimension_numbers = #tpu.dot_dimension_numbers<[1], [0], [0], [1], [0, 0, 1, 1], [], []>} : vector<2x400xbf16>, vector<400x128xbf16>, vector<2x128xf32> -> vector<2x128xf32>
    %67 = arith.addf %60, %66 : vector<2x128xf32>
    %68 = vector.extract_strided_slice %5 {offsets = [0, 9, 0], sizes = [2, 1, 400], strides = [1, 1, 1]} : vector<2x16x400xf32> to vector<2x1x400xf32>
    %69 = vector.shape_cast %68 : vector<2x1x400xf32> to vector<2x400xf32>
    %70 = arith.truncf %69 : vector<2x400xf32> to vector<2x400xbf16>
    %c9 = arith.constant 9 : index
    %c0_30 = arith.constant 0 : index
    %c0_31 = arith.constant 0 : index
    %71 = vector.load %arg4[%c9, %c0_30, %c0_31] : memref<16x400x128xbf16, #tpu.memory_space<vmem>>, vector<1x400x128xbf16>
    %72 = vector.shape_cast %71 : vector<1x400x128xbf16> to vector<400x128xbf16>
    %cst_32 = arith.constant dense<0.000000e+00> : vector<2x128xf32>
    %73 = tpu.matmul %70, %72, %cst_32 {dimension_numbers = #tpu.dot_dimension_numbers<[1], [0], [0], [1], [0, 0, 1, 1], [], []>} : vector<2x400xbf16>, vector<400x128xbf16>, vector<2x128xf32> -> vector<2x128xf32>
    %74 = arith.addf %67, %73 : vector<2x128xf32>
    %75 = vector.extract_strided_slice %5 {offsets = [0, 10, 0], sizes = [2, 1, 400], strides = [1, 1, 1]} : vector<2x16x400xf32> to vector<2x1x400xf32>
    %76 = vector.shape_cast %75 : vector<2x1x400xf32> to vector<2x400xf32>
    %77 = arith.truncf %76 : vector<2x400xf32> to vector<2x400xbf16>
    %c10 = arith.constant 10 : index
    %c0_33 = arith.constant 0 : index
    %c0_34 = arith.constant 0 : index
    %78 = vector.load %arg4[%c10, %c0_33, %c0_34] : memref<16x400x128xbf16, #tpu.memory_space<vmem>>, vector<1x400x128xbf16>
    %79 = vector.shape_cast %78 : vector<1x400x128xbf16> to vector<400x128xbf16>
    %cst_35 = arith.constant dense<0.000000e+00> : vector<2x128xf32>
    %80 = tpu.matmul %77, %79, %cst_35 {dimension_numbers = #tpu.dot_dimension_numbers<[1], [0], [0], [1], [0, 0, 1, 1], [], []>} : vector<2x400xbf16>, vector<400x128xbf16>, vector<2x128xf32> -> vector<2x128xf32>
    %81 = arith.addf %74, %80 : vector<2x128xf32>
    %82 = vector.extract_strided_slice %5 {offsets = [0, 11, 0], sizes = [2, 1, 400], strides = [1, 1, 1]} : vector<2x16x400xf32> to vector<2x1x400xf32>
    %83 = vector.shape_cast %82 : vector<2x1x400xf32> to vector<2x400xf32>
    %84 = arith.truncf %83 : vector<2x400xf32> to vector<2x400xbf16>
    %c11 = arith.constant 11 : index
    %c0_36 = arith.constant 0 : index
    %c0_37 = arith.constant 0 : index
    %85 = vector.load %arg4[%c11, %c0_36, %c0_37] : memref<16x400x128xbf16, #tpu.memory_space<vmem>>, vector<1x400x128xbf16>
    %86 = vector.shape_cast %85 : vector<1x400x128xbf16> to vector<400x128xbf16>
    %cst_38 = arith.constant dense<0.000000e+00> : vector<2x128xf32>
    %87 = tpu.matmul %84, %86, %cst_38 {dimension_numbers = #tpu.dot_dimension_numbers<[1], [0], [0], [1], [0, 0, 1, 1], [], []>} : vector<2x400xbf16>, vector<400x128xbf16>, vector<2x128xf32> -> vector<2x128xf32>
    %88 = arith.addf %81, %87 : vector<2x128xf32>
    %89 = vector.extract_strided_slice %5 {offsets = [0, 12, 0], sizes = [2, 1, 400], strides = [1, 1, 1]} : vector<2x16x400xf32> to vector<2x1x400xf32>
    %90 = vector.shape_cast %89 : vector<2x1x400xf32> to vector<2x400xf32>
    %91 = arith.truncf %90 : vector<2x400xf32> to vector<2x400xbf16>
    %c12 = arith.constant 12 : index
    %c0_39 = arith.constant 0 : index
    %c0_40 = arith.constant 0 : index
    %92 = vector.load %arg4[%c12, %c0_39, %c0_40] : memref<16x400x128xbf16, #tpu.memory_space<vmem>>, vector<1x400x128xbf16>
    %93 = vector.shape_cast %92 : vector<1x400x128xbf16> to vector<400x128xbf16>
    %cst_41 = arith.constant dense<0.000000e+00> : vector<2x128xf32>
    %94 = tpu.matmul %91, %93, %cst_41 {dimension_numbers = #tpu.dot_dimension_numbers<[1], [0], [0], [1], [0, 0, 1, 1], [], []>} : vector<2x400xbf16>, vector<400x128xbf16>, vector<2x128xf32> -> vector<2x128xf32>
    %95 = arith.addf %88, %94 : vector<2x128xf32>
    %96 = vector.extract_strided_slice %5 {offsets = [0, 13, 0], sizes = [2, 1, 400], strides = [1, 1, 1]} : vector<2x16x400xf32> to vector<2x1x400xf32>
    %97 = vector.shape_cast %96 : vector<2x1x400xf32> to vector<2x400xf32>
    %98 = arith.truncf %97 : vector<2x400xf32> to vector<2x400xbf16>
    %c13 = arith.constant 13 : index
    %c0_42 = arith.constant 0 : index
    %c0_43 = arith.constant 0 : index
    %99 = vector.load %arg4[%c13, %c0_42, %c0_43] : memref<16x400x128xbf16, #tpu.memory_space<vmem>>, vector<1x400x128xbf16>
    %100 = vector.shape_cast %99 : vector<1x400x128xbf16> to vector<400x128xbf16>
    %cst_44 = arith.constant dense<0.000000e+00> : vector<2x128xf32>
    %101 = tpu.matmul %98, %100, %cst_44 {dimension_numbers = #tpu.dot_dimension_numbers<[1], [0], [0], [1], [0, 0, 1, 1], [], []>} : vector<2x400xbf16>, vector<400x128xbf16>, vector<2x128xf32> -> vector<2x128xf32>
    %102 = arith.addf %95, %101 : vector<2x128xf32>
    %103 = vector.extract_strided_slice %5 {offsets = [0, 14, 0], sizes = [2, 1, 400], strides = [1, 1, 1]} : vector<2x16x400xf32> to vector<2x1x400xf32>
    %104 = vector.shape_cast %103 : vector<2x1x400xf32> to vector<2x400xf32>
    %105 = arith.truncf %104 : vector<2x400xf32> to vector<2x400xbf16>
    %c14 = arith.constant 14 : index
    %c0_45 = arith.constant 0 : index
    %c0_46 = arith.constant 0 : index
    %106 = vector.load %arg4[%c14, %c0_45, %c0_46] : memref<16x400x128xbf16, #tpu.memory_space<vmem>>, vector<1x400x128xbf16>
    %107 = vector.shape_cast %106 : vector<1x400x128xbf16> to vector<400x128xbf16>
    %cst_47 = arith.constant dense<0.000000e+00> : vector<2x128xf32>
    %108 = tpu.matmul %105, %107, %cst_47 {dimension_numbers = #tpu.dot_dimension_numbers<[1], [0], [0], [1], [0, 0, 1, 1], [], []>} : vector<2x400xbf16>, vector<400x128xbf16>, vector<2x128xf32> -> vector<2x128xf32>
    %109 = arith.addf %102, %108 : vector<2x128xf32>
    %110 = vector.extract_strided_slice %5 {offsets = [0, 15, 0], sizes = [2, 1, 400], strides = [1, 1, 1]} : vector<2x16x400xf32> to vector<2x1x400xf32>
    %111 = vector.shape_cast %110 : vector<2x1x400xf32> to vector<2x400xf32>
    %112 = arith.truncf %111 : vector<2x400xf32> to vector<2x400xbf16>
    %c15 = arith.constant 15 : index
    %c0_48 = arith.constant 0 : index
    %c0_49 = arith.constant 0 : index
    %113 = vector.load %arg4[%c15, %c0_48, %c0_49] : memref<16x400x128xbf16, #tpu.memory_space<vmem>>, vector<1x400x128xbf16>
    %114 = vector.shape_cast %113 : vector<1x400x128xbf16> to vector<400x128xbf16>
    %cst_50 = arith.constant dense<0.000000e+00> : vector<2x128xf32>
    %115 = tpu.matmul %112, %114, %cst_50 {dimension_numbers = #tpu.dot_dimension_numbers<[1], [0], [0], [1], [0, 0, 1, 1], [], []>} : vector<2x400xbf16>, vector<400x128xbf16>, vector<2x128xf32> -> vector<2x128xf32>
    %116 = arith.addf %109, %115 : vector<2x128xf32>
    %c0_51 = arith.constant 0 : index
    %c0_52 = arith.constant 0 : index
    %117 = vector.load %arg10[%c0_51, %c0_52] : memref<2x128xf32, #tpu.memory_space<vmem>>, vector<2x128xf32>
    %118 = arith.addf %117, %116 : vector<2x128xf32>
    %c0_53 = arith.constant 0 : index
    %c0_54 = arith.constant 0 : index
    %119 = vector.load %arg10[%c0_53, %c0_54] : memref<2x128xf32, #tpu.memory_space<vmem>>, vector<2x128xf32>
    tpu.vector_store %arg10[%c0_53, %c0_54], %118 {strides = array<i32>} : memref<2x128xf32, #tpu.memory_space<vmem>>, vector<2x128xf32>,
    %c1_i32 = arith.constant 1 : i32
    %120 = arith.cmpi eq, %arg0, %c1_i32 : i32
    %121 = arith.extui %120 : i1 to i32
    %c0_i32_55 = arith.constant 0 : i32
    %122 = arith.cmpi ne, %121, %c0_i32_55 : i32
    scf.if %122 {
      %c0_56 = arith.constant 0 : index
      %c0_57 = arith.constant 0 : index
      %123 = vector.load %arg10[%c0_56, %c0_57] : memref<2x128xf32, #tpu.memory_space<vmem>>, vector<2x128xf32>
      %c0_58 = arith.constant 0 : index
      %c0_59 = arith.constant 0 : index
      %124 = vector.load %arg5[%c0_58, %c0_59] : memref<1x128xf32, #tpu.memory_space<vmem>>, vector<1x128xf32>
      %125 = vector.broadcast %124 : vector<1x128xf32> to vector<2x128xf32>
      %126 = arith.addf %123, %125 : vector<2x128xf32>
      %cst_60 = arith.constant 0.000000e+00 : f32
      %127 = vector.broadcast %cst_60 : f32 to vector<2x128xf32>
      %128 = arith.maximumf %126, %127 : vector<2x128xf32>
      %c0_61 = arith.constant 0 : index
      %c0_62 = arith.constant 0 : index
      %129 = vector.load %arg6[%c0_61, %c0_62] : memref<1x128xf32, #tpu.memory_space<vmem>>, vector<1x128xf32>
      %130 = vector.broadcast %129 : vector<1x128xf32> to vector<2x128xf32>
      %131 = arith.mulf %128, %130 : vector<2x128xf32>
      %cst_63 = arith.constant dense<0.000000e+00> : vector<2xf32>
      %132 = vector.multi_reduction <add>, %131, %cst_63 [1] : vector<2x128xf32> to vector<2xf32>
      %133 = vector.shape_cast %132 : vector<2xf32> to vector<2x1xf32>
      %c0_64 = arith.constant 0 : index
      %c0_65 = arith.constant 0 : index
      %134 = vector.load %arg7[%c0_64, %c0_65] : memref<1x1xf32, #tpu.memory_space<vmem>>, vector<1x1xf32>
      %135 = vector.broadcast %134 : vector<1x1xf32> to vector<2x1xf32>
      %136 = arith.addf %133, %135 : vector<2x1xf32>
      %cst_66 = arith.constant 0.000000e+00 : f32
      %137 = vector.broadcast %cst_66 : f32 to vector<2x1xf32>
      %138 = arith.subf %137, %136 : vector<2x1xf32>
      %139 = math.exp %138 : vector<2x1xf32>
      %cst_67 = arith.constant 1.000000e+00 : f32
      %140 = vector.broadcast %cst_67 : f32 to vector<2x1xf32>
      %141 = arith.addf %140, %139 : vector<2x1xf32>
      %cst_68 = arith.constant 1.000000e+00 : f32
      %142 = vector.broadcast %cst_68 : f32 to vector<2x1xf32>
      %143 = arith.divf %142, %141 : vector<2x1xf32>
      %c0_69 = arith.constant 0 : index
      %c0_70 = arith.constant 0 : index
      %144 = vector.load %arg8[%c0_69, %c0_70] : memref<2x1xf32, #tpu.memory_space<vmem>>, vector<2x1xf32>
      tpu.vector_store %arg8[%c0_69, %c0_70], %143 {strides = array<i32>} : memref<2x1xf32, #tpu.memory_space<vmem>>, vector<2x1xf32>,
    } else {
    }
    return
  }
  func.func @transform_0(%arg0: i32) -> (i32, i32, i32) {
    %c0_i32 = arith.constant 0 : i32
    %c0_i32_0 = arith.constant 0 : i32
    %c0_i32_1 = arith.constant 0 : i32
    %c0_i32_2 = arith.constant 0 : i32
    return %c0_i32, %c0_i32_0, %c0_i32_1 : i32, i32, i32
  }
  func.func @transform_1(%arg0: i32) -> (i32, i32) {
    %c0_i32 = arith.constant 0 : i32
    %c0_i32_0 = arith.constant 0 : i32
    %c0_i32_1 = arith.constant 0 : i32
    return %c0_i32, %c0_i32_0 : i32, i32
  }
  func.func @transform_2(%arg0: i32) -> (i32, i32) {
    %c0_i32 = arith.constant 0 : i32
    %c0_i32_0 = arith.constant 0 : i32
    %c0_i32_1 = arith.constant 0 : i32
    return %c0_i32, %c0_i32_0 : i32, i32
  }
  func.func @transform_3(%arg0: i32) -> (i32, i32, i32) {
    %c0_i32 = arith.constant 0 : i32
    %c0_i32_0 = arith.constant 0 : i32
    %c0_i32_1 = arith.constant 0 : i32
    return %arg0, %c0_i32, %c0_i32_0 : i32, i32, i32
  }
  func.func @transform_4(%arg0: i32) -> (i32, i32) {
    %c0_i32 = arith.constant 0 : i32
    %c0_i32_0 = arith.constant 0 : i32
    %c0_i32_1 = arith.constant 0 : i32
    return %c0_i32, %c0_i32_0 : i32, i32
  }
  func.func @transform_5(%arg0: i32) -> (i32, i32) {
    %c0_i32 = arith.constant 0 : i32
    %c0_i32_0 = arith.constant 0 : i32
    %c0_i32_1 = arith.constant 0 : i32
    return %c0_i32, %c0_i32_0 : i32, i32
  }
  func.func @transform_6(%arg0: i32) -> (i32, i32) {
    %c0_i32 = arith.constant 0 : i32
    %c0_i32_0 = arith.constant 0 : i32
    %c0_i32_1 = arith.constant 0 : i32
    return %c0_i32, %c0_i32_0 : i32, i32
  }
  func.func @transform_7(%arg0: i32) -> (i32, i32) {
    %c0_i32 = arith.constant 0 : i32
    %c0_i32_0 = arith.constant 0 : i32
    %c0_i32_1 = arith.constant 0 : i32
    return %c0_i32, %c0_i32_0 : i32, i32
  }
}

</mosaic_0001>

<bundles_post_ra>
// kernel: convnet_forward.1
= control target key start
LH: loop header
LB: loop body
LE: loop exit
PB: predicated region body
PF: predicated region fallthrough
CT: control target
= control target key end

     0   :  { %s10191_s0 = inlined_call_operand.vmem [shape: f32[2,36,400], index: 0, kind: input, shape index: {}]   ;;  %s10192_s1 = inlined_call_operand.vmem [shape: f32[128,36], index: 1, kind: input, shape index: {}]   ;;  %s10193_s2 = inlined_call_operand.vmem [shape: f32[32,1], index: 2, kind: input, shape index: {}]   ;;  %s10194_s3 = inlined_call_operand.hbm [shape: bf16[32,400,128], index: 3, kind: input, shape index: {}]   ;;  %s10195_s4 = inlined_call_operand.hbm [shape: f32[1,128], index: 4, kind: input, shape index: {}]   ;;  %s10196_s5 = inlined_call_operand.hbm [shape: f32[1,128], index: 5, kind: input, shape index: {}]   ;;  %s10197_s6 = inlined_call_operand.<no memory space> [shape: f32[1,1], index: 6, kind: input, shape index: {}]   ;;  %s10198_s7 = inlined_call_operand.vmem [shape: f32[2,1], index: 7, kind: output, shape index: {}]  }
   0x1   :  { %v12_v0 = vstv %s10197_s6 }
   0x2   :  { %13 = vst [vmem:[#allocation4] sm:$0x1] %v12_v0 }
   0x3   :  { %14 = vsyncpa [#allocation6], 0 }
   0x4   :  { %16 = vsyncpa [#allocation6 + $0x1], 0 }
   0x5   :  { %17 = vsyncpa [#allocation8], 0  ;;  %s8647_s26 = smov 0   ;;  %s8649_s27 = smov 0  }
   0x6   :  { %s8651_s28 = smov 0   ;;  %s8653_s29 = smov 0  }
   0x7 LB: > { %s8666_s6 = sadd.s32 4294967295, %s8594_s29   ;;  %s8669_s30 = sadd.s32 1, %s8594_s29   ;;  %s8594_s29 = sphi %s8653_s29, %s10217_s29   ;;  %s8590_s28 = sphi %s8651_s28, %s10216_s28   ;;  %s8586_s27 = sphi %s8649_s27, %s10215_s27   ;;  %s8582_s26 = sphi %s8647_s26, %s10214_s26  }
   0x8   : > { %s90_s8 = ssub.s32 %s8594_s29, %s8669_s30  ;;  %s93_s9 = sadd.s32 1, %s8590_s28 }
   0x9   : > { %p91_p0 = scmp.eq.s32.totalorder %s90_s8, 0  ;;  %p100_p1 = scmp.ne.s32.totalorder %s8590_s28, %s8586_s27 }
   0xa   : > { %p101_p2 = scmp.eq.s32.totalorder %s8594_s29, 0  ;;  %p106_p3 = scmp.ne.s32.totalorder %s8586_s27, %s8582_s26 }
   0xb   : > { %s8679_s10 = scalar_select %p91_p0, %s8590_s28, %s93_s9  }
   0xc   : > { %p8681_p4 = por %p101_p2, %p100_p1  ;;  %p10199_p5 = scmp.eq.s32.totalorder %s8666_s6, 0 }
   0xd   : > { %p6334_p6 = scmp.ge.s32.totalorder %s8594_s29, 1  ;;  %p201_p7 = scmp.lt.s32.totalorder %s8594_s29, 3 }
   0xe   : > { %p8690_p8 = por %p10199_p5, %p106_p3  ;;  %s8596_s14 = smov [#allocation7]  }
   0xf   : > { %p8695_p10 = pnand %p6334_p6, %p201_p7  ;;  %s223_s15 = sshll.u32 %s8596_s14, 4  ;;  %s224_s15 = int_to_ptr.vmem [resolvable:$true] %s223_s15 }
  0x10   : > { %s10204_s12 = scalar_select %p8690_p8, 1, 0 }
  0x11   : > { %s10205_s13 = scalar_select %p8695_p10, 1, 0 }
  0x12   : > { %p8009_p11 = pneg %p8695_p10  ;;  %p8022_p12 = scmp.lt.s32.totalorder %s8594_s29, 2 }
  0x13   : > { %s8597_s17 = smov [#allocation9]   ;;  %s248_s20 = sand.u32 1, %s8590_s28  }
  0x14   : > { %p8704_p13 = pnand %p8009_p11, %p10199_p5  ;;  %s234_s18 = sshll.u32 %s8597_s17, 4  ;;  %s8714_s18 = int_to_ptr.vmem [resolvable:$true] %s234_s18 }
  0x15   : > { %p8710_p0 = pnand %p8022_p12, %p8681_p4  ;;  %s8470_s23 = scalar_lea.hbm %s10195_s4, 16 }
  0x16   : > { %p8471_p1 = scmp.ne.s32.totalorder %s10195_s4, %s8470_s23  ;;  %p8472_p2 = pneg %p8704_p13 }
  0x17   : > { %s10207_s19 = scalar_select %p8710_p0, 1, 0 }
  0x18   : > { %p8473_p3 = pnand %p8472_p2, %p8471_p1  ;;  %p8477_p6 = scmp.lt.u32.totalorder %s8470_s23, %s10195_s4 }
  0x1a   : > { %p8474_p4 = pneg %p8473_p3 }
  0x1c   : > { %p8479_p7 = pnand %p8477_p6, %p8474_p4 }
  0x1e   : > { %8482 = shalt.err (!%p8479_p7)
}
  0x1f   : > { %s8483_s9 = scalar_lea.vmem %s224_s15, 16  ;;  %s8490_s11 = scalar_lea.vmem %s224_s15, 32 }
  0x20   : > { %p8484_p11 = scmp.ne.s32.totalorder %s224_s15, %s8483_s9  ;;  %p8491_p5 = scmp.lt.s32.totalorder %s224_s15, %s224_s15 }
  0x21   : > { %p8492_p8 = scmp.lt.s32.totalorder %s8490_s11, %s8483_s9 }
  0x22   : > { %p8486_p12 = pnand %p8484_p11, %p8472_p2 }
  0x23   : > { %p8493_p10 = por %p8492_p8, %p8491_p5 }
  0x24   : > { %p8487_p9 = pneg %p8486_p12 }
  0x26   : > { %p8494_p0 = pnand %p8493_p10, %p8487_p9 }
  0x28   : > { %8497 = shalt.err (!%p8494_p0)
}
  0x29   : > { %8012 = dma.hbm_to_vmem [thread:$0]  (!%p8704_p13), %s10195_s4, 16, %s224_s15, [#allocation8]  }
  0x2a   : > { %s8498_s23 = scalar_lea.hbm %s10196_s5, 16 }
  0x2b   : > { %p8499_p1 = scmp.ne.s32.totalorder %s10196_s5, %s8498_s23  ;;  %p8505_p9 = scmp.lt.u32.totalorder %s8498_s23, %s10196_s5 }
  0x2d   : > { %p8501_p5 = pnand %p8499_p1, %p8472_p2 }
  0x2f   : > { %p8502_p8 = pneg %p8501_p5 }
  0x31   : > { %p8507_p10 = pnand %p8505_p9, %p8502_p8 }
  0x33   : > { %8510 = shalt.err (!%p8507_p10)
}
  0x34   : > { %s8511_s15 = scalar_lea.vmem %s8714_s18, 16  ;;  %s8518_s9 = scalar_lea.vmem %s8714_s18, 32 }
  0x35   : > { %p8512_p0 = scmp.ne.s32.totalorder %s8714_s18, %s8511_s15  ;;  %p8519_p6 = scmp.lt.s32.totalorder %s8714_s18, %s8714_s18 }
  0x36   : > { %p8520_p7 = scmp.lt.s32.totalorder %s8518_s9, %s8511_s15 }
  0x37   : > { %p8514_p3 = pnand %p8512_p0, %p8472_p2 }
  0x38   : > { %p8521_p11 = por %p8520_p7, %p8519_p6 }
  0x39   : > { %p8515_p4 = pneg %p8514_p3 }
  0x3b   : > { %p8522_p12 = pnand %p8521_p11, %p8515_p4 }
  0x3d   : > { %8525 = shalt.err (!%p8522_p12)
}
  0x3e   : > { %8015 = dma.hbm_to_vmem [thread:$0]  (!%p8704_p13), %s10196_s5, 16, %s8714_s18, [#allocation8]  }
  0x3f   : > { %s7996_s17 = smul.u32 3200, %s248_s20  ;;  %s8777_s26 = scalar_lea.sflag [#allocation6], %s248_s20 }
  0x40   : > { %s7997_s21 = smul.u32 51200, %s8594_s29  ;;  %p10208_p2 = scmp.ne.s32.totalorder %s10207_s19, 0 }
  0x41   : > { %s252_s16 = scalar_lea.vmem [#allocation5], %s7996_s17  ;;  %s8531_s15 = scalar_lea.hbm %s10194_s3, 102400 }
  0x42   : > { %s8771_s24 = scalar_lea.hbm %s10194_s3, %s7997_s21  ;;  %s260_s25 = sshll.u32 %s252_s16, 4  ;;  %s8773_s25 = int_to_ptr.vmem [resolvable:$true] %s260_s25 }
  0x43   : > { %s8526_s18 = scalar_lea.hbm %s8771_s24, 51200  ;;  %p8528_p1 = pneg %p10208_p2 }
  0x44   : > { %p8527_p13 = scmp.ne.s32.totalorder %s8771_s24, %s8526_s18  ;;  %p8532_p9 = scmp.lt.u32.totalorder %s8771_s24, %s10194_s3 }
  0x45   : > { %p8533_p10 = scmp.lt.u32.totalorder %s8531_s15, %s8526_s18  ;;  %p8535_p3 = scmp.lt.u32.totalorder %s8526_s18, %s8771_s24 }
  0x46   : > { %p8529_p5 = pnand %p8528_p1, %p8527_p13 }
  0x47   : > { %p8534_p0 = por %p8533_p10, %p8532_p9 }
  0x48   : > { %p8530_p8 = pneg %p8529_p5 }
  0x49   : > { %p8536_p4 = por %p8535_p3, %p8534_p0 }
  0x4b   : > { %p8537_p6 = pnand %p8536_p4, %p8530_p8 }
  0x4d   : > { %8540 = shalt.err (!%p8537_p6)
}
  0x4e   : > { %s8541_s20 = scalar_lea.vmem %s8773_s25, 51200  ;;  %s8598_s14 = smov [#allocation5]  }
  0x4f   : > { %p8542_p7 = scmp.ne.s32.totalorder %s8773_s25, %s8541_s20  ;;  %s8546_s17 = sshll.u32 %s8598_s14, 4  ;;  %s8547_s17 = int_to_ptr.vmem [resolvable:$false] %s8546_s17 }
  0x50   : > { %s8548_s21 = scalar_lea.vmem %s8547_s17, 102400  ;;  %p8549_p13 = scmp.lt.s32.totalorder %s8773_s25, %s8547_s17 }
  0x51   : > { %p8544_p11 = pnand %p8542_p7, %p8528_p1  ;;  %p8550_p5 = scmp.lt.s32.totalorder %s8548_s21, %s8541_s20 }
  0x53   : > { %p8545_p12 = pneg %p8544_p11  ;;  %p8551_p9 = por %p8550_p5, %p8549_p13 }
  0x55   : > { %p8552_p10 = pnand %p8551_p9, %p8545_p12 }
  0x57   : > { %8555 = shalt.err (!%p8552_p10)
}
  0x58   : > { %s8599_s22 = smov 64   ;;  %s8600_s23 = smov 4  }
  0x59   : > { %8019 = dma.hbm_to_vmem [thread:$0]  (!%p10208_p2), %s8771_s24, 51200, %s8773_s25, %s8777_s26, %s8599_s22, %s8599_s22, %s8600_s23  }
  0x5a   : > { %p10209_p1 = scmp.ne.s32.totalorder %s10205_s13, 0 }
  0x5b   : > { %s274_s16 = sand.u32 (!%p10209_p1), 1, %s8586_s27   ;;  %p10210_p8 = scmp.ne.s32.totalorder (!%p10209_p1), %s10204_s12, 0 }
  0x5c   : > { %272 = sbr.rel (%p10209_p1) target bundleno = 1430 (0x596), region = 48  ;;  %s275_s29 = scalar_lea.sflag (!%p10209_p1), [#allocation6], %s274_s16 }
  0x5d   : > { %s7998_s18 = smul.u32 (!%p10209_p1), 3200, %s274_s16 }
  0x5f   : > { %s8808_s8 = scalar_lea.vmem (!%p10209_p1), [#allocation5], %s7998_s18 }
  0x63   : > { %8573 = dma.done.wait (%p10210_p8), %s275_s29, 51200  }
  0x64   : > { %8575 = vsyncadd (%p10210_p8), %s275_s29, 4294916096  ;;  %p10211_p0 = scmp.eq.s32.totalorder %s8666_s6, 0 }
  0x66   : > { %8577 = dma.done.wait (%p10211_p0), [#allocation8], 32   ;;  %p10212_p2 = pmov %p10211_p0 }
  0x67   : > { %p10213_p3 = scmp.ne.s32.totalorder %s8666_s6, 0 }
  0x68   : > { %8579 = vsyncadd (%p10212_p2), [#allocation8], 4294967264  ;;  %v340_v1 = vld [vmem:[%s10191_s0 + $0x8] sm:$0xff] (!%p10213_p3)  ;;  %v342_v3 = vld [vmem:[%s10191_s0 + $0x18] sm:$0xff] (!%p10213_p3)  ;;  %v8601_v8 = vmov (!%p10213_p3), 0.0   ;;  %vm408_vm0 = vcmask (!%p10213_p3), 1043456  }
  0x69   : > { %317 = sbr.rel (%p10213_p3) target bundleno = 463 (0x1cf), region = 64  ;;  %v344_v2 = vld [vmem:[%s10191_s0 + $0x28] sm:$0xff] (!%p10213_p3)  ;;  %v346_v5 = vld [vmem:[%s10191_s0 + $0x38] sm:$0xff] (!%p10213_p3)  ;;  %v339_v6 = vld [vmem:[%s10191_s0] sm:$0xff] (!%p10213_p3)  ;;  %318 = vst [vmem:[#allocation3] sm:$0x3] (!%p10213_p3), %v8601_v8  ;;  %485 = vmatprep.mubr.f32.mxu0 (!%p10213_p3), %v8601_v8  ;;  %646 = vmatprep.mubr.f32.mxu1 (!%p10213_p3), %v8601_v8 }
  0x6a   : > { %v7964_v4 = vpack.c.bf16 (!%p10213_p3), %v344_v2, %v340_v1  ;;  %v343_v7 = vld [vmem:[%s10191_s0 + $0x20] sm:$0xff] (!%p10213_p3)  ;;  %v7972_v9 = vpack.c.bf16 (!%p10213_p3), %v346_v5, %v342_v3  ;;  %v341_v11 = vld [vmem:[%s10191_s0 + $0x10] sm:$0xff] (!%p10213_p3)  ;;  %v348_v13 = vld [vmem:[%s10191_s0 + $0x48] sm:$0xff] (!%p10213_p3)  ;;  %vm359_vm1 = vcmask (!%p10213_p3), 293888   ;;  %v8602_v42 = vmov (!%p10213_p3), 0  }
  0x6b   : > { %v7966_v10 = vpack.c.bf16 (!%p10213_p3), %v343_v7, %v339_v6  ;;  %v345_v12 = vld [vmem:[%s10191_s0 + $0x30] sm:$0xff] (!%p10213_p3)  ;;  %v352_v15 = vld [vmem:[%s10191_s0 + $0x68] sm:$0xff] (!%p10213_p3)  ;;  %v350_v16 = vld [vmem:[%s10191_s0 + $0x58] sm:$0xff] (!%p10213_p3)  ;;  %8064 = vset.pattern.permute.xlu0 (!%p10213_p3), %v8602_v42  ;;  %8065 = vset.pattern.permute.xlu1 (!%p10213_p3), %v8602_v42  ;;  %vm846_vm2 = vcmask (!%p10213_p3), 130048  }
  0x6c   : > { %7965 = vmatprep.subr.bf16.mxu0 (!%p10213_p3), %v7964_v4  ;;  %v7974_v14 = vpack.c.bf16 (!%p10213_p3), %v345_v12, %v341_v11  ;;  %v354_v17 = vld [vmem:[%s10191_s0 + $0x78] sm:$0xff] (!%p10213_p3)  ;;  %7973 = vmatprep.subr.bf16.mxu1 (!%p10213_p3), %v7972_v9  ;;  %v7968_v18 = vpack.c.bf16 (!%p10213_p3), %v352_v15, %v348_v13  ;;  %v347_v20 = vld [vmem:[%s10191_s0 + $0x40] sm:$0xff] (!%p10213_p3)  ;;  %v349_v22 = vld [vmem:[%s10191_s0 + $0x50] sm:$0xff] (!%p10213_p3) }
  0x6d   : > { %7967 = vmatpush1.bf16.msra.mxu0 (!%p10213_p3), %v7966_v10  ;;  %v7976_v19 = vpack.c.bf16 (!%p10213_p3), %v354_v17, %v350_v16  ;;  %v351_v21 = vld [vmem:[%s10191_s0 + $0x60] sm:$0xff] (!%p10213_p3)  ;;  %v353_v24 = vld [vmem:[%s10191_s0 + $0x70] sm:$0xff] (!%p10213_p3)  ;;  %v356_v26 = vld [vmem:[%s10191_s0 + $0x88] sm:$0xf] (!%p10213_p3) }
  0x6e   : > { %7975 = vmatpush1.bf16.msra.mxu1 (!%p10213_p3), %v7974_v14  ;;  %v7970_v23 = vpack.c.bf16 (!%p10213_p3), %v351_v21, %v347_v20  ;;  %7969 = vmatprep.subr.bf16.mxu0 (!%p10213_p3), %v7968_v18  ;;  %v7978_v25 = vpack.c.bf16 (!%p10213_p3), %v353_v24, %v349_v22  ;;  %v358_v27 = vld [vmem:[%s10191_s0 + $0x98] sm:$0xf] (!%p10213_p3)  ;;  %v6382_v28 = vld [vmem:[%s10191_s0 + $0xa8] sm:$0xff] (!%p10213_p3)  ;;  %v6381_v32 = vld [vmem:[%s10191_s0 + $0xa0] sm:$0xff] (!%p10213_p3) }
  0x6f   : > { %7977 = vmatprep.subr.bf16.mxu1 (!%p10213_p3), %v7976_v19  ;;  %v6386_v29 = vld [vmem:[%s10191_s0 + $0xc8] sm:$0xff] (!%p10213_p3)  ;;  %v6384_v30 = vld [vmem:[%s10191_s0 + $0xb8] sm:$0xff] (!%p10213_p3)  ;;  %v6385_v33 = vld [vmem:[%s10191_s0 + $0xc0] sm:$0xff] (!%p10213_p3) }
  0x70   : > { %v6388_v31 = vld [vmem:[%s10191_s0 + $0xd8] sm:$0xff]  ;;  %v355_v34 = vld [vmem:[%s10191_s0 + $0x80] sm:$0xf]  ;;  %v6383_v35 = vld [vmem:[%s10191_s0 + $0xb0] sm:$0xff]  ;;  %v7980_v39 = vpack.c.bf16 %v6386_v29, %v6382_v28  ;;  %v7982_v41 = vpack.c.bf16 %v6385_v33, %v6381_v32 }
  0x71   : > { %7971 = vmatpush1.bf16.msra.mxu0 %v7970_v23  ;;  %v6387_v36 = vld [vmem:[%s10191_s0 + $0xd0] sm:$0xff]  ;;  %v8912_v38 = vld [vmem:[%s10192_s1] sm:$0xff]  ;;  %v7988_v40 = vpack.c.bf16 %v6388_v31, %v6384_v30  ;;  %v6390_v44 = vld [vmem:[%s10191_s0 + $0xe8] sm:$0xff] }
  0x72   : > { %7979 = vmatpush1.bf16.msra.mxu1 %v7978_v25  ;;  %6345 = vmatprep.subr.msk.mxu0 %vm408_vm0, %v356_v26  ;;  %v357_v37 = vld [vmem:[%s10191_s0 + $0x90] sm:$0xf]  ;;  %v7990_v43 = vpack.c.bf16 %v6387_v36, %v6383_v35  ;;  %v6394_v45 = vld [vmem:[%s10191_s0 + $0x108] sm:$0xff]  ;;  %v6392_v46 = vld [vmem:[%s10191_s0 + $0xf8] sm:$0xff] }
  0x73   : > { %6363 = vmatprep.subr.msk.mxu1 %vm408_vm0, %v358_v27  ;;  %v6396_v47 = vld [vmem:[%s10191_s0 + $0x118] sm:$0xff]  ;;  %v6389_v48 = vld [vmem:[%s10191_s0 + $0xe0] sm:$0xff]  ;;  %v8941_v50 = vld [vmem:[%s10192_s1 + $0x8] sm:$0xff]  ;;  %v7984_v53 = vpack.c.bf16 %v6394_v45, %v6390_v44 }
  0x74   : > { %v6393_v49 = vld [vmem:[%s10191_s0 + $0x100] sm:$0xff]  ;;  %v6391_v51 = vld [vmem:[%s10191_s0 + $0xf0] sm:$0xff]  ;;  %v7992_v54 = vpack.c.bf16 %v6396_v47, %v6392_v46  ;;  %v6398_v58 = vld [vmem:[%s10191_s0 + $0x128] sm:$0xf] }
  0x75   : > { %6346 = vmatpush1.msk.msra.mxu0 %vm408_vm0, %v355_v34  ;;  %v6395_v52 = vld [vmem:[%s10191_s0 + $0x110] sm:$0xff]  ;;  %v7986_v55 = vpack.c.bf16 %v6393_v49, %v6389_v48  ;;  %v6400_v59 = vld [vmem:[%s10191_s0 + $0x138] sm:$0xf]  ;;  %v6397_v60 = vld [vmem:[%s10191_s0 + $0x120] sm:$0xf] }
  0x76   : > { %6364 = vmatpush1.msk.msra.mxu1 %vm408_vm0, %v357_v37  ;;  %6347 = vmatmul.mubr.msk.f32.vlgmr.msra.gmra.mrb[0].mxu0 %vm359_vm1, %v8912_v38  ;;  %v7994_v56 = vpack.c.bf16 %v6395_v52, %v6391_v51  ;;  %v8959_v57 = vld [vmem:[%s10192_s1 + $0x10] sm:$0xff]  ;;  %v8979_v61 = vld [vmem:[%s10192_s1 + $0x18] sm:$0xff]  ;;  %v335_v63 = vld [vmem:[%s10193_s2] sm:$0xff] }
  0x77   : > { %6365 = vmatmul.mubr.msk.f32.vlgmr.msra.gmra.mrb[0].mxu1 %vm359_vm1, %v8912_v38  ;;  %7981 = vmatprep.subr.bf16.mxu0 %v7980_v39  ;;  %v6399_v62 = vld [vmem:[%s10191_s0 + $0x130] sm:$0xf]  ;;  %v9003_v1 = vld [vmem:[%s10192_s1 + $0x20] sm:$0xff]  ;;  %v336_v2 = vld [vmem:[%s10193_s2 + $0x8] sm:$0xff] }
  0x78   : > { %7989 = vmatprep.subr.bf16.mxu1 %v7988_v40  ;;  %7983 = vmatpush1.bf16.msra.mxu0 %v7982_v41  ;;  %v337_v0 = vld [vmem:[%s10193_s2 + $0x10] sm:$0xff]  ;;  %v338_v3 = vld [vmem:[%s10193_s2 + $0x18] sm:$0xff]  ;;  %v9020_v4 = vld [vmem:[%s10192_s1 + $0x28] sm:$0xff] }
  0x79   : > { %7991 = vmatpush1.bf16.msra.mxu1 %v7990_v43  ;;  %491 = vmatprep.mubr.f32.mxu0 %v8601_v8  ;;  %v9031_v5 = vld [vmem:[%s10192_s1 + $0x30] sm:$0xff]  ;;  %v9042_v6 = vld [vmem:[%s10192_s1 + $0x38] sm:$0xff]  ;;  %v9053_v7 = vld [vmem:[%s10192_s1 + $0x40] sm:$0xff] }
  0x7a   : > { %652 = vmatprep.mubr.f32.mxu1 %v8601_v8  ;;  %6348 = vmatmul.mubr.msk.f32.gmra.mrb[2].mxu0 %vm359_vm1, %v8941_v50  ;;  %v9064_v9 = vld [vmem:[%s10192_s1 + $0x48] sm:$0xff]  ;;  %v9075_v10 = vld [vmem:[%s10192_s1 + $0x50] sm:$0xff]  ;;  %v9086_v11 = vld [vmem:[%s10192_s1 + $0x58] sm:$0xff] }
  0x7b   : > { %6366 = vmatmul.mubr.msk.f32.gmra.mrb[2].mxu1 %vm359_vm1, %v8941_v50  ;;  %497 = vmatprep.mubr.f32.mxu0 %v8601_v8  ;;  %v9097_v12 = vld [vmem:[%s10192_s1 + $0x60] sm:$0xff]  ;;  %v9108_v13 = vld [vmem:[%s10192_s1 + $0x68] sm:$0xff]  ;;  %v9119_v14 = vld [vmem:[%s10192_s1 + $0x70] sm:$0xff] }
  0x7c   : > { %658 = vmatprep.mubr.f32.mxu1 %v8601_v8  ;;  %7985 = vmatprep.subr.bf16.mxu0 %v7984_v53  ;;  %v9130_v15 = vld [vmem:[%s10192_s1 + $0x78] sm:$0xff] }
  0x7d   : > { %7993 = vmatprep.subr.bf16.mxu1 %v7992_v54  ;;  %7987 = vmatpush1.bf16.msra.mxu0 %v7986_v55 }
  0x7e   : > { %6349 = vmatmul.mubr.msk.f32.gmra.mrb[4].mxu0 %vm359_vm1, %v8959_v57  ;;  %7995 = vmatpush1.bf16.msra.mxu1 %v7994_v56 }
  0x7f   : > { %6367 = vmatmul.mubr.msk.f32.gmra.mrb[4].mxu1 %vm359_vm1, %v8959_v57  ;;  %503 = vmatprep.mubr.f32.mxu0 %v8601_v8 }
  0x80   : > { %664 = vmatprep.mubr.f32.mxu1 %v8601_v8  ;;  %6401 = vmatprep.subr.msk.mxu0 %vm408_vm0, %v6398_v58 }
  0x81   : > { %6419 = vmatprep.subr.msk.mxu1 %vm408_vm0, %v6400_v59  ;;  %6402 = vmatpush1.msk.msra.mxu0 %vm408_vm0, %v6397_v60 }
  0x82   : > { %6350 = vmatmul.mubr.msk.f32.gmra.mrb[6].mxu0 %vm359_vm1, %v8979_v61  ;;  %6420 = vmatpush1.msk.msra.mxu1 %vm408_vm0, %v6399_v62 }
  0x83   : > { %6368 = vmatmul.mubr.msk.f32.gmra.mrb[6].mxu1 %vm359_vm1, %v8979_v61  ;;  %509 = vmatprep.mubr.f32.mxu0 %v8601_v8 }
  0x84   : > { %670 = vmatprep.mubr.f32.mxu1 %v8601_v8  ;;  %793 = vperm.xlu0 %8064, %v335_v63  }
  0x85   : > { %803 = vperm.xlu1 %8065, %v337_v0  }
  0x86   : > { %6351 = vmatmul.mubr.msk.f32.gmra.mrb[8].mxu0 %vm359_vm1, %v9003_v1 }
  0x87   : > { %6369 = vmatmul.mubr.msk.f32.gmra.mrb[8].mxu1 %vm359_vm1, %v9003_v1  ;;  %515 = vmatprep.mubr.f32.mxu0 %v8601_v8 }
  0x88   : > { %676 = vmatprep.mubr.f32.mxu1 %v8601_v8  ;;  %798 = vperm.xlu0 %8064, %v336_v2  }
  0x89   : > { %808 = vperm.xlu1 %8065, %v338_v3  }
  0x8a   : > { %6352 = vmatmul.mubr.msk.f32.gmra.mrb[10].mxu0 %vm359_vm1, %v9020_v4 }
  0x8b   : > { %6370 = vmatmul.mubr.msk.f32.gmra.mrb[10].mxu1 %vm359_vm1, %v9020_v4  ;;  %521 = vmatprep.mubr.f32.mxu0 %v8601_v8 }
  0x8c   : > { %682 = vmatprep.mubr.f32.mxu1 %v8601_v8 }
  0x8e   : > { %6353 = vmatmul.mubr.msk.f32.gmra.mrb[12].mxu0 %vm359_vm1, %v9031_v5 }
  0x8f   : > { %6371 = vmatmul.mubr.msk.f32.gmra.mrb[12].mxu1 %vm359_vm1, %v9031_v5  ;;  %527 = vmatprep.mubr.f32.mxu0 %v8601_v8 }
  0x90   : > { %688 = vmatprep.mubr.f32.mxu1 %v8601_v8 }
  0x92   : > { %6354 = vmatmul.mubr.msk.f32.gmra.mrb[14].mxu0 %vm359_vm1, %v9042_v6 }
  0x93   : > { %6372 = vmatmul.mubr.msk.f32.gmra.mrb[14].mxu1 %vm359_vm1, %v9042_v6  ;;  %533 = vmatprep.mubr.f32.mxu0 %v8601_v8 }
  0x94   : > { %694 = vmatprep.mubr.f32.mxu1 %v8601_v8 }
  0x96   : > { %6355 = vmatmul.mubr.msk.f32.gmra.mrb[16].mxu0 %vm359_vm1, %v9053_v7 }
  0x97   : > { %6373 = vmatmul.mubr.msk.f32.gmra.mrb[16].mxu1 %vm359_vm1, %v9053_v7  ;;  %539 = vmatprep.mubr.f32.mxu0 %v8601_v8 }
  0x98   : > { %700 = vmatprep.mubr.f32.mxu1 %v8601_v8 }
  0x9a   : > { %6356 = vmatmul.mubr.msk.f32.gmra.mrb[18].mxu0 %vm359_vm1, %v9064_v9 }
  0x9b   : > { %6374 = vmatmul.mubr.msk.f32.gmra.mrb[18].mxu1 %vm359_vm1, %v9064_v9  ;;  %545 = vmatprep.mubr.f32.mxu0 %v8601_v8 }
  0x9c   : > { %706 = vmatprep.mubr.f32.mxu1 %v8601_v8 }
  0x9e   : > { %6357 = vmatmul.mubr.msk.f32.gmra.mrb[20].mxu0 %vm359_vm1, %v9075_v10 }
  0x9f   : > { %6375 = vmatmul.mubr.msk.f32.gmra.mrb[20].mxu1 %vm359_vm1, %v9075_v10  ;;  %551 = vmatprep.mubr.f32.mxu0 %v8601_v8 }
  0xa0   : > { %712 = vmatprep.mubr.f32.mxu1 %v8601_v8 }
  0xa2   : > { %6358 = vmatmul.mubr.msk.f32.gmra.mrb[22].mxu0 %vm359_vm1, %v9086_v11 }
  0xa3   : > { %6376 = vmatmul.mubr.msk.f32.gmra.mrb[22].mxu1 %vm359_vm1, %v9086_v11  ;;  %557 = vmatprep.mubr.f32.mxu0 %v8601_v8 }
  0xa4   : > { %718 = vmatprep.mubr.f32.mxu1 %v8601_v8 }
  0xa6   : > { %6359 = vmatmul.mubr.msk.f32.gmra.mrb[24].mxu0 %vm359_vm1, %v9097_v12 }
  0xa7   : > { %6377 = vmatmul.mubr.msk.f32.gmra.mrb[24].mxu1 %vm359_vm1, %v9097_v12  ;;  %563 = vmatprep.mubr.f32.mxu0 %v8601_v8 }
  0xa8   : > { %724 = vmatprep.mubr.f32.mxu1 %v8601_v8 }
  0xaa   : > { %6360 = vmatmul.mubr.msk.f32.gmra.mrb[26].mxu0 %vm359_vm1, %v9108_v13 }
  0xab   : > { %6378 = vmatmul.mubr.msk.f32.gmra.mrb[26].mxu1 %vm359_vm1, %v9108_v13  ;;  %569 = vmatprep.mubr.f32.mxu0 %v8601_v8 }
  0xac   : > { %730 = vmatprep.mubr.f32.mxu1 %v8601_v8 }
  0xae   : > { %6361 = vmatmul.mubr.msk.f32.gmra.mrb[28].mxu0 %vm359_vm1, %v9119_v14 }
  0xaf   : > { %6379 = vmatmul.mubr.msk.f32.gmra.mrb[28].mxu1 %vm359_vm1, %v9119_v14  ;;  %575 = vmatprep.mubr.f32.mxu0 %v8601_v8 }
  0xb0   : > { %736 = vmatprep.mubr.f32.mxu1 %v8601_v8 }
  0xb2   : > { %6362 = vmatmul.mubr.msk.f32.gmra.mrb[30].mxu0 %vm359_vm1, %v9130_v15 }
  0xb3   : > { %6380 = vmatmul.mubr.msk.f32.gmra.mrb[30].mxu1 %vm359_vm1, %v9130_v15  ;;  %958 = vmatprep.mubr.f32.mxu0 %v8601_v8 }
  0xb4   : > { %1119 = vmatprep.mubr.f32.mxu1 %v8601_v8 }
  0xb6   : > { %6403 = vmatmul.mubr.msk.f32.vlgmr.msra.gmra.mrb[32].mxu0 %vm359_vm1, %v8912_v38 }
  0xb7   : > { %6421 = vmatmul.mubr.msk.f32.vlgmr.msra.gmra.mrb[32].mxu1 %vm359_vm1, %v8912_v38  ;;  %964 = vmatprep.mubr.f32.mxu0 %v8601_v8 }
  0xb8   : > { %1125 = vmatprep.mubr.f32.mxu1 %v8601_v8 }
  0xba   : > { %6404 = vmatmul.mubr.msk.f32.gmra.mrb[34].mxu0 %vm359_vm1, %v8941_v50 }
  0xbb   : > { %6422 = vmatmul.mubr.msk.f32.gmra.mrb[34].mxu1 %vm359_vm1, %v8941_v50  ;;  %970 = vmatprep.mubr.f32.mxu0 %v8601_v8 }
  0xbc   : > { %1131 = vmatprep.mubr.f32.mxu1 %v8601_v8 }
  0xbe   : > { %6405 = vmatmul.mubr.msk.f32.gmra.mrb[36].mxu0 %vm359_vm1, %v8959_v57 }
  0xbf   : > { %6423 = vmatmul.mubr.msk.f32.gmra.mrb[36].mxu1 %vm359_vm1, %v8959_v57  ;;  %976 = vmatprep.mubr.f32.mxu0 %v8601_v8 }
  0xc0   : > { %1137 = vmatprep.mubr.f32.mxu1 %v8601_v8 }
  0xc2   : > { %6406 = vmatmul.mubr.msk.f32.gmra.mrb[38].mxu0 %vm359_vm1, %v8979_v61 }
  0xc3   : > { %6424 = vmatmul.mubr.msk.f32.gmra.mrb[38].mxu1 %vm359_vm1, %v8979_v61  ;;  %982 = vmatprep.mubr.f32.mxu0 %v8601_v8 }
  0xc4   : > { %1143 = vmatprep.mubr.f32.mxu1 %v8601_v8 }
  0xc6   : > { %6407 = vmatmul.mubr.msk.f32.gmra.mrb[40].mxu0 %vm359_vm1, %v9003_v1 }
  0xc7   : > { %6425 = vmatmul.mubr.msk.f32.gmra.mrb[40].mxu1 %vm359_vm1, %v9003_v1  ;;  %988 = vmatprep.mubr.f32.mxu0 %v8601_v8 }
  0xc8   : > { %1149 = vmatprep.mubr.f32.mxu1 %v8601_v8 }
  0xca   : > { %6408 = vmatmul.mubr.msk.f32.gmra.mrb[42].mxu0 %vm359_vm1, %v9020_v4 }
  0xcb   : > { %6426 = vmatmul.mubr.msk.f32.gmra.mrb[42].mxu1 %vm359_vm1, %v9020_v4  ;;  %994 = vmatprep.mubr.f32.mxu0 %v8601_v8 }
  0xcc   : > { %1155 = vmatprep.mubr.f32.mxu1 %v8601_v8 }
  0xce   : > { %6409 = vmatmul.mubr.msk.f32.gmra.mrb[44].mxu0 %vm359_vm1, %v9031_v5 }
  0xcf   : > { %6427 = vmatmul.mubr.msk.f32.gmra.mrb[44].mxu1 %vm359_vm1, %v9031_v5  ;;  %1000 = vmatprep.mubr.f32.mxu0 %v8601_v8 }
  0xd0   : > { %1161 = vmatprep.mubr.f32.mxu1 %v8601_v8 }
  0xd2   : > { %6410 = vmatmul.mubr.msk.f32.gmra.mrb[46].mxu0 %vm359_vm1, %v9042_v6 }
  0xd3   : > { %6428 = vmatmul.mubr.msk.f32.gmra.mrb[46].mxu1 %vm359_vm1, %v9042_v6  ;;  %1006 = vmatprep.mubr.f32.mxu0 %v8601_v8 }
  0xd4   : > { %1167 = vmatprep.mubr.f32.mxu1 %v8601_v8 }
  0xd6   : > { %6411 = vmatmul.mubr.msk.f32.gmra.mrb[48].mxu0 %vm359_vm1, %v9053_v7 }
  0xd7   : > { %6429 = vmatmul.mubr.msk.f32.gmra.mrb[48].mxu1 %vm359_vm1, %v9053_v7  ;;  %1012 = vmatprep.mubr.f32.mxu0 %v8601_v8 }
  0xd8   : > { %1173 = vmatprep.mubr.f32.mxu1 %v8601_v8 }
  0xda   : > { %6412 = vmatmul.mubr.msk.f32.gmra.mrb[50].mxu0 %vm359_vm1, %v9064_v9 }
  0xdb   : > { %6430 = vmatmul.mubr.msk.f32.gmra.mrb[50].mxu1 %vm359_vm1, %v9064_v9  ;;  %1018 = vmatprep.mubr.f32.mxu0 %v8601_v8 }
  0xdc   : > { %1179 = vmatprep.mubr.f32.mxu1 %v8601_v8 }
  0xde   : > { %6413 = vmatmul.mubr.msk.f32.gmra.mrb[52].mxu0 %vm359_vm1, %v9075_v10 }
  0xdf   : > { %6431 = vmatmul.mubr.msk.f32.gmra.mrb[52].mxu1 %vm359_vm1, %v9075_v10  ;;  %1024 = vmatprep.mubr.f32.mxu0 %v8601_v8 }
  0xe0   : > { %1185 = vmatprep.mubr.f32.mxu1 %v8601_v8 }
  0xe2   : > { %6414 = vmatmul.mubr.msk.f32.gmra.mrb[54].mxu0 %vm359_vm1, %v9086_v11 }
  0xe3   : > { %6432 = vmatmul.mubr.msk.f32.gmra.mrb[54].mxu1 %vm359_vm1, %v9086_v11  ;;  %1030 = vmatprep.mubr.f32.mxu0 %v8601_v8 }
  0xe4   : > { %1191 = vmatprep.mubr.f32.mxu1 %v8601_v8 }
  0xe6   : > { %6415 = vmatmul.mubr.msk.f32.gmra.mrb[56].mxu0 %vm359_vm1, %v9097_v12 }
  0xe7   : > { %6433 = vmatmul.mubr.msk.f32.gmra.mrb[56].mxu1 %vm359_vm1, %v9097_v12  ;;  %1036 = vmatprep.mubr.f32.mxu0 %v8601_v8 }
  0xe8   : > { %1197 = vmatprep.mubr.f32.mxu1 %v8601_v8 }
  0xea   : > { %6416 = vmatmul.mubr.msk.f32.gmra.mrb[58].mxu0 %vm359_vm1, %v9108_v13 }
  0xeb   : > { %6434 = vmatmul.mubr.msk.f32.gmra.mrb[58].mxu1 %vm359_vm1, %v9108_v13  ;;  %1042 = vmatprep.mubr.f32.mxu0 %v8601_v8 }
  0xec   : > { %1203 = vmatprep.mubr.f32.mxu1 %v8601_v8 }
  0xee   : > { %6417 = vmatmul.mubr.msk.f32.gmra.mrb[60].mxu0 %vm359_vm1, %v9119_v14 }
  0xef   : > { %6435 = vmatmul.mubr.msk.f32.gmra.mrb[60].mxu1 %vm359_vm1, %v9119_v14  ;;  %1048 = vmatprep.mubr.f32.mxu0 %v8601_v8 }
  0xf0   : > { %1209 = vmatprep.mubr.f32.mxu1 %v8601_v8 }
  0xf2   : > { %6418 = vmatmul.mubr.msk.f32.gmra.mrb[62].mxu0 %vm359_vm1, %v9130_v15 }
  0xf3   : > { %6436 = vmatmul.mubr.msk.f32.gmra.mrb[62].mxu1 %vm359_vm1, %v9130_v15 }
 0x149   : > { %v487_v16 = vpop.f32.mrb[0].mxu0 }
 0x14a   : > { %v648_v17 = vpop.f32.mrb[0].mxu1  ;;  %v489_v18 = vpop.f32.mrb[1].mxu0 }
 0x14b   : > { %v650_v19 = vpop.f32.mrb[1].mxu1 }
 0x14d   : > { %v493_v20 = vpop.f32.mrb[2].mxu0 }
 0x14e   : > { %v654_v21 = vpop.f32.mrb[2].mxu1  ;;  %v495_v22 = vpop.f32.mrb[3].mxu0 }
 0x14f   : > { %v656_v23 = vpop.f32.mrb[3].mxu1 }
 0x151   : > { %v499_v24 = vpop.f32.mrb[4].mxu0 }
 0x152   : > { %v660_v25 = vpop.f32.mrb[4].mxu1  ;;  %v501_v26 = vpop.f32.mrb[5].mxu0 }
 0x153   : > { %v662_v27 = vpop.f32.mrb[5].mxu1 }
 0x155   : > { %v505_v28 = vpop.f32.mrb[6].mxu0 }
 0x156   : > { %v9233_v8 = vpop.f32.mrb[6].mxu1  ;;  %v9235_v29 = vpop.f32.mrb[7].mxu0 }
 0x157   : > { %v9237_v30 = vpop.f32.mrb[7].mxu1 }
 0x159   : > { %v511_v31 = vpop.f32.mrb[8].mxu0 }
 0x15a   : > { %v743_v32 = vmax.f32 %v487_v16, %v511_v31  ;;  %v672_v33 = vpop.f32.mrb[8].mxu1  ;;  %v513_v34 = vpop.f32.mrb[9].mxu0 }
 0x15b   : > { %v745_v35 = vmax.f32 %v648_v17, %v672_v33  ;;  %v744_v36 = vmax.f32 %v489_v18, %v513_v34  ;;  %v674_v37 = vpop.f32.mrb[9].mxu1 }
 0x15c   : > { %v746_v38 = vmax.f32 %v650_v19, %v674_v37 }
 0x15d   : > { %v517_v39 = vpop.f32.mrb[10].mxu0 }
 0x15e   : > { %v747_v40 = vmax.f32 %v493_v20, %v517_v39  ;;  %v678_v41 = vpop.f32.mrb[10].mxu1  ;;  %v519_v42 = vpop.f32.mrb[11].mxu0 }
 0x15f   : > { %v749_v43 = vmax.f32 %v654_v21, %v678_v41  ;;  %v748_v44 = vmax.f32 %v495_v22, %v519_v42  ;;  %v680_v45 = vpop.f32.mrb[11].mxu1 }
 0x160   : > { %v750_v46 = vmax.f32 %v656_v23, %v680_v45 }
 0x161   : > { %v523_v47 = vpop.f32.mrb[12].mxu0 }
 0x162   : > { %v751_v48 = vmax.f32 %v499_v24, %v523_v47  ;;  %v684_v49 = vpop.f32.mrb[12].mxu1  ;;  %v525_v50 = vpop.f32.mrb[13].mxu0 }
 0x163   : > { %v753_v51 = vmax.f32 %v660_v25, %v684_v49  ;;  %v752_v52 = vmax.f32 %v501_v26, %v525_v50  ;;  %v686_v53 = vpop.f32.mrb[13].mxu1 }
 0x164   : > { %v754_v54 = vmax.f32 %v662_v27, %v686_v53 }
 0x165   : > { %v529_v55 = vpop.f32.mrb[14].mxu0 }
 0x166   : > { %v755_v56 = vmax.f32 %v505_v28, %v529_v55  ;;  %v690_v57 = vpop.f32.mrb[14].mxu1  ;;  %v531_v58 = vpop.f32.mrb[15].mxu0 }
 0x167   : > { %v757_v59 = vmax.f32 %v9233_v8, %v690_v57  ;;  %v756_v60 = vmax.f32 %v9235_v29, %v531_v58  ;;  %v692_v61 = vpop.f32.mrb[15].mxu1  ;;  %v9266_v55 = vpop.permute.xlu1 %803 }
 0x168   : > { %v758_v62 = vmax.f32 %v9237_v30, %v692_v61  ;;  %v9256_v30 = vpop.permute.xlu0 %793 }
 0x169   : > { %v535_v63 = vpop.f32.mrb[16].mxu0 }
 0x16a   : > { %v759_v0 = vmax.f32 %v743_v32, %v535_v63  ;;  %v696_v1 = vpop.f32.mrb[16].mxu1  ;;  %v537_v2 = vpop.f32.mrb[17].mxu0 }
 0x16b   : > { %v761_v3 = vmax.f32 %v745_v35, %v696_v1  ;;  %v760_v4 = vmax.f32 %v744_v36, %v537_v2  ;;  %v698_v5 = vpop.f32.mrb[17].mxu1 }
 0x16c   : > { %v762_v6 = vmax.f32 %v746_v38, %v698_v5 }
 0x16d   : > { %v541_v7 = vpop.f32.mrb[18].mxu0 }
 0x16e   : > { %v763_v9 = vmax.f32 %v747_v40, %v541_v7  ;;  %v702_v10 = vpop.f32.mrb[18].mxu1  ;;  %v543_v11 = vpop.f32.mrb[19].mxu0 }
 0x16f   : > { %v765_v12 = vmax.f32 %v749_v43, %v702_v10  ;;  %v764_v13 = vmax.f32 %v748_v44, %v543_v11  ;;  %v704_v14 = vpop.f32.mrb[19].mxu1  ;;  %v9263_v44 = vpop.permute.xlu0 %798 }
 0x170   : > { %v766_v15 = vmax.f32 %v750_v46, %v704_v14 }
 0x171   : > { %v547_v16 = vpop.f32.mrb[20].mxu0 }
 0x172   : > { %v9242_v17 = vmax.f32 %v751_v48, %v547_v16  ;;  %v708_v18 = vpop.f32.mrb[20].mxu1  ;;  %v549_v19 = vpop.f32.mrb[21].mxu0 }
 0x173   : > { %v9244_v20 = vmax.f32 %v753_v51, %v708_v18  ;;  %v9246_v21 = vmax.f32 %v752_v52, %v549_v19  ;;  %v710_v22 = vpop.f32.mrb[21].mxu1 }
 0x174   : > { %v9248_v23 = vmax.f32 %v754_v54, %v710_v22 }
 0x175   : > { %v553_v24 = vpop.f32.mrb[22].mxu0 }
 0x176   : > { %v9250_v25 = vmax.f32 %v755_v56, %v553_v24  ;;  %v714_v26 = vpop.f32.mrb[22].mxu1  ;;  %v555_v27 = vpop.f32.mrb[23].mxu0 }
 0x177   : > { %v9252_v28 = vmax.f32 %v757_v59, %v714_v26  ;;  %v9254_v8 = vmax.f32 %v756_v60, %v555_v27  ;;  %v716_v29 = vpop.f32.mrb[23].mxu1 }
 0x178   : > { %v9258_v31 = vmax.f32 %v758_v62, %v716_v29 }
 0x179   : > { %v559_v32 = vpop.f32.mrb[24].mxu0 }
 0x17a   : > { %v775_v33 = vmax.f32 %v759_v0, %v559_v32  ;;  %v720_v34 = vpop.f32.mrb[24].mxu1  ;;  %v561_v35 = vpop.f32.mrb[25].mxu0 }
 0x17b   : > { %v777_v36 = vmax.f32 %v761_v3, %v720_v34  ;;  %v776_v37 = vmax.f32 %v760_v4, %v561_v35  ;;  %v722_v38 = vpop.f32.mrb[25].mxu1 }
 0x17c   : > { %v778_v39 = vmax.f32 %v762_v6, %v722_v38  ;;  %v811_v40 = vadd.f32 %v9256_v30, %v775_v33 }
 0x17d   : > { %v812_v41 = vadd.f32 %v9256_v30, %v776_v37  ;;  %v813_v42 = vadd.f32 %v9256_v30, %v777_v36  ;;  %v565_v43 = vpop.f32.mrb[26].mxu0 }
 0x17e   : > { %v814_v45 = vadd.f32 %v9256_v30, %v778_v39  ;;  %v827_v46 = vmax.f32 %v811_v40, 0.0  ;;  %v779_v47 = vmax.f32 %v763_v9, %v565_v43  ;;  %v726_v48 = vpop.f32.mrb[26].mxu1  ;;  %v567_v49 = vpop.f32.mrb[27].mxu0 }
 0x17f   : > { %v828_v50 = vmax.f32 %v812_v41, 0.0  ;;  %v829_v51 = vmax.f32 %v813_v42, 0.0  ;;  %v781_v52 = vmax.f32 %v765_v12, %v726_v48  ;;  %v780_v53 = vmax.f32 %v764_v13, %v567_v49  ;;  %v728_v54 = vpop.f32.mrb[27].mxu1 }
 0x180   : > { %v830_v56 = vmax.f32 %v814_v45, 0.0  ;;  %843 = vst [vmem:[#allocation2] sm:$0xff] %v827_v46  ;;  %v782_v57 = vmax.f32 %v766_v15, %v728_v54  ;;  %v815_v58 = vadd.f32 %v9263_v44, %v779_v47  ;;  %v9280_v15 = vpop.permute.xlu1 %808 }
 0x181   : > { %844 = vst [vmem:[#allocation2 + $0x8] sm:$0xff] %v828_v50  ;;  %845 = vst [vmem:[#allocation2 + $0x10] sm:$0xff] %v829_v51  ;;  %v816_v59 = vadd.f32 %v9263_v44, %v780_v53  ;;  %v817_v60 = vadd.f32 %v9263_v44, %v781_v52  ;;  %v571_v61 = vpop.f32.mrb[28].mxu0 }
 0x182   : > { %v818_v62 = vadd.f32 %v9263_v44, %v782_v57  ;;  %v831_v63 = vmax.f32 %v815_v58, 0.0  ;;  %847 = vst.msk [vmem:[#allocation2 + $0x18] sm:$0xff] %vm846_vm2, %v830_v56  ;;  %v783_v0 = vmax.f32 %v9242_v17, %v571_v61  ;;  %v732_v1 = vpop.f32.mrb[28].mxu1  ;;  %v573_v2 = vpop.f32.mrb[29].mxu0 }
 0x183   : > { %v832_v3 = vmax.f32 %v816_v59, 0.0  ;;  %v833_v4 = vmax.f32 %v817_v60, 0.0  ;;  %v785_v5 = vmax.f32 %v9244_v20, %v732_v1  ;;  %v784_v6 = vmax.f32 %v9246_v21, %v573_v2  ;;  %v734_v7 = vpop.f32.mrb[29].mxu1 }
 0x184   : > { %v834_v9 = vmax.f32 %v818_v62, 0.0  ;;  %848 = vst [vmem:[#allocation2 + $0x20] sm:$0xff] %v831_v63  ;;  %v786_v10 = vmax.f32 %v9248_v23, %v734_v7  ;;  %v819_v11 = vadd.f32 %v9266_v55, %v783_v0 }
 0x185   : > { %849 = vst [vmem:[#allocation2 + $0x28] sm:$0xff] %v832_v3  ;;  %850 = vst [vmem:[#allocation2 + $0x30] sm:$0xff] %v833_v4  ;;  %v820_v12 = vadd.f32 %v9266_v55, %v784_v6  ;;  %v821_v13 = vadd.f32 %v9266_v55, %v785_v5  ;;  %v577_v14 = vpop.f32.mrb[30].mxu0 }
 0x186   : > { %851 = vst.msk [vmem:[#allocation2 + $0x38] sm:$0xff] %vm846_vm2, %v834_v9  ;;  %v822_v16 = vadd.f32 %v9266_v55, %v786_v10  ;;  %v835_v17 = vmax.f32 %v819_v11, 0.0  ;;  %v787_v18 = vmax.f32 %v9250_v25, %v577_v14  ;;  %v738_v19 = vpop.f32.mrb[30].mxu1  ;;  %v579_v20 = vpop.f32.mrb[31].mxu0 }
 0x187   : > { %v836_v21 = vmax.f32 %v820_v12, 0.0  ;;  %v837_v22 = vmax.f32 %v821_v13, 0.0  ;;  %v789_v23 = vmax.f32 %v9252_v28, %v738_v19  ;;  %v788_v24 = vmax.f32 %v9254_v8, %v579_v20  ;;  %v740_v26 = vpop.f32.mrb[31].mxu1 }
 0x188   : > { %v838_v27 = vmax.f32 %v822_v16, 0.0  ;;  %853 = vst [vmem:[#allocation2 + $0x80] sm:$0xff] %v835_v17  ;;  %v790_v29 = vmax.f32 %v9258_v31, %v740_v26  ;;  %v823_v32 = vadd.f32 %v9280_v15, %v787_v18 }
 0x189   : > { %854 = vst [vmem:[#allocation2 + $0x88] sm:$0xff] %v836_v21  ;;  %855 = vst [vmem:[#allocation2 + $0x90] sm:$0xff] %v837_v22  ;;  %v824_v33 = vadd.f32 %v9280_v15, %v788_v24  ;;  %v825_v25 = vadd.f32 %v9280_v15, %v789_v23  ;;  %v960_v34 = vpop.f32.mrb[32].mxu0 }
 0x18a   : > { %856 = vst.msk [vmem:[#allocation2 + $0x98] sm:$0xff] %vm846_vm2, %v838_v27  ;;  %v826_v28 = vadd.f32 %v9280_v15, %v790_v29  ;;  %v839_v35 = vmax.f32 %v823_v32, 0.0  ;;  %v1121_v8 = vpop.f32.mrb[32].mxu1  ;;  %v962_v36 = vpop.f32.mrb[33].mxu0 }
 0x18b   : > { %v840_v37 = vmax.f32 %v824_v33, 0.0  ;;  %v841_v38 = vmax.f32 %v825_v25, 0.0  ;;  %v1123_v39 = vpop.f32.mrb[33].mxu1 }
 0x18c   : > { %v842_v31 = vmax.f32 %v826_v28, 0.0  ;;  %857 = vst [vmem:[#allocation2 + $0xa0] sm:$0xff] %v839_v35 }
 0x18d   : > { %858 = vst [vmem:[#allocation2 + $0xa8] sm:$0xff] %v840_v37  ;;  %859 = vst [vmem:[#allocation2 + $0xb0] sm:$0xff] %v841_v38  ;;  %v966_v40 = vpop.f32.mrb[34].mxu0 }
 0x18e   : > { %860 = vst.msk [vmem:[#allocation2 + $0xb8] sm:$0xff] %vm846_vm2, %v842_v31  ;;  %v1127_v41 = vpop.f32.mrb[34].mxu1  ;;  %v968_v42 = vpop.f32.mrb[35].mxu0 }
 0x18f   : > { %v1129_v43 = vpop.f32.mrb[35].mxu1 }
 0x191   : > { %v972_v45 = vpop.f32.mrb[36].mxu0 }
 0x192   : > { %v1133_v46 = vpop.f32.mrb[36].mxu1  ;;  %v974_v47 = vpop.f32.mrb[37].mxu0 }
 0x193   : > { %v1135_v48 = vpop.f32.mrb[37].mxu1 }
 0x195   : > { %v978_v49 = vpop.f32.mrb[38].mxu0 }
 0x196   : > { %v9294_v50 = vpop.f32.mrb[38].mxu1  ;;  %v9296_v51 = vpop.f32.mrb[39].mxu0 }
 0x197   : > { %v9298_v52 = vpop.f32.mrb[39].mxu1 }
 0x199   : > { %v984_v53 = vpop.f32.mrb[40].mxu0 }
 0x19a   : > { %v1216_v54 = vmax.f32 %v960_v34, %v984_v53  ;;  %v1145_v56 = vpop.f32.mrb[40].mxu1  ;;  %v986_v57 = vpop.f32.mrb[41].mxu0 }
 0x19b   : > { %v1218_v58 = vmax.f32 %v1121_v8, %v1145_v56  ;;  %v1217_v59 = vmax.f32 %v962_v36, %v986_v57  ;;  %v1147_v60 = vpop.f32.mrb[41].mxu1 }
 0x19c   : > { %v1219_v61 = vmax.f32 %v1123_v39, %v1147_v60 }
 0x19d   : > { %v990_v62 = vpop.f32.mrb[42].mxu0 }
 0x19e   : > { %v1220_v63 = vmax.f32 %v966_v40, %v990_v62  ;;  %v1151_v0 = vpop.f32.mrb[42].mxu1  ;;  %v992_v1 = vpop.f32.mrb[43].mxu0 }
 0x19f   : > { %v1222_v2 = vmax.f32 %v1127_v41, %v1151_v0  ;;  %v1221_v3 = vmax.f32 %v968_v42, %v992_v1  ;;  %v1153_v4 = vpop.f32.mrb[43].mxu1 }
 0x1a0   : > { %v1223_v5 = vmax.f32 %v1129_v43, %v1153_v4 }
 0x1a1   : > { %v996_v6 = vpop.f32.mrb[44].mxu0 }
 0x1a2   : > { %v1224_v7 = vmax.f32 %v972_v45, %v996_v6  ;;  %v1157_v9 = vpop.f32.mrb[44].mxu1  ;;  %v998_v10 = vpop.f32.mrb[45].mxu0 }
 0x1a3   : > { %v1226_v11 = vmax.f32 %v1133_v46, %v1157_v9  ;;  %v1225_v12 = vmax.f32 %v974_v47, %v998_v10  ;;  %v1159_v13 = vpop.f32.mrb[45].mxu1 }
 0x1a4   : > { %v1227_v14 = vmax.f32 %v1135_v48, %v1159_v13 }
 0x1a5   : > { %v1002_v16 = vpop.f32.mrb[46].mxu0 }
 0x1a6   : > { %v1228_v17 = vmax.f32 %v978_v49, %v1002_v16  ;;  %v1163_v18 = vpop.f32.mrb[46].mxu1  ;;  %v1004_v19 = vpop.f32.mrb[47].mxu0 }
 0x1a7   : > { %v1230_v20 = vmax.f32 %v9294_v50, %v1163_v18  ;;  %v1229_v21 = vmax.f32 %v9296_v51, %v1004_v19  ;;  %v1165_v22 = vpop.f32.mrb[47].mxu1 }
 0x1a8   : > { %v1231_v23 = vmax.f32 %v9298_v52, %v1165_v22 }
 0x1a9   : > { %v1008_v24 = vpop.f32.mrb[48].mxu0 }
 0x1aa   : > { %v1232_v26 = vmax.f32 %v1216_v54, %v1008_v24  ;;  %v1169_v27 = vpop.f32.mrb[48].mxu1  ;;  %v1010_v29 = vpop.f32.mrb[49].mxu0 }
 0x1ab   : > { %v1234_v32 = vmax.f32 %v1218_v58, %v1169_v27  ;;  %v1233_v33 = vmax.f32 %v1217_v59, %v1010_v29  ;;  %v1171_v25 = vpop.f32.mrb[49].mxu1 }
 0x1ac   : > { %v1235_v34 = vmax.f32 %v1219_v61, %v1171_v25 }
 0x1ad   : > { %v1014_v28 = vpop.f32.mrb[50].mxu0 }
 0x1ae   : > { %v1236_v35 = vmax.f32 %v1220_v63, %v1014_v28  ;;  %v1175_v8 = vpop.f32.mrb[50].mxu1  ;;  %v1016_v36 = vpop.f32.mrb[51].mxu0 }
 0x1af   : > { %v1238_v37 = vmax.f32 %v1222_v2, %v1175_v8  ;;  %v1237_v38 = vmax.f32 %v1221_v3, %v1016_v36  ;;  %v1177_v39 = vpop.f32.mrb[51].mxu1 }
 0x1b0   : > { %v1239_v31 = vmax.f32 %v1223_v5, %v1177_v39 }
 0x1b1   : > { %v1020_v40 = vpop.f32.mrb[52].mxu0 }
 0x1b2   : > { %v1240_v41 = vmax.f32 %v1224_v7, %v1020_v40  ;;  %v1181_v42 = vpop.f32.mrb[52].mxu1  ;;  %v1022_v43 = vpop.f32.mrb[53].mxu0 }
 0x1b3   : > { %v1242_v45 = vmax.f32 %v1226_v11, %v1181_v42  ;;  %v1241_v46 = vmax.f32 %v1225_v12, %v1022_v43  ;;  %v1183_v47 = vpop.f32.mrb[53].mxu1 }
 0x1b4   : > { %v9303_v48 = vmax.f32 %v1227_v14, %v1183_v47 }
 0x1b5   : > { %v1026_v49 = vpop.f32.mrb[54].mxu0 }
 0x1b6   : > { %v9305_v50 = vmax.f32 %v1228_v17, %v1026_v49  ;;  %v1187_v51 = vpop.f32.mrb[54].mxu1  ;;  %v1028_v52 = vpop.f32.mrb[55].mxu0 }
 0x1b7   : > { %v9307_v53 = vmax.f32 %v1230_v20, %v1187_v51  ;;  %v9309_v54 = vmax.f32 %v1229_v21, %v1028_v52  ;;  %v1189_v56 = vpop.f32.mrb[55].mxu1 }
 0x1b8   : > { %v9311_v57 = vmax.f32 %v1231_v23, %v1189_v56 }
 0x1b9   : > { %v1032_v58 = vpop.f32.mrb[56].mxu0 }
 0x1ba   : > { %v1248_v59 = vmax.f32 %v1232_v26, %v1032_v58  ;;  %v1193_v60 = vpop.f32.mrb[56].mxu1  ;;  %v1034_v61 = vpop.f32.mrb[57].mxu0 }
 0x1bb   : > { %v1250_v62 = vmax.f32 %v1234_v32, %v1193_v60  ;;  %v1249_v63 = vmax.f32 %v1233_v33, %v1034_v61  ;;  %v1195_v0 = vpop.f32.mrb[57].mxu1 }
 0x1bc   : > { %v1264_v1 = vadd.f32 %v1248_v59, %v9256_v30  ;;  %v1251_v2 = vmax.f32 %v1235_v34, %v1195_v0 }
 0x1bd   : > { %v1266_v3 = vadd.f32 %v1250_v62, %v9256_v30  ;;  %v1265_v4 = vadd.f32 %v1249_v63, %v9256_v30  ;;  %v1038_v5 = vpop.f32.mrb[58].mxu0 }
 0x1be   : > { %v1280_v6 = vmax.f32 %v1264_v1, 0.0  ;;  %v1267_v7 = vadd.f32 %v1251_v2, %v9256_v30  ;;  %v1252_v9 = vmax.f32 %v1236_v35, %v1038_v5  ;;  %v1199_v10 = vpop.f32.mrb[58].mxu1  ;;  %v1040_v11 = vpop.f32.mrb[59].mxu0 }
 0x1bf   : > { %v1282_v12 = vmax.f32 %v1266_v3, 0.0  ;;  %v1281_v13 = vmax.f32 %v1265_v4, 0.0  ;;  %v1254_v14 = vmax.f32 %v1238_v37, %v1199_v10  ;;  %v1253_v16 = vmax.f32 %v1237_v38, %v1040_v11  ;;  %v1201_v17 = vpop.f32.mrb[59].mxu1 }
 0x1c0   : > { %1297 = vst [vmem:[#allocation2 + $0x40] sm:$0xff] %v1280_v6  ;;  %v1283_v18 = vmax.f32 %v1267_v7, 0.0  ;;  %v1268_v19 = vadd.f32 %v1252_v9, %v9263_v44  ;;  %v1255_v20 = vmax.f32 %v1239_v31, %v1201_v17 }
 0x1c1   : > { %1299 = vst [vmem:[#allocation2 + $0x50] sm:$0xff] %v1282_v12  ;;  %1298 = vst [vmem:[#allocation2 + $0x48] sm:$0xff] %v1281_v13  ;;  %v1270_v21 = vadd.f32 %v1254_v14, %v9263_v44  ;;  %v1269_v22 = vadd.f32 %v1253_v16, %v9263_v44  ;;  %v1044_v30 = vpop.f32.mrb[60].mxu0 }
 0x1c2   : > { %1300 = vst.msk [vmem:[#allocation2 + $0x58] sm:$0xff] %vm846_vm2, %v1283_v18  ;;  %v1284_v23 = vmax.f32 %v1268_v19, 0.0  ;;  %v1271_v24 = vadd.f32 %v1255_v20, %v9263_v44  ;;  %v1256_v26 = vmax.f32 %v1240_v41, %v1044_v30  ;;  %v1205_v27 = vpop.f32.mrb[60].mxu1  ;;  %v1046_v29 = vpop.f32.mrb[61].mxu0 }
 0x1c3   : > { %v1286_v32 = vmax.f32 %v1270_v21, 0.0  ;;  %v1285_v33 = vmax.f32 %v1269_v22, 0.0  ;;  %v1258_v25 = vmax.f32 %v1242_v45, %v1205_v27  ;;  %v1257_v34 = vmax.f32 %v1241_v46, %v1046_v29  ;;  %v1207_v28 = vpop.f32.mrb[61].mxu1 }
 0x1c4   : > { %1301 = vst [vmem:[#allocation2 + $0x60] sm:$0xff] %v1284_v23  ;;  %v1287_v35 = vmax.f32 %v1271_v24, 0.0  ;;  %v1272_v8 = vadd.f32 %v1256_v26, %v9266_v55  ;;  %v1259_v36 = vmax.f32 %v9303_v48, %v1207_v28 }
 0x1c5   : > { %1303 = vst [vmem:[#allocation2 + $0x70] sm:$0xff] %v1286_v32  ;;  %1302 = vst [vmem:[#allocation2 + $0x68] sm:$0xff] %v1285_v33  ;;  %v1274_v37 = vadd.f32 %v1258_v25, %v9266_v55  ;;  %v1273_v44 = vadd.f32 %v1257_v34, %v9266_v55  ;;  %v1050_v38 = vpop.f32.mrb[62].mxu0 }
 0x1c6   : > { %1304 = vst.msk [vmem:[#allocation2 + $0x78] sm:$0xff] %vm846_vm2, %v1287_v35  ;;  %v1288_v39 = vmax.f32 %v1272_v8, 0.0  ;;  %v1275_v31 = vadd.f32 %v1259_v36, %v9266_v55  ;;  %v1260_v40 = vmax.f32 %v9305_v50, %v1050_v38  ;;  %v1211_v41 = vpop.f32.mrb[62].mxu1  ;;  %v1052_v42 = vpop.f32.mrb[63].mxu0 }
 0x1c7   : > { %v1290_v43 = vmax.f32 %v1274_v37, 0.0  ;;  %v1289_v45 = vmax.f32 %v1273_v44, 0.0  ;;  %v1262_v46 = vmax.f32 %v9307_v53, %v1211_v41  ;;  %v1261_v47 = vmax.f32 %v9309_v54, %v1052_v42  ;;  %v1213_v48 = vpop.f32.mrb[63].mxu1 }
 0x1c8   : > { %1306 = vst [vmem:[#allocation2 + $0xc0] sm:$0xff] %v1288_v39  ;;  %v1291_v49 = vmax.f32 %v1275_v31, 0.0  ;;  %v1276_v51 = vadd.f32 %v1260_v40, %v9280_v15  ;;  %v1263_v52 = vmax.f32 %v9311_v57, %v1213_v48 }
 0x1c9   : > { %1308 = vst [vmem:[#allocation2 + $0xd0] sm:$0xff] %v1290_v43  ;;  %1307 = vst [vmem:[#allocation2 + $0xc8] sm:$0xff] %v1289_v45  ;;  %v1278_v55 = vadd.f32 %v1262_v46, %v9280_v15  ;;  %v1277_v50 = vadd.f32 %v1261_v47, %v9280_v15 }
 0x1ca   : > { %1309 = vst.msk [vmem:[#allocation2 + $0xd8] sm:$0xff] %vm846_vm2, %v1291_v49  ;;  %v1292_v56 = vmax.f32 %v1276_v51, 0.0  ;;  %v1279_v53 = vadd.f32 %v1263_v52, %v9280_v15 }
 0x1cb   : > { %v1294_v58 = vmax.f32 %v1278_v55, 0.0  ;;  %v1293_v54 = vmax.f32 %v1277_v50, 0.0 }
 0x1cc   : > { %1310 = vst [vmem:[#allocation2 + $0xe0] sm:$0xff] %v1292_v56  ;;  %v1295_v59 = vmax.f32 %v1279_v53, 0.0 }
 0x1cd   : > { %1312 = vst [vmem:[#allocation2 + $0xf0] sm:$0xff] %v1294_v58  ;;  %1311 = vst [vmem:[#allocation2 + $0xe8] sm:$0xff] %v1293_v54 }
 0x1ce   : > { %1313 = vst.msk [vmem:[#allocation2 + $0xf8] sm:$0xff] %vm846_vm2, %v1295_v59 }
 0x1cf PF: > { %v8066_v57 = vld [vmem:[%s8808_s8 + $0x108] sm:$0xff]   ;;  %v8603_v60 = vmov 0   ;;  %v8069_v62 = vld [vmem:[%s8808_s8 + $0x110] sm:$0xff]   ;;  %v8072_v1 = vld [vmem:[%s8808_s8 + $0x118] sm:$0xff]   ;;  %s7611_s21 = sshll.u32 %s8666_s6, 7  ;;  %vm1459_vm3 = vcmask 1041409  }
 0x1d0   : > { %1668 = vmatprep.subr.bf16.mxu1 %v8603_v60  ;;  %v8067_v15 = vld [vmem:[%s8808_s8 + $0x148] sm:$0xff]   ;;  %7612 = vmatprep.subr.bf16.mxu0 %v8066_v57  ;;  %v8070_v63 = vld [vmem:[%s8808_s8 + $0x150] sm:$0xff]   ;;  %v8073_v2 = vld [vmem:[%s8808_s8 + $0x158] sm:$0xff]   ;;  %s9368_s22 = scalar_lea.vmem [#allocation2], %s7611_s21  ;;  %vm1624_vm4 = vcmask 130048   ;;  %p7605_p4 = scmp.ne.s32.totalorder %s8666_s6, 1 }
 0x1d1   : > { %v8068_v61 = vld [vmem:[%s8808_s8 + $0xc8] sm:$0xff]   ;;  %1669 = vmatpush1.bf16.msra.mxu1 %v8067_v15  ;;  %v8071_v0 = vld [vmem:[%s8808_s8 + $0xd0] sm:$0xff]   ;;  %v8074_v3 = vld [vmem:[%s8808_s8 + $0xd8] sm:$0xff]   ;;  %vm6253_vm5 = vcmask (!%p7605_p4), 1041408   ;;  %vm6271_vm6 = vcmask (!%p7605_p4), 1024  }
 0x1d2   : > { %7613 = vmatpush3.bf16.msra.mxu0 %v8068_v61  ;;  %1670 = vmatprep.subr.bf16.mxu1 %v8603_v60  ;;  %v8075_v4 = vld [vmem:[%s8808_s8 + $0x120] sm:$0xff]   ;;  %v8078_v7 = vld [vmem:[%s8808_s8 + $0x128] sm:$0xff]   ;;  %v8081_v11 = vld [vmem:[%s8808_s8 + $0x130] sm:$0xff]  }
 0x1d3   : > { %7614 = vmatprep.subr.bf16.mxu0 %v8069_v62  ;;  %v8076_v5 = vld [vmem:[%s8808_s8 + $0x160] sm:$0xff]   ;;  %v8079_v9 = vld [vmem:[%s8808_s8 + $0x168] sm:$0xff]   ;;  %v8082_v12 = vld [vmem:[%s8808_s8 + $0x170] sm:$0xff]  }
 0x1d4   : > { %v8077_v6 = vld [vmem:[%s8808_s8 + $0xe0] sm:$0xff]   ;;  %v8080_v10 = vld [vmem:[%s8808_s8 + $0xe8] sm:$0xff]   ;;  %v8083_v13 = vld [vmem:[%s8808_s8 + $0xf0] sm:$0xff]  }
 0x1d5   : > { %1671 = vmatpush1.bf16.msra.mxu1 %v8070_v63  ;;  %v8084_v14 = vld [vmem:[%s8808_s8 + $0x138] sm:$0xff]   ;;  %v8087_v18 = vld [vmem:[%s8808_s8 + $0x140] sm:$0xff]   ;;  %v1319_v44 = vld [vmem:[%s9368_s22 + $0x10] sm:$0xff] }
 0x1d6   : > { %7615 = vmatpush3.bf16.msra.mxu0 %v8071_v0  ;;  %1672 = vmatprep.subr.bf16.mxu1 %v8603_v60  ;;  %v8085_v16 = vld [vmem:[%s8808_s8 + $0x178] sm:$0xff]   ;;  %v1318_v19 = vld [vmem:[%s9368_s22 + $0x8] sm:$0xff]  ;;  %v1327_v38 = vld [vmem:[%s9368_s22 + $0x50] sm:$0xff]  ;;  %v1335_v31 = vpack.c.bf16 %v1319_v44, %v1319_v44 }
 0x1d7   : > { %7616 = vmatprep.subr.bf16.mxu0 %v8072_v1  ;;  %v8086_v17 = vld [vmem:[%s8808_s8 + $0xf8] sm:$0xff]   ;;  %v1326_v20 = vld [vmem:[%s9368_s22 + $0x48] sm:$0xff]  ;;  %v1334_v22 = vpack.c.bf16 %v1318_v19, %v1318_v19  ;;  %v1339_v40 = vpack.c.bf16 %v1327_v38, %v1327_v38 }
 0x1d8   : > { %v8088_v21 = vld [vmem:[%s8808_s8 + $0x180] sm:$0xff]   ;;  %v1338_v30 = vpack.c.bf16 %v1326_v20, %v1326_v20  ;;  %v1320_v34 = vld [vmem:[%s9368_s22 + $0x18] sm:$0xff]  ;;  %v8090_v43 = vld [vmem:[%s8808_s8 + $0x188] sm:$0xff]   ;;  %v9401_v49 = vunpack.c.l.b16 %v1335_v31 }
 0x1d9   : > { %1673 = vmatpush1.bf16.msra.mxu1 %v8073_v2  ;;  %v8089_v23 = vld [vmem:[%s8808_s8 + $0x100] sm:$0xff]   ;;  %v9375_v26 = vunpack.c.l.b16 %v1334_v22  ;;  %v1328_v28 = vld [vmem:[%s9368_s22 + $0x58] sm:$0xff]  ;;  %v1336_v36 = vpack.c.bf16 %v1320_v34, %v1320_v34  ;;  %v9403_v51 = vunpack.c.l.b16 %v1339_v40  ;;  %v8093_v59 = vld [vmem:[%s8808_s8 + $0x48] sm:$0xff]  }
 0x1da   : > { %7617 = vmatpush3.bf16.msra.mxu0 %v8074_v3  ;;  %1674 = vmatprep.subr.bf16.mxu1 %v8603_v60  ;;  %v1317_v24 = vld [vmem:[%s9368_s22] sm:$0xff]  ;;  %v9377_v27 = vunpack.c.l.b16 %v1338_v30  ;;  %v1340_v37 = vpack.c.bf16 %v1328_v28, %v1328_v28  ;;  %v1463_v54 = vrot.slane %v9401_v49, 1  ;;  %v8095_v1 = vld [vmem:[%s8808_s8 + $0x8] sm:$0xff]   ;;  %v8096_v2 = vld [vmem:[%s8808_s8 + $0x50] sm:$0xff]  }
 0x1db   : > { %7618 = vmatprep.subr.bf16.mxu0 %v8075_v4  ;;  %v1325_v29 = vld [vmem:[%s9368_s22 + $0x40] sm:$0xff]  ;;  %v1333_v32 = vpack.c.bf16 %v1317_v24, %v1317_v24  ;;  %v1461_v35 = vrot.slane %v9375_v26, 1  ;;  %v9396_v46 = vunpack.c.l.b16 %v1336_v36  ;;  %v8109_v19 = vld [vmem:[%s8808_s8 + $0xa8] sm:$0xff]   ;;  %v8110_v20 = vld [vmem:[%s8808_s8 + $0x30] sm:$0xff]   ;;  %v2010_v30 = vrot.slane %v9375_v26, 2 }
 0x1dc   : > { %v8091_v33 = vld [vmem:[%s8808_s8 + $0x40] sm:$0xff]   ;;  %v1337_v25 = vpack.c.bf16 %v1325_v29, %v1325_v29  ;;  %v1710_v41 = vrot.slane %v9377_v27, 7  ;;  %v9398_v47 = vunpack.c.l.b16 %v1340_v37  ;;  %v1464_v61 = vsel %vm1459_vm3, %v9403_v51, %v1463_v54  ;;  %v8111_v22 = vld [vmem:[%s8808_s8 + $0x78] sm:$0xff]   ;;  %v8112_v24 = vld [vmem:[%s8808_s8 + $0xb0] sm:$0xff]  }
 0x1dd   : > { %1675 = vmatpush1.bf16.msra.mxu1 %v8076_v5  ;;  %v9385_v8 = vunpack.c.l.b16 %v1333_v32  ;;  %v1462_v42 = vsel %vm1459_vm3, %v9377_v27, %v1461_v35  ;;  %v8092_v50 = vld [vmem:[%s8808_s8] sm:$0xff]   ;;  %v1465_v56 = vrot.slane %v9396_v46, 1  ;;  %v1469_v0 = vpack.c.b16 %v1464_v61, %v1464_v61  ;;  %v8097_v5 = vld [vmem:[%s8808_s8 + $0x88] sm:$0xff]   ;;  %v8113_v29 = vld [vmem:[%s8808_s8 + $0x38] sm:$0xff]  }
 0x1de   : > { %7619 = vmatpush3.bf16.msra.mxu0 %v8077_v6  ;;  %1676 = vmatprep.subr.bf16.mxu1 %v8603_v60  ;;  %v9389_v39 = vunpack.c.l.b16 %v1337_v25  ;;  %v1468_v48 = vpack.c.b16 %v1462_v42, %v1462_v42  ;;  %v1711_v52 = vsel %vm1459_vm3, %v1710_v41, %v9375_v26  ;;  %v8094_v62 = vld [vmem:[%s8808_s8 + $0x80] sm:$0xff]   ;;  %v1714_v63 = vrot.slane %v9398_v47, 7  ;;  %v8098_v6 = vld [vmem:[%s8808_s8 + $0x10] sm:$0xff]   ;;  %v8114_v35 = vld [vmem:[%s8808_s8 + $0xb8] sm:$0xff]  }
 0x1df   : > { %7620 = vmatprep.subr.bf16.mxu0 %v8078_v7  ;;  %v1458_v45 = vrot.slane %v9385_v8, 1  ;;  %v1717_v53 = vpack.c.b16 %v1711_v52, %v1711_v52  ;;  %v1466_v57 = vsel %vm1459_vm3, %v9398_v47, %v1465_v56  ;;  %v8099_v7 = vld [vmem:[%s8808_s8 + $0x58] sm:$0xff]   ;;  %v1712_v25 = vrot.slane %v9403_v51, 7  ;;  %v8116_v37 = vld [vmem:[%s8808_s8 + $0x190] sm:$0xff]   ;;  %v8117_v40 = vld [vmem:[%s8808_s8 + $0xc0] sm:$0xff]  }
 0x1e0   : > { %1660 = vmatprep.mubr.bf16.mxu0 %v1468_v48  ;;  %v1470_v15 = vpack.c.b16 %v1466_v57, %v1466_v57  ;;  %v1715_v3 = vsel %vm1459_vm3, %v1714_v63, %v9396_v46  ;;  %v2016_v36 = vrot.slane %v9396_v46, 2  ;;  %v2017_v44 = vrot.slane %v9398_v47, 1  ;;  %v8118_v38 = vld [vmem:[%s8808_s8 + $0x1d8] sm:$0xff]   ;;  %v8121_v52 = vld [vmem:[%s8808_s8 + $0x210] sm:$0xff]   ;;  %v8123_v56 = vld [vmem:[%s8808_s8 + $0x1e8] sm:$0xff]  }
 0x1e1   : > { %1677 = vmatpush1.bf16.msra.mxu1 %v8079_v9  ;;  %v1460_v55 = vsel %vm1459_vm3, %v9389_v39, %v1458_v45  ;;  %v1719_v4 = vpack.c.b16 %v1715_v3, %v1715_v3  ;;  %v8100_v9 = vld [vmem:[%s8808_s8 + $0x90] sm:$0xff]   ;;  %v1713_v41 = vsel %vm1459_vm3, %v1712_v25, %v9401_v49  ;;  %v8119_v42 = vld [vmem:[%s8808_s8 + $0x198] sm:$0xff]   ;;  %v8120_v45 = vld [vmem:[%s8808_s8 + $0x1e0] sm:$0xff]   ;;  %v2008_v3 = vrot.slane %v9389_v39, 1 }
 0x1e2   : > { %7621 = vmatpush3.bf16.msra.mxu0 %v8080_v10  ;;  %1678 = vmatprep.subr.bf16.mxu1 %v8603_v60  ;;  %v1467_v58 = vpack.c.b16 %v1460_v55, %v1460_v55  ;;  %v8101_v10 = vld [vmem:[%s8808_s8 + $0x18] sm:$0xff]   ;;  %v1718_v48 = vpack.c.b16 %v1713_v41, %v1713_v41  ;;  %v8126_v54 = vld [vmem:[%s8808_s8 + $0x1f0] sm:$0xff]   ;;  %v8130_v61 = vld [vmem:[%s8808_s8 + $0x228] sm:$0xff]  }
 0x1e3   : > { %7622 = vmatprep.subr.bf16.mxu0 %v8081_v11  ;;  %6514 = vmatprep.mubr.msk.bf16.mxu1 %vm1624_vm4, %v1470_v15  ;;  %v8102_v11 = vld [vmem:[%s8808_s8 + $0x60] sm:$0xff]   ;;  %v8128_v57 = vld [vmem:[%s8808_s8 + $0x1b0] sm:$0xff]   ;;  %v8129_v15 = vld [vmem:[%s8808_s8 + $0x1f8] sm:$0xff]  }
 0x1e4   : > { %v8132_v63 = vld [vmem:[%s8808_s8 + $0x200] sm:$0xff]   ;;  %v8154_v41 = vld [vmem:[%s8808_s8 + $0x2e8] sm:$0xff]  }
 0x1e5   : > { %1679 = vmatpush1.bf16.msra.mxu1 %v8082_v12  ;;  %v8103_v12 = vld [vmem:[%s8808_s8 + $0x98] sm:$0xff]  }
 0x1e6   : > { %7623 = vmatpush3.bf16.msra.mxu0 %v8083_v13  ;;  %1680 = vmatprep.subr.bf16.mxu1 %v8603_v60  ;;  %v8104_v13 = vld [vmem:[%s8808_s8 + $0x20] sm:$0xff]  }
 0x1e7   : > { %7624 = vmatprep.subr.bf16.mxu0 %v8084_v14  ;;  %v8105_v14 = vld [vmem:[%s8808_s8 + $0x68] sm:$0xff]  }
 0x1e9   : > { %1681 = vmatpush1.bf16.msra.mxu1 %v8085_v16  ;;  %v8106_v16 = vld [vmem:[%s8808_s8 + $0xa0] sm:$0xff]  }
 0x1ea   : > { %7625 = vmatpush3.bf16.msra.mxu0 %v8086_v17  ;;  %1682 = vmatprep.subr.bf16.mxu1 %v8603_v60  ;;  %v8107_v17 = vld [vmem:[%s8808_s8 + $0x28] sm:$0xff]  }
 0x1eb   : > { %7626 = vmatprep.subr.bf16.mxu0 %v8087_v18  ;;  %v8108_v18 = vld [vmem:[%s8808_s8 + $0x70] sm:$0xff]  }
 0x1ed   : > { %1683 = vmatpush1.bf16.msra.mxu1 %v8088_v21  ;;  %v1708_v21 = vrot.slane %v9389_v39, 7 }
 0x1ee   : > { %7627 = vmatpush3.bf16.msra.mxu0 %v8089_v23  ;;  %1684 = vmatprep.subr.bf16.mxu1 %v8603_v60  ;;  %v2011_v23 = vrot.slane %v9377_v27, 1 }
 0x1ef   : > { %7634 = vmatprep.subr.bf16.mxu0 %v8091_v33  ;;  %v1709_v32 = vsel %vm1459_vm3, %v1708_v21, %v9385_v8  ;;  %v8115_v33 = vld [vmem:[%s8808_s8 + $0x1d0] sm:$0xff]   ;;  %v8141_v21 = vld [vmem:[%s8808_s8 + $0x248] sm:$0xff]  }
 0x1f0   : > { %v2012_v34 = vsel %vm1459_vm3, %v2011_v23, %v2010_v30  ;;  %v1716_v28 = vpack.c.b16 %v1709_v32, %v1709_v32  ;;  %v8143_v30 = vld [vmem:[%s8808_s8 + $0x260] sm:$0xff]   ;;  %v2321_v23 = vrot.slane %v9398_v47, 2 }
 0x1f1   : > { %1685 = vmatpush1.bf16.msra.mxu1 %v8090_v43  ;;  %1661 = vmatmul.mubr.bf16.vlgmr.msra.gmra.mrb[0].mxu0 %v1467_v58  ;;  %v2020_v31 = vpack.c.b16 %v2012_v34, %v2012_v34  ;;  %v2018_v43 = vsel %vm1459_vm3, %v2017_v44, %v2016_v36  ;;  %v8125_v58 = vld [vmem:[%s8808_s8 + $0x1a8] sm:$0xff]   ;;  %v8147_v34 = vld [vmem:[%s8808_s8 + $0x2b0] sm:$0xff]   ;;  %v8150_v44 = vld [vmem:[%s8808_s8 + $0x2b8] sm:$0xff]  }
 0x1f2   : > { %1916 = vmatprep.subr.bf16.mxu1 %v8603_v60  ;;  %7635 = vmatpush3.bf16.msra.mxu0 %v8092_v50  ;;  %v2022_v55 = vpack.c.b16 %v2018_v43, %v2018_v43  ;;  %v8122_v50 = vld [vmem:[%s8808_s8 + $0x1a0] sm:$0xff]   ;;  %v8156_v43 = vld [vmem:[%s8808_s8 + $0x2c8] sm:$0xff]  }
 0x1f3   : > { %1908 = vmatprep.mubr.bf16.mxu0 %v1717_v53  ;;  %7636 = vmatprep.subr.bf16.mxu0 %v8093_v59  ;;  %v8124_v53 = vld [vmem:[%s8808_s8 + $0x218] sm:$0xff]   ;;  %v8127_v59 = vld [vmem:[%s8808_s8 + $0x220] sm:$0xff]  }
 0x1f4   : > { %1701 = vmatmul.mubr.bf16.vlgmr.msra.gmra.mrb[0].mxu1 %v1469_v0  ;;  %v8133_v0 = vld [vmem:[%s8808_s8 + $0x230] sm:$0xff]  }
 0x1f5   : > { %1917 = vmatpush1.bf16.msra.mxu1 %v8094_v62  ;;  %6540 = vmatprep.mubr.msk.bf16.mxu1 %vm1624_vm4, %v1719_v4  ;;  %v8131_v62 = vld [vmem:[%s8808_s8 + $0x1b8] sm:$0xff]   ;;  %v8135_v4 = vld [vmem:[%s8808_s8 + $0x208] sm:$0xff]  }
 0x1f6   : > { %7637 = vmatpush3.bf16.msra.mxu0 %v8095_v1  ;;  %1918 = vmatprep.subr.bf16.mxu1 %v8603_v60  ;;  %v2007_v1 = vrot.slane %v9385_v8, 2 }
 0x1f7   : > { %7638 = vmatprep.subr.bf16.mxu0 %v8096_v2  ;;  %v8134_v2 = vld [vmem:[%s8808_s8 + $0x1c0] sm:$0xff]  }
 0x1f9   : > { %1919 = vmatpush1.bf16.msra.mxu1 %v8097_v5  ;;  %v2314_v5 = vrot.slane %v9375_v26, 3 }
 0x1fa   : > { %7639 = vmatpush3.bf16.msra.mxu0 %v8098_v6  ;;  %1920 = vmatprep.subr.bf16.mxu1 %v8603_v60  ;;  %v2315_v6 = vrot.slane %v9377_v27, 2 }
 0x1fb   : > { %7640 = vmatprep.subr.bf16.mxu0 %v8099_v7  ;;  %v8136_v7 = vld [vmem:[%s8808_s8 + $0x238] sm:$0xff]  }
 0x1fd   : > { %1921 = vmatpush1.bf16.msra.mxu1 %v8100_v9  ;;  %v8137_v9 = vld [vmem:[%s8808_s8 + $0x1c8] sm:$0xff]  }
 0x1fe   : > { %7641 = vmatpush3.bf16.msra.mxu0 %v8101_v10  ;;  %1922 = vmatprep.subr.bf16.mxu1 %v8603_v60  ;;  %v2009_v10 = vsel %vm1459_vm3, %v2008_v3, %v2007_v1  ;;  %v8167_v3 = vld [vmem:[%s8808_s8 + $0x328] sm:$0xff]  }
 0x1ff   : > { %7642 = vmatprep.subr.bf16.mxu0 %v8102_v11  ;;  %v8139_v11 = vld [vmem:[%s8808_s8 + $0x298] sm:$0xff]  }
 0x201   : > { %1923 = vmatpush1.bf16.msra.mxu1 %v8103_v12  ;;  %v2316_v12 = vsel %vm1459_vm3, %v2315_v6, %v2314_v5  ;;  %v2317_v5 = vrot.slane %v9401_v49, 3  ;;  %v2318_v6 = vrot.slane %v9403_v51, 2 }
 0x202   : > { %7643 = vmatpush3.bf16.msra.mxu0 %v8104_v13  ;;  %1924 = vmatprep.subr.bf16.mxu1 %v8603_v60  ;;  %v8138_v13 = vld [vmem:[%s8808_s8 + $0x240] sm:$0xff]  }
 0x203   : > { %7644 = vmatprep.subr.bf16.mxu0 %v8105_v14  ;;  %v2019_v14 = vpack.c.b16 %v2009_v10, %v2009_v10  ;;  %v8170_v10 = vld [vmem:[%s8808_s8 + $0x330] sm:$0xff]  }
 0x205   : > { %1925 = vmatpush1.bf16.msra.mxu1 %v8106_v16  ;;  %v8140_v16 = vld [vmem:[%s8808_s8 + $0x258] sm:$0xff]  }
 0x206   : > { %7645 = vmatpush3.bf16.msra.mxu0 %v8107_v17  ;;  %1926 = vmatprep.subr.bf16.mxu1 %v8603_v60  ;;  %v8142_v17 = vld [vmem:[%s8808_s8 + $0x2a0] sm:$0xff]  }
 0x207   : > { %7646 = vmatprep.subr.bf16.mxu0 %v8108_v18  ;;  %v2324_v18 = vpack.c.b16 %v2316_v12, %v2316_v12  ;;  %v8172_v12 = vld [vmem:[%s8808_s8 + $0x378] sm:$0xff]  }
 0x209   : > { %1927 = vmatpush1.bf16.msra.mxu1 %v8109_v19  ;;  %v2013_v19 = vrot.slane %v9401_v49, 2 }
 0x20a   : > { %7647 = vmatpush3.bf16.msra.mxu0 %v8110_v20  ;;  %1928 = vmatprep.subr.bf16.mxu1 %v8603_v60  ;;  %v2014_v20 = vrot.slane %v9403_v51, 1 }
 0x20b   : > { %7648 = vmatprep.subr.bf16.mxu0 %v8111_v22  ;;  %v2320_v22 = vrot.slane %v9396_v46, 3 }
 0x20c   : > { %v2015_v32 = vsel %vm1459_vm3, %v2014_v20, %v2013_v19  ;;  %v8175_v20 = vld [vmem:[%s8808_s8 + $0x3a0] sm:$0xff]  }
 0x20d   : > { %1929 = vmatpush1.bf16.msra.mxu1 %v8112_v24  ;;  %v8145_v24 = vld [vmem:[%s8808_s8 + $0x2a8] sm:$0xff]   ;;  %v2322_v25 = vsel %vm1459_vm3, %v2321_v23, %v2320_v22  ;;  %v8176_v22 = vld [vmem:[%s8808_s8 + $0x340] sm:$0xff]  }
 0x20e   : > { %7649 = vmatpush3.bf16.msra.mxu0 %v8113_v29  ;;  %1930 = vmatprep.subr.bf16.mxu1 %v8603_v60  ;;  %v8144_v29 = vld [vmem:[%s8808_s8 + $0x250] sm:$0xff]   ;;  %v2326_v36 = vpack.c.b16 %v2322_v25, %v2322_v25  ;;  %v8178_v23 = vld [vmem:[%s8808_s8 + $0x3a8] sm:$0xff]  }
 0x20f   : > { %7656 = vmatprep.subr.bf16.mxu0 %v8115_v33  ;;  %v8146_v33 = vld [vmem:[%s8808_s8 + $0x268] sm:$0xff]   ;;  %v8182_v25 = vld [vmem:[%s8808_s8 + $0x350] sm:$0xff]  }
 0x211   : > { %1909 = vmatmul.mubr.bf16.vlgmr.msra.gmra.mrb[4].mxu0 %v1716_v28  ;;  %1931 = vmatpush1.bf16.msra.mxu1 %v8114_v35  ;;  %v2021_v28 = vpack.c.b16 %v2015_v32, %v2015_v32  ;;  %v8148_v35 = vld [vmem:[%s8808_s8 + $0x2d8] sm:$0xff]   ;;  %v8181_v32 = vld [vmem:[%s8808_s8 + $0x3b0] sm:$0xff]  }
 0x212   : > { %7657 = vmatpush3.bf16.msra.mxu0 %v8116_v37  ;;  %1932 = vmatprep.subr.bf16.mxu1 %v8603_v60  ;;  %v8149_v37 = vld [vmem:[%s8808_s8 + $0x270] sm:$0xff]  }
 0x213   : > { %7658 = vmatprep.subr.bf16.mxu0 %v8118_v38  ;;  %2211 = vmatprep.mubr.bf16.mxu0 %v2020_v31  ;;  %v8151_v38 = vld [vmem:[%s8808_s8 + $0x2e0] sm:$0xff]   ;;  %v8152_v31 = vld [vmem:[%s8808_s8 + $0x278] sm:$0xff]  }
 0x215   : > { %1933 = vmatpush1.bf16.msra.mxu1 %v8117_v40  ;;  %v8153_v40 = vld [vmem:[%s8808_s8 + $0x2c0] sm:$0xff]  }
 0x216   : > { %7659 = vmatpush3.bf16.msra.mxu0 %v8119_v42  ;;  %2219 = vmatprep.subr.bf16.mxu1 %v8603_v60  ;;  %v8155_v42 = vld [vmem:[%s8808_s8 + $0x280] sm:$0xff]  }
 0x217   : > { %7660 = vmatprep.subr.bf16.mxu0 %v8120_v45  ;;  %v8157_v45 = vld [vmem:[%s8808_s8 + $0x2f0] sm:$0xff]  }
 0x218   : > { %1949 = vmatmul.mubr.bf16.vlgmr.msra.gmra.mrb[4].mxu1 %v1718_v48  ;;  %v2311_v48 = vrot.slane %v9385_v8, 3 }
 0x219   : > { %2220 = vmatpush1.bf16.msra.mxu1 %v8121_v52  ;;  %6616 = vmatprep.mubr.msk.bf16.mxu1 %vm1624_vm4, %v2022_v55  ;;  %v8158_v52 = vld [vmem:[%s8808_s8 + $0x288] sm:$0xff]   ;;  %v2312_v55 = vrot.slane %v9389_v39, 2 }
 0x21a   : > { %7661 = vmatpush3.bf16.msra.mxu0 %v8122_v50  ;;  %2221 = vmatprep.subr.bf16.mxu1 %v8603_v60  ;;  %v8159_v50 = vld [vmem:[%s8808_s8 + $0x2d0] sm:$0xff]  }
 0x21b   : > { %7662 = vmatprep.subr.bf16.mxu0 %v8123_v56  ;;  %v2618_v56 = vrot.slane %v9375_v26, 4 }
 0x21d   : > { %2222 = vmatpush1.bf16.msra.mxu1 %v8124_v53  ;;  %v2619_v53 = vrot.slane %v9377_v27, 3 }
 0x21e   : > { %7663 = vmatpush3.bf16.msra.mxu0 %v8125_v58  ;;  %2223 = vmatprep.subr.bf16.mxu1 %v8603_v60  ;;  %v8160_v58 = vld [vmem:[%s8808_s8 + $0x2f8] sm:$0xff]  }
 0x21f   : > { %7664 = vmatprep.subr.bf16.mxu0 %v8126_v54  ;;  %v8161_v54 = vld [vmem:[%s8808_s8 + $0x290] sm:$0xff]  }
 0x221   : > { %2224 = vmatpush1.bf16.msra.mxu1 %v8127_v59  ;;  %v2313_v59 = vsel %vm1459_vm3, %v2312_v55, %v2311_v48  ;;  %v8191_v55 = vld [vmem:[%s8808_s8 + $0x3f0] sm:$0xff]  }
 0x222   : > { %7665 = vmatpush3.bf16.msra.mxu0 %v8128_v57  ;;  %2225 = vmatprep.subr.bf16.mxu1 %v8603_v60  ;;  %v8163_v57 = vld [vmem:[%s8808_s8 + $0x360] sm:$0xff]  }
 0x223   : > { %7666 = vmatprep.subr.bf16.mxu0 %v8129_v15  ;;  %v2620_v15 = vsel %vm1459_vm3, %v2619_v53, %v2618_v56  ;;  %v8192_v56 = vld [vmem:[%s8808_s8 + $0x3d0] sm:$0xff]   ;;  %v8194_v53 = vld [vmem:[%s8808_s8 + $0x3f8] sm:$0xff]  }
 0x224   : > { %v2628_v1 = vpack.c.b16 %v2620_v15, %v2620_v15  ;;  %v2928_v15 = vrot.slane %v9396_v46, 5 }
 0x225   : > { %2226 = vmatpush1.bf16.msra.mxu1 %v8130_v61  ;;  %v8162_v61 = vld [vmem:[%s8808_s8 + $0x300] sm:$0xff]  }
 0x226   : > { %7667 = vmatpush3.bf16.msra.mxu0 %v8131_v62  ;;  %2227 = vmatprep.subr.bf16.mxu1 %v8603_v60  ;;  %v2323_v62 = vpack.c.b16 %v2313_v59, %v2313_v59  ;;  %v2622_v59 = vrot.slane %v9403_v51, 3 }
 0x227   : > { %7668 = vmatprep.subr.bf16.mxu0 %v8132_v63  ;;  %v8164_v63 = vld [vmem:[%s8808_s8 + $0x320] sm:$0xff]  }
 0x229   : > { %2228 = vmatpush1.bf16.msra.mxu1 %v8133_v0  ;;  %v8166_v0 = vld [vmem:[%s8808_s8 + $0x368] sm:$0xff]  }
 0x22a   : > { %7669 = vmatpush3.bf16.msra.mxu0 %v8134_v2  ;;  %2229 = vmatprep.subr.bf16.mxu1 %v8603_v60  ;;  %v8165_v2 = vld [vmem:[%s8808_s8 + $0x308] sm:$0xff]  }
 0x22b   : > { %7670 = vmatprep.subr.bf16.mxu0 %v8135_v4  ;;  %v8169_v4 = vld [vmem:[%s8808_s8 + $0x370] sm:$0xff]  }
 0x22d   : > { %2230 = vmatpush1.bf16.msra.mxu1 %v8136_v7  ;;  %v8168_v7 = vld [vmem:[%s8808_s8 + $0x310] sm:$0xff]  }
 0x22e   : > { %7671 = vmatpush3.bf16.msra.mxu0 %v8137_v9  ;;  %2231 = vmatprep.subr.bf16.mxu1 %v8603_v60  ;;  %v2624_v9 = vrot.slane %v9396_v46, 4 }
 0x22f   : > { %7678 = vmatprep.subr.bf16.mxu0 %v8139_v11  ;;  %v2625_v11 = vrot.slane %v9398_v47, 3 }
 0x231   : > { %2232 = vmatpush1.bf16.msra.mxu1 %v8138_v13  ;;  %2212 = vmatmul.mubr.bf16.vlgmr.msra.gmra.mrb[8].mxu0 %v2019_v14  ;;  %v8171_v13 = vld [vmem:[%s8808_s8 + $0x318] sm:$0xff]   ;;  %v2319_v14 = vsel %vm1459_vm3, %v2318_v6, %v2317_v5  ;;  %v8202_v6 = vld [vmem:[%s8808_s8 + $0x468] sm:$0xff]  }
 0x232   : > { %7679 = vmatpush3.bf16.msra.mxu0 %v8140_v16  ;;  %2233 = vmatprep.subr.bf16.mxu1 %v8603_v60  ;;  %v8173_v16 = vld [vmem:[%s8808_s8 + $0x338] sm:$0xff]   ;;  %v2325_v19 = vpack.c.b16 %v2319_v14, %v2319_v14  ;;  %v2920_v14 = vrot.slane %v9389_v39, 4 }
 0x233   : > { %7680 = vmatprep.subr.bf16.mxu0 %v8142_v17  ;;  %2515 = vmatprep.mubr.bf16.mxu0 %v2324_v18  ;;  %v2626_v17 = vsel %vm1459_vm3, %v2625_v11, %v2624_v9  ;;  %v8174_v18 = vld [vmem:[%s8808_s8 + $0x380] sm:$0xff]   ;;  %v8203_v9 = vld [vmem:[%s8808_s8 + $0x410] sm:$0xff]  }
 0x234   : > { %v8205_v11 = vld [vmem:[%s8808_s8 + $0x470] sm:$0xff]  }
 0x235   : > { %2234 = vmatpush1.bf16.msra.mxu1 %v8141_v21  ;;  %v2630_v21 = vpack.c.b16 %v2626_v17, %v2626_v17  ;;  %v3226_v17 = vrot.slane %v9375_v26, 6 }
 0x236   : > { %7681 = vmatpush3.bf16.msra.mxu0 %v8143_v30  ;;  %2235 = vmatprep.subr.bf16.mxu1 %v8603_v60  ;;  %v8177_v30 = vld [vmem:[%s8808_s8 + $0x388] sm:$0xff]  }
 0x237   : > { %7682 = vmatprep.subr.bf16.mxu0 %v8145_v24  ;;  %v8179_v24 = vld [vmem:[%s8808_s8 + $0x348] sm:$0xff]  }
 0x239   : > { %2236 = vmatpush1.bf16.msra.mxu1 %v8144_v29  ;;  %v8180_v29 = vld [vmem:[%s8808_s8 + $0x390] sm:$0xff]  }
 0x23a   : > { %7683 = vmatpush3.bf16.msra.mxu0 %v8146_v33  ;;  %2523 = vmatprep.subr.bf16.mxu1 %v8603_v60  ;;  %v2615_v33 = vrot.slane %v9385_v8, 4 }
 0x23b   : > { %7684 = vmatprep.subr.bf16.mxu0 %v8147_v34  ;;  %v2616_v34 = vrot.slane %v9389_v39, 3 }
 0x23c   : > { %2252 = vmatmul.mubr.bf16.vlgmr.msra.gmra.mrb[8].mxu1 %v2021_v28  ;;  %v8183_v28 = vld [vmem:[%s8808_s8 + $0x398] sm:$0xff]  }
 0x23d   : > { %2524 = vmatpush1.bf16.msra.mxu1 %v8148_v35  ;;  %6692 = vmatprep.mubr.msk.bf16.mxu1 %vm1624_vm4, %v2326_v36  ;;  %v2922_v35 = vrot.slane %v9375_v26, 5  ;;  %v2923_v36 = vrot.slane %v9377_v27, 4 }
 0x23e   : > { %7685 = vmatpush3.bf16.msra.mxu0 %v8149_v37  ;;  %2525 = vmatprep.subr.bf16.mxu1 %v8603_v60  ;;  %v8184_v37 = vld [vmem:[%s8808_s8 + $0x3b8] sm:$0xff]  }
 0x23f   : > { %7686 = vmatprep.subr.bf16.mxu0 %v8150_v44  ;;  %v8185_v44 = vld [vmem:[%s8808_s8 + $0x358] sm:$0xff]  }
 0x241   : > { %2526 = vmatpush1.bf16.msra.mxu1 %v8151_v38  ;;  %v2617_v38 = vsel %vm1459_vm3, %v2616_v34, %v2615_v33  ;;  %v8215_v34 = vld [vmem:[%s8808_s8 + $0x4b8] sm:$0xff]  }
 0x242   : > { %7687 = vmatpush3.bf16.msra.mxu0 %v8152_v31  ;;  %2527 = vmatprep.subr.bf16.mxu1 %v8603_v60  ;;  %v8187_v31 = vld [vmem:[%s8808_s8 + $0x428] sm:$0xff]  }
 0x243   : > { %7688 = vmatprep.subr.bf16.mxu0 %v8153_v40  ;;  %v2924_v40 = vsel %vm1459_vm3, %v2923_v36, %v2922_v35  ;;  %v8216_v35 = vld [vmem:[%s8808_s8 + $0x490] sm:$0xff]   ;;  %v8218_v36 = vld [vmem:[%s8808_s8 + $0x4c0] sm:$0xff]  }
 0x244   : > { %v2932_v48 = vpack.c.b16 %v2924_v40, %v2924_v40  ;;  %v2925_v40 = vrot.slane %v9401_v49, 5 }
 0x245   : > { %2528 = vmatpush1.bf16.msra.mxu1 %v8154_v41  ;;  %v8186_v41 = vld [vmem:[%s8808_s8 + $0x3c0] sm:$0xff]  }
 0x246   : > { %7689 = vmatpush3.bf16.msra.mxu0 %v8155_v42  ;;  %2529 = vmatprep.subr.bf16.mxu1 %v8603_v60  ;;  %v2627_v42 = vpack.c.b16 %v2617_v38, %v2617_v38  ;;  %v8221_v38 = vld [vmem:[%s8808_s8 + $0x4c8] sm:$0xff]  }
 0x247   : > { %7690 = vmatprep.subr.bf16.mxu0 %v8156_v43  ;;  %v8188_v43 = vld [vmem:[%s8808_s8 + $0x3e8] sm:$0xff]  }
 0x249   : > { %2530 = vmatpush1.bf16.msra.mxu1 %v8157_v45  ;;  %v8190_v45 = vld [vmem:[%s8808_s8 + $0x430] sm:$0xff]  }
 0x24a   : > { %7691 = vmatpush3.bf16.msra.mxu0 %v8158_v52  ;;  %2531 = vmatprep.subr.bf16.mxu1 %v8603_v60  ;;  %v8189_v52 = vld [vmem:[%s8808_s8 + $0x3c8] sm:$0xff]  }
 0x24b   : > { %7692 = vmatprep.subr.bf16.mxu0 %v8159_v50  ;;  %v8193_v50 = vld [vmem:[%s8808_s8 + $0x438] sm:$0xff]  }
 0x24d   : > { %2532 = vmatpush1.bf16.msra.mxu1 %v8160_v58  ;;  %v8196_v58 = vld [vmem:[%s8808_s8 + $0x440] sm:$0xff]  }
 0x24e   : > { %7693 = vmatpush3.bf16.msra.mxu0 %v8161_v54  ;;  %2533 = vmatprep.subr.bf16.mxu1 %v8603_v60  ;;  %v2621_v54 = vrot.slane %v9401_v49, 4 }
 0x24f   : > { %7700 = vmatprep.subr.bf16.mxu0 %v8163_v57  ;;  %v8195_v57 = vld [vmem:[%s8808_s8 + $0x3d8] sm:$0xff]  }
 0x251   : > { %2534 = vmatpush1.bf16.msra.mxu1 %v8162_v61  ;;  %2516 = vmatmul.mubr.bf16.vlgmr.msra.gmra.mrb[12].mxu0 %v2323_v62  ;;  %v8197_v61 = vld [vmem:[%s8808_s8 + $0x400] sm:$0xff]   ;;  %v2929_v62 = vrot.slane %v9398_v47, 4 }
 0x252   : > { %7701 = vmatpush3.bf16.msra.mxu0 %v8164_v63  ;;  %2535 = vmatprep.subr.bf16.mxu1 %v8603_v60  ;;  %v8199_v63 = vld [vmem:[%s8808_s8 + $0x448] sm:$0xff]  }
 0x253   : > { %7702 = vmatprep.subr.bf16.mxu0 %v8166_v0  ;;  %2819 = vmatprep.mubr.bf16.mxu0 %v2628_v1  ;;  %v8198_v0 = vld [vmem:[%s8808_s8 + $0x3e0] sm:$0xff]   ;;  %v2623_v1 = vsel %vm1459_vm3, %v2622_v59, %v2621_v54  ;;  %v8229_v59 = vld [vmem:[%s8808_s8 + $0x530] sm:$0xff]  }
 0x254   : > { %v2629_v5 = vpack.c.b16 %v2623_v1, %v2623_v1  ;;  %v3531_v1 = vrot.slane %v9377_v27, 6 }
 0x255   : > { %2536 = vmatpush1.bf16.msra.mxu1 %v8165_v2  ;;  %v8200_v2 = vld [vmem:[%s8808_s8 + $0x408] sm:$0xff]  }
 0x256   : > { %7703 = vmatpush3.bf16.msra.mxu0 %v8167_v3  ;;  %2537 = vmatprep.subr.bf16.mxu1 %v8603_v60  ;;  %v2930_v3 = vsel %vm1459_vm3, %v2929_v62, %v2928_v15  ;;  %v3224_v62 = vrot.slane %v9389_v39, 5 }
 0x257   : > { %7704 = vmatprep.subr.bf16.mxu0 %v8169_v4  ;;  %v8201_v4 = vld [vmem:[%s8808_s8 + $0x450] sm:$0xff]  }
 0x259   : > { %2538 = vmatpush1.bf16.msra.mxu1 %v8168_v7  ;;  %v2934_v7 = vpack.c.b16 %v2930_v3, %v2930_v3  ;;  %v8233_v3 = vld [vmem:[%s8808_s8 + $0x4e8] sm:$0xff]  }
 0x25a   : > { %7705 = vmatpush3.bf16.msra.mxu0 %v8170_v10  ;;  %2539 = vmatprep.subr.bf16.mxu1 %v8603_v60  ;;  %v8204_v10 = vld [vmem:[%s8808_s8 + $0x458] sm:$0xff]  }
 0x25b   : > { %7706 = vmatprep.subr.bf16.mxu0 %v8172_v12  ;;  %v2919_v12 = vrot.slane %v9385_v8, 5 }
 0x25d   : > { %2540 = vmatpush1.bf16.msra.mxu1 %v8171_v13  ;;  %v8206_v13 = vld [vmem:[%s8808_s8 + $0x418] sm:$0xff]  }
 0x25e   : > { %7707 = vmatpush3.bf16.msra.mxu0 %v8173_v16  ;;  %2827 = vmatprep.subr.bf16.mxu1 %v8603_v60  ;;  %v8207_v16 = vld [vmem:[%s8808_s8 + $0x460] sm:$0xff]  }
 0x25f   : > { %7708 = vmatprep.subr.bf16.mxu0 %v8174_v18  ;;  %v3227_v18 = vrot.slane %v9377_v27, 5  ;;  %v8234_v27 = vld [vmem:[%s8808_s8 + $0x540] sm:$0xff]  }
 0x260   : > { %2556 = vmatmul.mubr.bf16.vlgmr.msra.gmra.mrb[12].mxu1 %v2325_v19  ;;  %v8208_v19 = vld [vmem:[%s8808_s8 + $0x478] sm:$0xff]  }
 0x261   : > { %2828 = vmatpush1.bf16.msra.mxu1 %v8175_v20  ;;  %6768 = vmatprep.mubr.msk.bf16.mxu1 %vm1624_vm4, %v2630_v21  ;;  %v8209_v20 = vld [vmem:[%s8808_s8 + $0x420] sm:$0xff]   ;;  %v2921_v21 = vsel %vm1459_vm3, %v2920_v14, %v2919_v12  ;;  %v8240_v14 = vld [vmem:[%s8808_s8 + $0x550] sm:$0xff]  }
 0x262   : > { %7709 = vmatpush3.bf16.msra.mxu0 %v8176_v22  ;;  %2829 = vmatprep.subr.bf16.mxu1 %v8603_v60  ;;  %v8211_v22 = vld [vmem:[%s8808_s8 + $0x4f0] sm:$0xff]   ;;  %v8239_v12 = vld [vmem:[%s8808_s8 + $0x580] sm:$0xff]  }
 0x263   : > { %7710 = vmatprep.subr.bf16.mxu0 %v8177_v30  ;;  %v3228_v30 = vsel %vm1459_vm3, %v3227_v18, %v3226_v17  ;;  %v8244_v17 = vld [vmem:[%s8808_s8 + $0x5d0] sm:$0xff]   ;;  %v8243_v18 = vld [vmem:[%s8808_s8 + $0x558] sm:$0xff]  }
 0x264   : > { %v3236_v33 = vpack.c.b16 %v3228_v30, %v3228_v30  ;;  %v8248_v30 = vld [vmem:[%s8808_s8 + $0x598] sm:$0xff]  }
 0x265   : > { %2830 = vmatpush1.bf16.msra.mxu1 %v8178_v23  ;;  %v8210_v23 = vld [vmem:[%s8808_s8 + $0x480] sm:$0xff]  }
 0x266   : > { %7711 = vmatpush3.bf16.msra.mxu0 %v8179_v24  ;;  %2831 = vmatprep.subr.bf16.mxu1 %v8603_v60  ;;  %v2931_v24 = vpack.c.b16 %v2921_v21, %v2921_v21  ;;  %v8246_v21 = vld [vmem:[%s8808_s8 + $0x560] sm:$0xff]  }
 0x267   : > { %7712 = vmatprep.subr.bf16.mxu0 %v8180_v29  ;;  %v8212_v29 = vld [vmem:[%s8808_s8 + $0x4b0] sm:$0xff]  }
 0x269   : > { %2832 = vmatpush1.bf16.msra.mxu1 %v8181_v32  ;;  %v8214_v32 = vld [vmem:[%s8808_s8 + $0x4f8] sm:$0xff]  }
 0x26a   : > { %7713 = vmatpush3.bf16.msra.mxu0 %v8182_v25  ;;  %2833 = vmatprep.subr.bf16.mxu1 %v8603_v60  ;;  %v8213_v25 = vld [vmem:[%s8808_s8 + $0x488] sm:$0xff]  }
 0x26b   : > { %7714 = vmatprep.subr.bf16.mxu0 %v8183_v28  ;;  %v8217_v28 = vld [vmem:[%s8808_s8 + $0x500] sm:$0xff]  }
 0x26d   : > { %2834 = vmatpush1.bf16.msra.mxu1 %v8184_v37  ;;  %v8220_v37 = vld [vmem:[%s8808_s8 + $0x508] sm:$0xff]  }
 0x26e   : > { %7715 = vmatpush3.bf16.msra.mxu0 %v8185_v44  ;;  %2835 = vmatprep.subr.bf16.mxu1 %v8603_v60  ;;  %v8219_v44 = vld [vmem:[%s8808_s8 + $0x498] sm:$0xff]  }
 0x26f   : > { %7722 = vmatprep.subr.bf16.mxu0 %v8187_v31  ;;  %v8223_v31 = vld [vmem:[%s8808_s8 + $0x510] sm:$0xff]  }
 0x271   : > { %2836 = vmatpush1.bf16.msra.mxu1 %v8186_v41  ;;  %2820 = vmatmul.mubr.bf16.vlgmr.msra.gmra.mrb[16].mxu0 %v2627_v42  ;;  %v2926_v41 = vrot.slane %v9403_v51, 4  ;;  %v8222_v42 = vld [vmem:[%s8808_s8 + $0x4a0] sm:$0xff]  }
 0x272   : > { %7723 = vmatpush3.bf16.msra.mxu0 %v8188_v43  ;;  %2837 = vmatprep.subr.bf16.mxu1 %v8603_v60  ;;  %v3232_v43 = vrot.slane %v9396_v46, 6 }
 0x273   : > { %7724 = vmatprep.subr.bf16.mxu0 %v8190_v45  ;;  %3123 = vmatprep.mubr.bf16.mxu0 %v2932_v48  ;;  %v8224_v45 = vld [vmem:[%s8808_s8 + $0x4d0] sm:$0xff]   ;;  %v3233_v48 = vrot.slane %v9398_v47, 5 }
 0x275   : > { %2838 = vmatpush1.bf16.msra.mxu1 %v8189_v52  ;;  %v8226_v52 = vld [vmem:[%s8808_s8 + $0x518] sm:$0xff]  }
 0x276   : > { %7725 = vmatpush3.bf16.msra.mxu0 %v8191_v55  ;;  %2839 = vmatprep.subr.bf16.mxu1 %v8603_v60  ;;  %v8225_v55 = vld [vmem:[%s8808_s8 + $0x4a8] sm:$0xff]  }
 0x277   : > { %7726 = vmatprep.subr.bf16.mxu0 %v8193_v50  ;;  %v2927_v50 = vsel %vm1459_vm3, %v2926_v41, %v2925_v40  ;;  %v8252_v41 = vld [vmem:[%s8808_s8 + $0x570] sm:$0xff]  }
 0x278   : > { %v2933_v54 = vpack.c.b16 %v2927_v50, %v2927_v50 }
 0x279   : > { %2840 = vmatpush1.bf16.msra.mxu1 %v8192_v56  ;;  %v8227_v56 = vld [vmem:[%s8808_s8 + $0x4d8] sm:$0xff]  }
 0x27a   : > { %7727 = vmatpush3.bf16.msra.mxu0 %v8194_v53  ;;  %2841 = vmatprep.subr.bf16.mxu1 %v8603_v60  ;;  %v3234_v53 = vsel %vm1459_vm3, %v3233_v48, %v3232_v43 }
 0x27b   : > { %7728 = vmatprep.subr.bf16.mxu0 %v8196_v58  ;;  %v8228_v58 = vld [vmem:[%s8808_s8 + $0x520] sm:$0xff]   ;;  %v3238_v15 = vpack.c.b16 %v3234_v53, %v3234_v53 }
 0x27d   : > { %2842 = vmatpush1.bf16.msra.mxu1 %v8195_v57  ;;  %v3223_v57 = vrot.slane %v9385_v8, 6 }
 0x27e   : > { %7729 = vmatpush3.bf16.msra.mxu0 %v8197_v61  ;;  %2843 = vmatprep.subr.bf16.mxu1 %v8603_v60  ;;  %v8230_v61 = vld [vmem:[%s8808_s8 + $0x4e0] sm:$0xff]  }
 0x27f   : > { %7730 = vmatprep.subr.bf16.mxu0 %v8199_v63  ;;  %v8231_v63 = vld [vmem:[%s8808_s8 + $0x528] sm:$0xff]  }
 0x281   : > { %2844 = vmatpush1.bf16.msra.mxu1 %v8198_v0  ;;  %v3530_v0 = vrot.slane %v9375_v26, 7 }
 0x282   : > { %7731 = vmatpush3.bf16.msra.mxu0 %v8200_v2  ;;  %3131 = vmatprep.subr.bf16.mxu1 %v8603_v60  ;;  %v8232_v2 = vld [vmem:[%s8808_s8 + $0x538] sm:$0xff]  }
 0x283   : > { %7732 = vmatprep.subr.bf16.mxu0 %v8201_v4  ;;  %v3225_v4 = vsel %vm1459_vm3, %v3224_v62, %v3223_v57  ;;  %v3532_v26 = vsel %vm1459_vm3, %v3531_v1, %v3530_v0  ;;  %v8257_v57 = vld [vmem:[%s8808_s8 + $0x5b0] sm:$0xff]   ;;  %v8259_v62 = vld [vmem:[%s8808_s8 + $0x680] sm:$0xff]  }
 0x284   : > { %2860 = vmatmul.mubr.bf16.vlgmr.msra.gmra.mrb[16].mxu1 %v2629_v5  ;;  %v8235_v5 = vld [vmem:[%s8808_s8 + $0x5b8] sm:$0xff]   ;;  %v8258_v1 = vld [vmem:[%s8808_s8 + $0x600] sm:$0xff]  }
 0x285   : > { %3132 = vmatpush1.bf16.msra.mxu1 %v8202_v6  ;;  %6844 = vmatprep.mubr.msk.bf16.mxu1 %vm1624_vm4, %v2934_v7  ;;  %v3235_v6 = vpack.c.b16 %v3225_v4, %v3225_v4  ;;  %v8236_v7 = vld [vmem:[%s8808_s8 + $0x578] sm:$0xff]   ;;  %v8262_v4 = vld [vmem:[%s8808_s8 + $0x688] sm:$0xff]  }
 0x286   : > { %7733 = vmatpush3.bf16.msra.mxu0 %v8203_v9  ;;  %3133 = vmatprep.subr.bf16.mxu1 %v8603_v60  ;;  %v8238_v9 = vld [vmem:[%s8808_s8 + $0x5c0] sm:$0xff]  }
 0x287   : > { %7734 = vmatprep.subr.bf16.mxu0 %v8204_v10  ;;  %v3540_v10 = vpack.c.b16 %v3532_v26, %v3532_v26  ;;  %v8261_v26 = vld [vmem:[%s8808_s8 + $0x608] sm:$0xff]  }
 0x289   : > { %3134 = vmatpush1.bf16.msra.mxu1 %v8205_v11  ;;  %v8237_v11 = vld [vmem:[%s8808_s8 + $0x548] sm:$0xff]  }
 0x28a   : > { %7735 = vmatpush3.bf16.msra.mxu0 %v8206_v13  ;;  %3135 = vmatprep.subr.bf16.mxu1 %v8603_v60  ;;  %v8241_v13 = vld [vmem:[%s8808_s8 + $0x5c8] sm:$0xff]  }
 0x28b   : > { %7736 = vmatprep.subr.bf16.mxu0 %v8207_v16  ;;  %v8242_v16 = vld [vmem:[%s8808_s8 + $0x588] sm:$0xff]  }
 0x28d   : > { %3136 = vmatpush1.bf16.msra.mxu1 %v8208_v19  ;;  %v8245_v19 = vld [vmem:[%s8808_s8 + $0x590] sm:$0xff]  }
 0x28e   : > { %7737 = vmatpush3.bf16.msra.mxu0 %v8209_v20  ;;  %3137 = vmatprep.subr.bf16.mxu1 %v8603_v60  ;;  %v8247_v20 = vld [vmem:[%s8808_s8 + $0x5d8] sm:$0xff]  }
 0x28f   : > { %7744 = vmatprep.subr.bf16.mxu0 %v8211_v22  ;;  %v1330_v22 = vld [vmem:[%s9368_s22 + $0x68] sm:$0xff] }
 0x291   : > { %3138 = vmatpush1.bf16.msra.mxu1 %v8210_v23  ;;  %3124 = vmatmul.mubr.bf16.vlgmr.msra.gmra.mrb[20].mxu0 %v2931_v24  ;;  %v8250_v23 = vld [vmem:[%s8808_s8 + $0x5e0] sm:$0xff]   ;;  %v3229_v24 = vrot.slane %v9401_v49, 6 }
 0x292   : > { %7745 = vmatpush3.bf16.msra.mxu0 %v8212_v29  ;;  %3139 = vmatprep.subr.bf16.mxu1 %v8603_v60  ;;  %v8249_v29 = vld [vmem:[%s8808_s8 + $0x568] sm:$0xff]  }
 0x293   : > { %7746 = vmatprep.subr.bf16.mxu0 %v8214_v32  ;;  %3427 = vmatprep.mubr.bf16.mxu0 %v3236_v33  ;;  %v3230_v32 = vrot.slane %v9403_v51, 5  ;;  %v3785_v33 = vpack.c.bf16 %v1330_v22, %v1330_v22  ;;  %v8273_v22 = vld [vmem:[%s8808_s8 + $0x628] sm:$0xff]  }
 0x295   : > { %3140 = vmatpush1.bf16.msra.mxu1 %v8213_v25  ;;  %v3536_v25 = vrot.slane %v9396_v46, 7  ;;  %v9713_v40 = vunpack.c.l.b16 %v3785_v33  ;;  %v1324_v33 = vld [vmem:[%s9368_s22 + $0x38] sm:$0xff] }
 0x296   : > { %7747 = vmatpush3.bf16.msra.mxu0 %v8215_v34  ;;  %3141 = vmatprep.subr.bf16.mxu1 %v8603_v60  ;;  %v1322_v34 = vld [vmem:[%s9368_s22 + $0x28] sm:$0xff] }
 0x297   : > { %7748 = vmatprep.subr.bf16.mxu0 %v8217_v28  ;;  %v8251_v28 = vld [vmem:[%s8808_s8 + $0x5a0] sm:$0xff]  }
 0x299   : > { %3142 = vmatpush1.bf16.msra.mxu1 %v8216_v35  ;;  %v3537_v35 = vrot.slane %v9398_v47, 6  ;;  %v8254_v47 = vld [vmem:[%s8808_s8 + $0x5a8] sm:$0xff]  }
 0x29a   : > { %7749 = vmatpush3.bf16.msra.mxu0 %v8218_v36  ;;  %3143 = vmatprep.subr.bf16.mxu1 %v8603_v60  ;;  %v8253_v36 = vld [vmem:[%s8808_s8 + $0x5e8] sm:$0xff]  }
 0x29b   : > { %7750 = vmatprep.subr.bf16.mxu0 %v8220_v37  ;;  %v3527_v37 = vrot.slane %v9385_v8, 7 }
 0x29d   : > { %3144 = vmatpush1.bf16.msra.mxu1 %v8219_v44 }
 0x29e   : > { %7751 = vmatpush3.bf16.msra.mxu0 %v8221_v38  ;;  %3145 = vmatprep.subr.bf16.mxu1 %v8603_v60  ;;  %v3528_v38 = vrot.slane %v9389_v39, 6  ;;  %v8255_v39 = vld [vmem:[%s8808_s8 + $0x5f0] sm:$0xff]  }
 0x29f   : > { %7752 = vmatprep.subr.bf16.mxu0 %v8223_v31  ;;  %v3781_v31 = vpack.c.bf16 %v1322_v34, %v1322_v34  ;;  %v3534_v34 = vrot.slane %v9403_v51, 6 }
 0x2a1   : > { %3146 = vmatpush1.bf16.msra.mxu1 %v8222_v42  ;;  %v3231_v42 = vsel %vm1459_vm3, %v3230_v32, %v3229_v24  ;;  %v9723_v53 = vunpack.c.l.b16 %v3781_v31  ;;  %v3533_v24 = vrot.slane %v9401_v49, 7 }
 0x2a2   : > { %7753 = vmatpush3.bf16.msra.mxu0 %v8224_v45  ;;  %3147 = vmatprep.subr.bf16.mxu1 %v8603_v60  ;;  %v3538_v45 = vsel %vm1459_vm3, %v3537_v35, %v3536_v25  ;;  %v8277_v25 = vld [vmem:[%s8808_s8 + $0x6b0] sm:$0xff]  }
 0x2a3   : > { %7754 = vmatprep.subr.bf16.mxu0 %v8226_v52  ;;  %v8276_v35 = vld [vmem:[%s8808_s8 + $0x630] sm:$0xff]  }
 0x2a5   : > { %3148 = vmatpush1.bf16.msra.mxu1 %v8225_v55 }
 0x2a6   : > { %7755 = vmatpush3.bf16.msra.mxu0 %v8227_v56  ;;  %3435 = vmatprep.subr.bf16.mxu1 %v8603_v60  ;;  %v3237_v56 = vpack.c.b16 %v3231_v42, %v3231_v42 }
 0x2a7   : > { %7756 = vmatprep.subr.bf16.mxu0 %v8228_v58  ;;  %v3857_v58 = vrot.slane %v9713_v40, 7 }
 0x2a8   : > { %3164 = vmatmul.mubr.bf16.vlgmr.msra.gmra.mrb[20].mxu1 %v2933_v54 }
 0x2a9   : > { %3436 = vmatpush1.bf16.msra.mxu1 %v8229_v59  ;;  %6920 = vmatprep.mubr.msk.bf16.mxu1 %vm1624_vm4, %v3238_v15  ;;  %v8256_v59 = vld [vmem:[%s8808_s8 + $0x5f8] sm:$0xff]   ;;  %v3542_v15 = vpack.c.b16 %v3538_v45, %v3538_v45  ;;  %v3858_v0 = vsel %vm1459_vm3, %v3857_v58, %v9723_v53 }
 0x2aa   : > { %7757 = vmatpush3.bf16.msra.mxu0 %v8230_v61  ;;  %3437 = vmatprep.subr.bf16.mxu1 %v8603_v60  ;;  %v8281_v45 = vld [vmem:[%s8808_s8 + $0x678] sm:$0xff]  }
 0x2ab   : > { %7758 = vmatprep.subr.bf16.mxu0 %v8231_v63  ;;  %v3529_v63 = vsel %vm1459_vm3, %v3528_v38, %v3527_v37  ;;  %v8278_v37 = vld [vmem:[%s8808_s8 + $0x670] sm:$0xff]  }
 0x2ad   : > { %3438 = vmatpush1.bf16.msra.mxu1 %v8232_v2  ;;  %v3539_v2 = vpack.c.b16 %v3529_v63, %v3529_v63  ;;  %v8284_v63 = vld [vmem:[%s8808_s8 + $0x6c0] sm:$0xff]  }
 0x2ae   : > { %7759 = vmatpush3.bf16.msra.mxu0 %v8233_v3  ;;  %3439 = vmatprep.subr.bf16.mxu1 %v8603_v60  ;;  %v8260_v3 = vld [vmem:[%s8808_s8 + $0x640] sm:$0xff]  }
 0x2af   : > { %7766 = vmatprep.subr.bf16.mxu0 %v8235_v5  ;;  %v3864_v5 = vpack.c.b16 %v3858_v0, %v3858_v0 }
 0x2b1   : > { %3440 = vmatpush1.bf16.msra.mxu1 %v8234_v27  ;;  %3428 = vmatmul.mubr.bf16.vlgmr.msra.gmra.mrb[24].mxu0 %v3235_v6  ;;  %v8263_v27 = vld [vmem:[%s8808_s8 + $0x648] sm:$0xff]   ;;  %v8265_v6 = vld [vmem:[%s8808_s8 + $0x690] sm:$0xff]  }
 0x2b2   : > { %7767 = vmatpush3.bf16.msra.mxu0 %v8236_v7  ;;  %3441 = vmatprep.subr.bf16.mxu1 %v8603_v60  ;;  %v8264_v7 = vld [vmem:[%s8808_s8 + $0x610] sm:$0xff]  }
 0x2b3   : > { %7768 = vmatprep.subr.bf16.mxu0 %v8238_v9  ;;  %3731 = vmatprep.mubr.bf16.mxu0 %v3540_v10  ;;  %v8266_v9 = vld [vmem:[%s8808_s8 + $0x650] sm:$0xff]   ;;  %v8268_v10 = vld [vmem:[%s8808_s8 + $0x698] sm:$0xff]  }
 0x2b5   : > { %3442 = vmatpush1.bf16.msra.mxu1 %v8237_v11  ;;  %v8267_v11 = vld [vmem:[%s8808_s8 + $0x618] sm:$0xff]  }
 0x2b6   : > { %7769 = vmatpush3.bf16.msra.mxu0 %v8239_v12  ;;  %3443 = vmatprep.subr.bf16.mxu1 %v8603_v60  ;;  %v8269_v12 = vld [vmem:[%s8808_s8 + $0x658] sm:$0xff]  }
 0x2b7   : > { %7770 = vmatprep.subr.bf16.mxu0 %v8241_v13  ;;  %v8271_v13 = vld [vmem:[%s8808_s8 + $0x6a0] sm:$0xff]  }
 0x2b9   : > { %3444 = vmatpush1.bf16.msra.mxu1 %v8240_v14  ;;  %v8270_v14 = vld [vmem:[%s8808_s8 + $0x620] sm:$0xff]  }
 0x2ba   : > { %7771 = vmatpush3.bf16.msra.mxu0 %v8242_v16  ;;  %3445 = vmatprep.subr.bf16.mxu1 %v8603_v60  ;;  %v1329_v16 = vld [vmem:[%s9368_s22 + $0x60] sm:$0xff] }
 0x2bb   : > { %7772 = vmatprep.subr.bf16.mxu0 %v8244_v17  ;;  %v8272_v17 = vld [vmem:[%s8808_s8 + $0x660] sm:$0xff]  }
 0x2bd   : > { %3446 = vmatpush1.bf16.msra.mxu1 %v8243_v18  ;;  %v8274_v18 = vld [vmem:[%s8808_s8 + $0x6a8] sm:$0xff]  }
 0x2be   : > { %7773 = vmatpush3.bf16.msra.mxu0 %v8245_v19  ;;  %3447 = vmatprep.subr.bf16.mxu1 %v8603_v60  ;;  %v3784_v19 = vpack.c.bf16 %v1329_v16, %v1329_v16  ;;  %v8297_v16 = vld [vmem:[%s8808_s8 + $0x770] sm:$0xff]  }
 0x2bf   : > { %7774 = vmatprep.subr.bf16.mxu0 %v8247_v20  ;;  %v1332_v20 = vld [vmem:[%s9368_s22 + $0x78] sm:$0xff] }
 0x2c0   : > { %v9761_v32 = vunpack.c.l.b16 %v3784_v19  ;;  %v8299_v19 = vld [vmem:[%s8808_s8 + $0x6e8] sm:$0xff]  }
 0x2c1   : > { %3448 = vmatpush1.bf16.msra.mxu1 %v8246_v21  ;;  %v1321_v21 = vld [vmem:[%s9368_s22 + $0x20] sm:$0xff] }
 0x2c2   : > { %7775 = vmatpush3.bf16.msra.mxu0 %v8248_v30  ;;  %3449 = vmatprep.subr.bf16.mxu1 %v8603_v60  ;;  %v8275_v30 = vld [vmem:[%s8808_s8 + $0x668] sm:$0xff]  }
 0x2c3   : > { %7776 = vmatprep.subr.bf16.mxu0 %v8250_v23  ;;  %v3787_v23 = vpack.c.bf16 %v1332_v20, %v1332_v20  ;;  %v8300_v20 = vld [vmem:[%s8808_s8 + $0x778] sm:$0xff]  }
 0x2c4   : > { %v7628_v44 = vpop.f32.mrb[0].mxu0 }
 0x2c5   : > { %3450 = vmatpush1.bf16.msra.mxu1 %v8249_v29  ;;  %v7629_v46 = vpop.f32.mrb[1].mxu0  ;;  %v3780_v29 = vpack.c.bf16 %v1321_v21, %v1321_v21  ;;  %v9768_v38 = vunpack.c.l.b16 %v3787_v23  ;;  %v1323_v23 = vld [vmem:[%s9368_s22 + $0x30] sm:$0xff] }
 0x2c6   : > { %v7630_v43 = vadd.f32 %v7629_v46, %v7628_v44  ;;  %7777 = vmatpush3.bf16.msra.mxu0 %v8251_v28  ;;  %3451 = vmatprep.subr.bf16.mxu1 %v8603_v60  ;;  %v7631_v8 = vpop.f32.mrb[2].mxu0  ;;  %v3783_v44 = vpack.c.bf16 %v1324_v33, %v1324_v33  ;;  %v3855_v46 = vrot.slane %v9761_v32, 7  ;;  %v8303_v33 = vld [vmem:[%s8808_s8 + $0x780] sm:$0xff]  }
 0x2c7   : > { %v1702_v48 = vpop.f32.mrb[0].mxu1  ;;  %7778 = vmatprep.subr.bf16.mxu0 %v8253_v36  ;;  %v7632_v52 = vpop.f32.mrb[3].mxu0  ;;  %v9771_v31 = vunpack.c.l.b16 %v3780_v29  ;;  %v4157_v8 = vrot.slane %v9723_v53, 1 }
 0x2c8   : > { %v9721_v55 = vadd.f32 %v7630_v43, %v1702_v48  ;;  %v1704_v50 = vpop.f32.mrb[1].mxu1  ;;  %v3535_v48 = vsel %vm1459_vm3, %v3534_v34, %v3533_v24  ;;  %v3861_v52 = vrot.slane %v9768_v38, 7  ;;  %v8302_v24 = vld [vmem:[%s8808_s8 + $0x6f0] sm:$0xff]  }
 0x2c9   : > { %v1705_v54 = vpop.f32.mrb[2].mxu1  ;;  %3452 = vmatpush1.bf16.msra.mxu1 %v8252_v41  ;;  %v8280_v41 = vld [vmem:[%s8808_s8 + $0x6b8] sm:$0xff]   ;;  %v8282_v50 = vld [vmem:[%s8808_s8 + $0x748] sm:$0xff]  }
 0x2ca   : > { %v1706_v61 = vpop.f32.mrb[3].mxu1  ;;  %7779 = vmatpush3.bf16.msra.mxu0 %v8254_v47  ;;  %3739 = vmatprep.subr.bf16.mxu1 %v8603_v60  ;;  %v8279_v47 = vld [vmem:[%s8808_s8 + $0x638] sm:$0xff]  }
 0x2cb   : > { %7780 = vmatprep.subr.bf16.mxu0 %v8255_v39  ;;  %v9780_v39 = vunpack.c.l.b16 %v3783_v44 }
 0x2cc   : > { %3468 = vmatmul.mubr.bf16.vlgmr.msra.gmra.mrb[24].mxu1 %v3237_v56 }
 0x2cd   : > { %3740 = vmatpush1.bf16.msra.mxu1 %v8256_v59  ;;  %6996 = vmatprep.mubr.msk.bf16.mxu1 %vm1624_vm4, %v3542_v15  ;;  %v3541_v59 = vpack.c.b16 %v3535_v48, %v3535_v48  ;;  %v4158_v15 = vsel %vm1459_vm3, %v9713_v40, %v4157_v8  ;;  %v3862_v0 = vsel %vm1459_vm3, %v3861_v52, %v9780_v39  ;;  %v4458_v8 = vrot.slane %v9723_v53, 2  ;;  %v8306_v48 = vld [vmem:[%s8808_s8 + $0x788] sm:$0xff]  }
 0x2ce   : > { %7781 = vmatpush3.bf16.msra.mxu0 %v8257_v57  ;;  %3741 = vmatprep.subr.bf16.mxu1 %v8603_v60  ;;  %v8283_v57 = vld [vmem:[%s8808_s8 + $0x708] sm:$0xff]  }
 0x2cf   : > { %7788 = vmatprep.subr.bf16.mxu0 %v8259_v62 }
 0x2d1   : > { %3742 = vmatpush1.bf16.msra.mxu1 %v8258_v1  ;;  %3732 = vmatmul.mubr.bf16.vlgmr.msra.gmra.mrb[28].mxu0 %v3539_v2  ;;  %v8285_v2 = vld [vmem:[%s8808_s8 + $0x750] sm:$0xff]  }
 0x2d2   : > { %7789 = vmatpush3.bf16.msra.mxu0 %v8260_v3  ;;  %3743 = vmatprep.subr.bf16.mxu1 %v8603_v60  ;;  %v4164_v3 = vpack.c.b16 %v4158_v15, %v4158_v15 }
 0x2d3   : > { %7790 = vmatprep.subr.bf16.mxu0 %v8262_v4  ;;  %4055 = vmatprep.mubr.bf16.mxu0 %v3864_v5  ;;  %v8286_v4 = vld [vmem:[%s8808_s8 + $0x710] sm:$0xff]   ;;  %v3866_v5 = vpack.c.b16 %v3862_v0, %v3862_v0 }
 0x2d5   : > { %3744 = vmatpush1.bf16.msra.mxu1 %v8261_v26  ;;  %v8287_v26 = vld [vmem:[%s8808_s8 + $0x6c8] sm:$0xff]  }
 0x2d6   : > { %7791 = vmatpush3.bf16.msra.mxu0 %v8263_v27  ;;  %3745 = vmatprep.subr.bf16.mxu1 %v8603_v60  ;;  %v8288_v27 = vld [vmem:[%s8808_s8 + $0x758] sm:$0xff]  }
 0x2d7   : > { %7792 = vmatprep.subr.bf16.mxu0 %v8265_v6  ;;  %v8289_v6 = vld [vmem:[%s8808_s8 + $0x718] sm:$0xff]  }
 0x2d9   : > { %3746 = vmatpush1.bf16.msra.mxu1 %v8264_v7  ;;  %v8290_v7 = vld [vmem:[%s8808_s8 + $0x6d0] sm:$0xff]  }
 0x2da   : > { %7793 = vmatpush3.bf16.msra.mxu0 %v8266_v9  ;;  %3747 = vmatprep.subr.bf16.mxu1 %v8603_v60  ;;  %v8291_v9 = vld [vmem:[%s8808_s8 + $0x760] sm:$0xff]  }
 0x2db   : > { %7794 = vmatprep.subr.bf16.mxu0 %v8268_v10  ;;  %v8292_v10 = vld [vmem:[%s8808_s8 + $0x720] sm:$0xff]  }
 0x2dd   : > { %3748 = vmatpush1.bf16.msra.mxu1 %v8267_v11  ;;  %v8293_v11 = vld [vmem:[%s8808_s8 + $0x6d8] sm:$0xff]  }
 0x2de   : > { %7795 = vmatpush3.bf16.msra.mxu0 %v8269_v12  ;;  %3749 = vmatprep.subr.bf16.mxu1 %v8603_v60  ;;  %v8294_v12 = vld [vmem:[%s8808_s8 + $0x768] sm:$0xff]  }
 0x2df   : > { %7796 = vmatprep.subr.bf16.mxu0 %v8271_v13  ;;  %v8295_v13 = vld [vmem:[%s8808_s8 + $0x728] sm:$0xff]  }
 0x2e1   : > { %3750 = vmatpush1.bf16.msra.mxu1 %v8270_v14  ;;  %v8296_v14 = vld [vmem:[%s8808_s8 + $0x6e0] sm:$0xff]  }
 0x2e2   : > { %7797 = vmatpush3.bf16.msra.mxu0 %v8272_v17  ;;  %3751 = vmatprep.subr.bf16.mxu1 %v8603_v60  ;;  %v1331_v17 = vld [vmem:[%s9368_s22 + $0x70] sm:$0xff] }
 0x2e3   : > { %7798 = vmatprep.subr.bf16.mxu0 %v8274_v18  ;;  %v8298_v18 = vld [vmem:[%s8808_s8 + $0x730] sm:$0xff]   ;;  %v3786_v21 = vpack.c.bf16 %v1331_v17, %v1331_v17  ;;  %v8323_v17 = vld [vmem:[%s8808_s8 + $0x7b8] sm:$0xff]  }
 0x2e4   : > { %v7650_v28 = vpop.f32.mrb[4].mxu0 }
 0x2e5   : > { %v7651_v36 = vpop.f32.mrb[5].mxu0  ;;  %3752 = vmatpush1.bf16.msra.mxu1 %v8273_v22  ;;  %v8301_v22 = vld [vmem:[%s8808_s8 + $0x738] sm:$0xff]  }
 0x2e6   : > { %v7652_v49 = vadd.f32 %v7651_v36, %v7650_v28  ;;  %7799 = vmatpush3.bf16.msra.mxu0 %v8275_v30  ;;  %3753 = vmatprep.subr.bf16.mxu1 %v8603_v60  ;;  %v7653_v51 = vpop.f32.mrb[6].mxu0  ;;  %v4155_v30 = vrot.slane %v9771_v31, 1  ;;  %v3782_v28 = vpack.c.bf16 %v1323_v23, %v1323_v23  ;;  %v4455_v23 = vrot.slane %v9771_v31, 2 }
 0x2e7   : > { %7800 = vmatprep.subr.bf16.mxu0 %v8277_v25  ;;  %v7654_v42 = vpop.f32.mrb[7].mxu0  ;;  %v8305_v51 = vld [vmem:[%s8808_s8 + $0x6f8] sm:$0xff]  }
 0x2e8   : > { %v1911_v43 = vadd.f32 %v7652_v49, %v9721_v55  ;;  %v3856_v55 = vsel %vm1459_vm3, %v3855_v46, %v9771_v31  ;;  %v8304_v49 = vld [vmem:[%s8808_s8 + $0x740] sm:$0xff]   ;;  %v4156_v46 = vsel %vm1459_vm3, %v9761_v32, %v4155_v30 }
 0x2e9   : > { %3754 = vmatpush1.bf16.msra.mxu1 %v8276_v35  ;;  %v3863_v62 = vpack.c.b16 %v3856_v55, %v3856_v55  ;;  %v9824_v35 = vunpack.c.l.b16 %v3786_v21 }
 0x2ea   : > { %7801 = vmatpush3.bf16.msra.mxu0 %v8278_v37  ;;  %3755 = vmatprep.subr.bf16.mxu1 %v8603_v60  ;;  %v4161_v37 = vrot.slane %v9780_v39, 1 }
 0x2eb   : > { %v1950_v56 = vpop.f32.mrb[4].mxu1  ;;  %7802 = vmatprep.subr.bf16.mxu0 %v8280_v41  ;;  %v9832_v41 = vunpack.c.l.b16 %v3782_v28  ;;  %v3859_v42 = vrot.slane %v9824_v35, 7  ;;  %v8330_v28 = vld [vmem:[%s8808_s8 + $0x848] sm:$0xff]  }
 0x2ec   : > { %v9787_v58 = vadd.f32 %v1950_v56, %v1911_v43  ;;  %v1952_v54 = vpop.f32.mrb[5].mxu1  ;;  %v4162_v43 = vsel %vm1459_vm3, %v9768_v38, %v4161_v37  ;;  %v8329_v37 = vld [vmem:[%s8808_s8 + $0x7c8] sm:$0xff]  }
 0x2ed   : > { %v1953_v61 = vpop.f32.mrb[6].mxu1  ;;  %3756 = vmatpush1.bf16.msra.mxu1 %v8279_v47  ;;  %v4163_v47 = vpack.c.b16 %v4156_v46, %v4156_v46  ;;  %v4166_v52 = vpack.c.b16 %v4162_v43, %v4162_v43  ;;  %v3860_v55 = vsel %vm1459_vm3, %v3859_v42, %v9832_v41  ;;  %v8309_v54 = vld [vmem:[%s8808_s8 + $0x810] sm:$0xff]   ;;  %v8332_v42 = vld [vmem:[%s8808_s8 + $0x8d8] sm:$0xff]  }
 0x2ee   : > { %v1954_v1 = vpop.f32.mrb[7].mxu1  ;;  %7803 = vmatpush3.bf16.msra.mxu0 %v8281_v45  ;;  %7810 = vmatprep.subr.bf16.mxu1 %v8282_v50  ;;  %v4459_v45 = vrot.slane %v9713_v40, 1  ;;  %v8307_v50 = vld [vmem:[%s8808_s8 + $0x700] sm:$0xff]  }
 0x2ef   : > { %4063 = vmatprep.subr.bf16.mxu0 %v8603_v60 }
 0x2f0   : > { %3772 = vmatmul.mubr.bf16.vlgmr.msra.gmra.mrb[28].mxu1 %v3541_v59  ;;  %v4460_v15 = vsel %vm1459_vm3, %v4459_v45, %v4458_v8  ;;  %v8333_v8 = vld [vmem:[%s8808_s8 + $0x898] sm:$0xff]  }
 0x2f1   : > { %7811 = vmatpush3.bf16.msra.mxu1 %v8283_v57  ;;  %4056 = vmatmul.mubr.bf16.vlgmr.msra.gmra.mrb[32].mxu0 %v3863_v62  ;;  %v3865_v62 = vpack.c.b16 %v3860_v55, %v3860_v55  ;;  %v8335_v55 = vld [vmem:[%s8808_s8 + $0x8e0] sm:$0xff]  }
 0x2f2   : > { %4064 = vmatpush1.bf16.msra.mxu0 %v8284_v63  ;;  %7812 = vmatprep.subr.bf16.mxu1 %v8285_v2  ;;  %v8308_v63 = vld [vmem:[%s8808_s8 + $0x790] sm:$0xff]  }
 0x2f3   : > { %4065 = vmatprep.subr.bf16.mxu0 %v8603_v60  ;;  %4355 = vmatprep.mubr.bf16.mxu1 %v4164_v3  ;;  %v8310_v2 = vld [vmem:[%s8808_s8 + $0x7d0] sm:$0xff]   ;;  %v8312_v3 = vld [vmem:[%s8808_s8 + $0x818] sm:$0xff]  }
 0x2f4   : > { %7072 = vmatprep.mubr.msk.bf16.mxu0 %vm1624_vm4, %v3866_v5  ;;  %v8311_v5 = vld [vmem:[%s8808_s8 + $0x798] sm:$0xff]  }
 0x2f5   : > { %7813 = vmatpush3.bf16.msra.mxu1 %v8286_v4  ;;  %v4468_v4 = vpack.c.b16 %v4460_v15, %v4460_v15  ;;  %v8336_v15 = vld [vmem:[%s8808_s8 + $0x8a0] sm:$0xff]  }
 0x2f6   : > { %4066 = vmatpush1.bf16.msra.mxu0 %v8287_v26  ;;  %7814 = vmatprep.subr.bf16.mxu1 %v8288_v27  ;;  %v8315_v26 = vld [vmem:[%s8808_s8 + $0x820] sm:$0xff]  }
 0x2f7   : > { %4067 = vmatprep.subr.bf16.mxu0 %v8603_v60  ;;  %v8314_v27 = vld [vmem:[%s8808_s8 + $0x7a0] sm:$0xff]  }
 0x2f9   : > { %7815 = vmatpush3.bf16.msra.mxu1 %v8289_v6  ;;  %v8316_v6 = vld [vmem:[%s8808_s8 + $0x7e0] sm:$0xff]  }
 0x2fa   : > { %4068 = vmatpush1.bf16.msra.mxu0 %v8290_v7  ;;  %7816 = vmatprep.subr.bf16.mxu1 %v8291_v9  ;;  %v8318_v7 = vld [vmem:[%s8808_s8 + $0x828] sm:$0xff]  }
 0x2fb   : > { %4069 = vmatprep.subr.bf16.mxu0 %v8603_v60  ;;  %v8317_v9 = vld [vmem:[%s8808_s8 + $0x7a8] sm:$0xff]  }
 0x2fd   : > { %7817 = vmatpush3.bf16.msra.mxu1 %v8292_v10  ;;  %v8319_v10 = vld [vmem:[%s8808_s8 + $0x7e8] sm:$0xff]  }
 0x2fe   : > { %4070 = vmatpush1.bf16.msra.mxu0 %v8293_v11  ;;  %7818 = vmatprep.subr.bf16.mxu1 %v8294_v12  ;;  %v8321_v11 = vld [vmem:[%s8808_s8 + $0x830] sm:$0xff]  }
 0x2ff   : > { %4071 = vmatprep.subr.bf16.mxu0 %v8603_v60  ;;  %v8320_v12 = vld [vmem:[%s8808_s8 + $0x7b0] sm:$0xff]  }
 0x301   : > { %7819 = vmatpush3.bf16.msra.mxu1 %v8295_v13  ;;  %v8322_v13 = vld [vmem:[%s8808_s8 + $0x7f0] sm:$0xff]  }
 0x302   : > { %4072 = vmatpush1.bf16.msra.mxu0 %v8296_v14  ;;  %7820 = vmatprep.subr.bf16.mxu1 %v8297_v16  ;;  %v8324_v14 = vld [vmem:[%s8808_s8 + $0x838] sm:$0xff]  }
 0x303   : > { %4073 = vmatprep.subr.bf16.mxu0 %v8603_v60 }
 0x304   : > { %v7672_v29 = vpop.f32.mrb[8].mxu0 }
 0x305   : > { %7821 = vmatpush3.bf16.msra.mxu1 %v8298_v18  ;;  %v7673_v25 = vpop.f32.mrb[9].mxu0 }
 0x306   : > { %4074 = vmatpush1.bf16.msra.mxu0 %v8299_v19  ;;  %7822 = vmatprep.subr.bf16.mxu1 %v8300_v20  ;;  %v7674_v34 = vadd.f32 %v7673_v25, %v7672_v29  ;;  %v7675_v36 = vpop.f32.mrb[10].mxu0  ;;  %v8325_v19 = vld [vmem:[%s8808_s8 + $0x7f8] sm:$0xff]   ;;  %v8326_v29 = vld [vmem:[%s8808_s8 + $0x7c0] sm:$0xff]  }
 0x307   : > { %4075 = vmatprep.subr.bf16.mxu0 %v8603_v60  ;;  %v7676_v44 = vpop.f32.mrb[11].mxu0  ;;  %v8328_v25 = vld [vmem:[%s8808_s8 + $0x800] sm:$0xff]   ;;  %v4763_v36 = vrot.slane %v9713_v40, 2 }
 0x308   : > { %v4464_v44 = vrot.slane %v9780_v39, 2 }
 0x309   : > { %7823 = vmatpush3.bf16.msra.mxu1 %v8301_v22  ;;  %v8327_v22 = vld [vmem:[%s8808_s8 + $0x840] sm:$0xff]  }
 0x30a   : > { %4076 = vmatpush1.bf16.msra.mxu0 %v8302_v24  ;;  %7824 = vmatprep.subr.bf16.mxu1 %v8303_v33  ;;  %v4456_v24 = vrot.slane %v9761_v32, 1  ;;  %v4159_v33 = vrot.slane %v9832_v41, 1 }
 0x30b   : > { %4077 = vmatprep.subr.bf16.mxu0 %v8603_v60 }
 0x30c   : > { %v4160_v46 = vsel %vm1459_vm3, %v9824_v35, %v4159_v33  ;;  %v4457_v43 = vsel %vm1459_vm3, %v4456_v24, %v4455_v23  ;;  %v4768_v23 = vrot.slane %v9780_v39, 3  ;;  %v4769_v24 = vrot.slane %v9768_v38, 2 }
 0x30d   : > { %7825 = vmatpush3.bf16.msra.mxu1 %v8304_v49  ;;  %v8331_v49 = vld [vmem:[%s8808_s8 + $0x808] sm:$0xff]  }
 0x30e   : > { %4078 = vmatpush1.bf16.msra.mxu0 %v8305_v51  ;;  %4363 = vmatprep.subr.bf16.mxu1 %v8603_v60  ;;  %v4465_v51 = vrot.slane %v9768_v38, 1 }
 0x30f   : > { %v2253_v56 = vpop.f32.mrb[8].mxu1  ;;  %4079 = vmatprep.subr.bf16.mxu0 %v8603_v60 }
 0x310   : > { %v2254_v59 = vadd.f32 %v7674_v34, %v2253_v56  ;;  %v2255_v57 = vpop.f32.mrb[9].mxu1  ;;  %4356 = vmatmul.mubr.bf16.vlgmr.msra.gmra.mrb[32].mxu1 %v4163_v47  ;;  %v4762_v34 = vrot.slane %v9723_v53, 3  ;;  %v4165_v47 = vpack.c.b16 %v4160_v46, %v4160_v46  ;;  %v8356_v46 = vld [vmem:[%s8808_s8 + $0x918] sm:$0xff]  }
 0x311   : > { %v2256_v61 = vpop.f32.mrb[10].mxu1  ;;  %4364 = vmatpush1.bf16.msra.mxu1 %v8306_v48  ;;  %7148 = vmatprep.mubr.msk.bf16.mxu1 %vm1624_vm4, %v4166_v52  ;;  %v4467_v48 = vpack.c.b16 %v4457_v43, %v4457_v43  ;;  %v8334_v52 = vld [vmem:[%s8808_s8 + $0x850] sm:$0xff]  }
 0x312   : > { %v9851_v0 = vadd.f32 %v2254_v59, %v9787_v58  ;;  %v2257_v1 = vpop.f32.mrb[11].mxu1  ;;  %4080 = vmatpush1.bf16.msra.mxu0 %v8307_v50  ;;  %4365 = vmatprep.subr.bf16.mxu1 %v8603_v60  ;;  %v8313_v58 = vld [vmem:[%s8808_s8 + $0x7d8] sm:$0xff]   ;;  %v4764_v45 = vsel %vm1459_vm3, %v4763_v36, %v4762_v34  ;;  %v4466_v50 = vsel %vm1459_vm3, %v4465_v51, %v4464_v44  ;;  %v8355_v34 = vld [vmem:[%s8808_s8 + $0x888] sm:$0xff]   ;;  %v5066_v44 = vrot.slane %v9723_v53, 4 }
 0x313   : > { %7832 = vmatprep.subr.bf16.mxu0 %v8309_v54  ;;  %v4772_v54 = vpack.c.b16 %v4764_v45, %v4764_v45  ;;  %v4470_v61 = vpack.c.b16 %v4466_v50, %v4466_v50  ;;  %v4770_v36 = vsel %vm1459_vm3, %v4769_v24, %v4768_v23  ;;  %v5370_v23 = vrot.slane %v9723_v53, 5 }
 0x314   : > { %v4774_v51 = vpack.c.b16 %v4770_v36, %v4770_v36  ;;  %v5371_v24 = vrot.slane %v9713_v40, 4  ;;  %v8382_v36 = vld [vmem:[%s8808_s8 + $0xa68] sm:$0xff]  }
 0x315   : > { %4096 = vmatmul.mubr.bf16.vlgmr.msra.gmra.mrb[36].mxu0 %v3865_v62  ;;  %4366 = vmatpush1.bf16.msra.mxu1 %v8308_v63  ;;  %v8337_v63 = vld [vmem:[%s8808_s8 + $0x858] sm:$0xff]  }
 0x316   : > { %7833 = vmatpush3.bf16.msra.mxu0 %v8310_v2  ;;  %4367 = vmatprep.subr.bf16.mxu1 %v8603_v60 }
 0x317   : > { %7834 = vmatprep.subr.bf16.mxu0 %v8312_v3  ;;  %4659 = vmatprep.mubr.bf16.mxu0 %v4468_v4  ;;  %v8338_v3 = vld [vmem:[%s8808_s8 + $0x8e8] sm:$0xff]  }
 0x318   : > { %v8339_v4 = vld [vmem:[%s8808_s8 + $0x8a8] sm:$0xff]  }
 0x319   : > { %4368 = vmatpush1.bf16.msra.mxu1 %v8311_v5  ;;  %v8340_v5 = vld [vmem:[%s8808_s8 + $0x860] sm:$0xff]  }
 0x31a   : > { %7835 = vmatpush3.bf16.msra.mxu0 %v8313_v58  ;;  %4369 = vmatprep.subr.bf16.mxu1 %v8603_v60  ;;  %v8342_v58 = vld [vmem:[%s8808_s8 + $0x8b0] sm:$0xff]  }
 0x31b   : > { %7836 = vmatprep.subr.bf16.mxu0 %v8315_v26  ;;  %v8343_v26 = vld [vmem:[%s8808_s8 + $0x868] sm:$0xff]  }
 0x31d   : > { %4370 = vmatpush1.bf16.msra.mxu1 %v8314_v27  ;;  %v8344_v27 = vld [vmem:[%s8808_s8 + $0x8f8] sm:$0xff]  }
 0x31e   : > { %7837 = vmatpush3.bf16.msra.mxu0 %v8316_v6  ;;  %4371 = vmatprep.subr.bf16.mxu1 %v8603_v60  ;;  %v8345_v6 = vld [vmem:[%s8808_s8 + $0x8b8] sm:$0xff]  }
 0x31f   : > { %7838 = vmatprep.subr.bf16.mxu0 %v8318_v7  ;;  %v8346_v7 = vld [vmem:[%s8808_s8 + $0x870] sm:$0xff]  }
 0x321   : > { %4372 = vmatpush1.bf16.msra.mxu1 %v8317_v9  ;;  %v8347_v9 = vld [vmem:[%s8808_s8 + $0x900] sm:$0xff]  }
 0x322   : > { %7839 = vmatpush3.bf16.msra.mxu0 %v8319_v10  ;;  %4373 = vmatprep.subr.bf16.mxu1 %v8603_v60  ;;  %v8348_v10 = vld [vmem:[%s8808_s8 + $0x8c0] sm:$0xff]  }
 0x323   : > { %7840 = vmatprep.subr.bf16.mxu0 %v8321_v11 }
 0x324   : > { %v7694_v16 = vpop.f32.mrb[12].mxu0 }
 0x325   : > { %4374 = vmatpush1.bf16.msra.mxu1 %v8320_v12  ;;  %v7695_v18 = vpop.f32.mrb[13].mxu0  ;;  %v8349_v12 = vld [vmem:[%s8808_s8 + $0x878] sm:$0xff]  }
 0x326   : > { %7841 = vmatpush3.bf16.msra.mxu0 %v8322_v13  ;;  %4375 = vmatprep.subr.bf16.mxu1 %v8603_v60  ;;  %v7696_v20 = vadd.f32 %v7695_v18, %v7694_v16  ;;  %v7697_v21 = vpop.f32.mrb[14].mxu0  ;;  %v8351_v18 = vld [vmem:[%s8808_s8 + $0x8c8] sm:$0xff]  }
 0x327   : > { %7842 = vmatprep.subr.bf16.mxu0 %v8324_v14  ;;  %v7698_v30 = vpop.f32.mrb[15].mxu0  ;;  %v8350_v14 = vld [vmem:[%s8808_s8 + $0x908] sm:$0xff]   ;;  %v4759_v21 = vrot.slane %v9771_v31, 3 }
 0x328   : > { %v4760_v30 = vrot.slane %v9761_v32, 2 }
 0x329   : > { %4376 = vmatpush1.bf16.msra.mxu1 %v8323_v17 }
 0x32a   : > { %7843 = vmatpush3.bf16.msra.mxu0 %v8325_v19  ;;  %4377 = vmatprep.subr.bf16.mxu1 %v8603_v60  ;;  %v4761_v33 = vsel %vm1459_vm3, %v4760_v30, %v4759_v21  ;;  %v5063_v21 = vrot.slane %v9771_v31, 4  ;;  %v8380_v30 = vld [vmem:[%s8808_s8 + $0x9d8] sm:$0xff]  }
 0x32b   : > { %7844 = vmatprep.subr.bf16.mxu0 %v8327_v22  ;;  %v8353_v22 = vld [vmem:[%s8808_s8 + $0x910] sm:$0xff]  }
 0x32d   : > { %4378 = vmatpush1.bf16.msra.mxu1 %v8326_v29  ;;  %v8354_v29 = vld [vmem:[%s8808_s8 + $0x8d0] sm:$0xff]  }
 0x32e   : > { %7845 = vmatpush3.bf16.msra.mxu0 %v8328_v25  ;;  %4379 = vmatprep.subr.bf16.mxu1 %v8603_v60  ;;  %v4461_v25 = vrot.slane %v9832_v41, 2 }
 0x32f   : > { %7846 = vmatprep.subr.bf16.mxu0 %v8330_v28  ;;  %v4462_v28 = vrot.slane %v9824_v35, 1 }
 0x331   : > { %4380 = vmatpush1.bf16.msra.mxu1 %v8329_v37  ;;  %v4771_v37 = vpack.c.b16 %v4761_v33, %v4761_v33  ;;  %v4463_v43 = vsel %vm1459_vm3, %v4462_v28, %v4461_v25  ;;  %v5072_v25 = vrot.slane %v9780_v39, 4  ;;  %v8381_v28 = vld [vmem:[%s8808_s8 + $0x998] sm:$0xff]  }
 0x332   : > { %7847 = vmatpush3.bf16.msra.mxu0 %v8331_v49  ;;  %7854 = vmatprep.subr.bf16.mxu1 %v8332_v42  ;;  %v5067_v49 = vrot.slane %v9713_v40, 3  ;;  %v8357_v42 = vld [vmem:[%s8808_s8 + $0x890] sm:$0xff]   ;;  %v4469_v45 = vpack.c.b16 %v4463_v43, %v4463_v43  ;;  %v8384_v43 = vld [vmem:[%s8808_s8 + $0x9e0] sm:$0xff]  }
 0x333   : > { %v2557_v56 = vpop.f32.mrb[12].mxu1  ;;  %4667 = vmatprep.subr.bf16.mxu0 %v8603_v60 }
 0x334   : > { %v2558_v59 = vadd.f32 %v7696_v20, %v2557_v56  ;;  %v2559_v57 = vpop.f32.mrb[13].mxu1  ;;  %4396 = vmatmul.mubr.bf16.vlgmr.msra.gmra.mrb[36].mxu1 %v4165_v47  ;;  %v8352_v20 = vld [vmem:[%s8808_s8 + $0x880] sm:$0xff]  }
 0x335   : > { %v2560_v62 = vpop.f32.mrb[14].mxu1  ;;  %7855 = vmatpush3.bf16.msra.mxu1 %v8333_v8  ;;  %4660 = vmatmul.mubr.bf16.vlgmr.msra.gmra.mrb[40].mxu0 %v4467_v48  ;;  %v8359_v47 = vld [vmem:[%s8808_s8 + $0x9a0] sm:$0xff]   ;;  %v5068_v8 = vsel %vm1459_vm3, %v5067_v49, %v5066_v44  ;;  %v5372_v49 = vsel %vm1459_vm3, %v5371_v24, %v5370_v23  ;;  %v5070_v23 = vrot.slane %v9824_v35, 3 }
 0x336   : > { %v9903_v1 = vadd.f32 %v2558_v59, %v9851_v0  ;;  %v2561_v2 = vpop.f32.mrb[15].mxu1  ;;  %4668 = vmatpush1.bf16.msra.mxu0 %v8334_v52  ;;  %7856 = vmatprep.subr.bf16.mxu1 %v8335_v55  ;;  %v8341_v0 = vld [vmem:[%s8808_s8 + $0x8f0] sm:$0xff]   ;;  %v8358_v48 = vld [vmem:[%s8808_s8 + $0x920] sm:$0xff]   ;;  %v8362_v55 = vld [vmem:[%s8808_s8 + $0x9a8] sm:$0xff]   ;;  %v5076_v56 = vpack.c.b16 %v5068_v8, %v5068_v8  ;;  %v5380_v8 = vpack.c.b16 %v5372_v49, %v5372_v49 }
 0x337   : > { %4669 = vmatprep.subr.bf16.mxu0 %v8603_v60  ;;  %4963 = vmatprep.mubr.bf16.mxu1 %v4772_v54  ;;  %v8360_v52 = vld [vmem:[%s8808_s8 + $0x960] sm:$0xff]   ;;  %v8365_v2 = vld [vmem:[%s8808_s8 + $0x9b0] sm:$0xff]  }
 0x338   : > { %7224 = vmatprep.mubr.msk.bf16.mxu0 %vm1624_vm4, %v4470_v61 }
 0x339   : > { %7857 = vmatpush3.bf16.msra.mxu1 %v8336_v15  ;;  %v8361_v15 = vld [vmem:[%s8808_s8 + $0x928] sm:$0xff]  }
 0x33a   : > { %4670 = vmatpush1.bf16.msra.mxu0 %v8337_v63  ;;  %7858 = vmatprep.subr.bf16.mxu1 %v8338_v3  ;;  %v8363_v63 = vld [vmem:[%s8808_s8 + $0x968] sm:$0xff]   ;;  %v8364_v3 = vld [vmem:[%s8808_s8 + $0x930] sm:$0xff]  }
 0x33b   : > { %4671 = vmatprep.subr.bf16.mxu0 %v8603_v60 }
 0x33d   : > { %7859 = vmatpush3.bf16.msra.mxu1 %v8339_v4  ;;  %v8366_v4 = vld [vmem:[%s8808_s8 + $0x970] sm:$0xff]  }
 0x33e   : > { %4672 = vmatpush1.bf16.msra.mxu0 %v8340_v5  ;;  %7860 = vmatprep.subr.bf16.mxu1 %v8341_v0  ;;  %v8368_v5 = vld [vmem:[%s8808_s8 + $0x9b8] sm:$0xff]  }
 0x33f   : > { %4673 = vmatprep.subr.bf16.mxu0 %v8603_v60  ;;  %v8369_v0 = vld [vmem:[%s8808_s8 + $0x978] sm:$0xff]  }
 0x341   : > { %7861 = vmatpush3.bf16.msra.mxu1 %v8342_v58  ;;  %v8371_v58 = vld [vmem:[%s8808_s8 + $0x9c0] sm:$0xff]  }
 0x342   : > { %4674 = vmatpush1.bf16.msra.mxu0 %v8343_v26  ;;  %7862 = vmatprep.subr.bf16.mxu1 %v8344_v27  ;;  %v8370_v27 = vld [vmem:[%s8808_s8 + $0x940] sm:$0xff]  }
 0x343   : > { %4675 = vmatprep.subr.bf16.mxu0 %v8603_v60 }
 0x344   : > { %v7716_v11 = vpop.f32.mrb[16].mxu0 }
 0x345   : > { %7863 = vmatpush3.bf16.msra.mxu1 %v8345_v6  ;;  %v7717_v13 = vpop.f32.mrb[17].mxu0 }
 0x346   : > { %4676 = vmatpush1.bf16.msra.mxu0 %v8346_v7  ;;  %7864 = vmatprep.subr.bf16.mxu1 %v8347_v9  ;;  %v7718_v16 = vadd.f32 %v7717_v13, %v7716_v11  ;;  %v7719_v17 = vpop.f32.mrb[18].mxu0  ;;  %v8372_v7 = vld [vmem:[%s8808_s8 + $0x980] sm:$0xff]   ;;  %v8374_v11 = vld [vmem:[%s8808_s8 + $0x9c8] sm:$0xff]  }
 0x347   : > { %4677 = vmatprep.subr.bf16.mxu0 %v8603_v60  ;;  %v7720_v19 = vpop.f32.mrb[19].mxu0  ;;  %v8373_v13 = vld [vmem:[%s8808_s8 + $0x948] sm:$0xff]   ;;  %v8376_v17 = vld [vmem:[%s8808_s8 + $0x950] sm:$0xff]  }
 0x348   : > { %v4766_v19 = vrot.slane %v9824_v35, 2 }
 0x349   : > { %7865 = vmatpush3.bf16.msra.mxu1 %v8348_v10 }
 0x34a   : > { %4678 = vmatpush1.bf16.msra.mxu0 %v8349_v12  ;;  %7866 = vmatprep.subr.bf16.mxu1 %v8350_v14  ;;  %v8375_v14 = vld [vmem:[%s8808_s8 + $0x988] sm:$0xff]  }
 0x34b   : > { %4679 = vmatprep.subr.bf16.mxu0 %v8603_v60 }
 0x34d   : > { %7867 = vmatpush3.bf16.msra.mxu1 %v8351_v18  ;;  %v4765_v18 = vrot.slane %v9832_v41, 3 }
 0x34e   : > { %4680 = vmatpush1.bf16.msra.mxu0 %v8352_v20  ;;  %7868 = vmatprep.subr.bf16.mxu1 %v8353_v22  ;;  %v8378_v20 = vld [vmem:[%s8808_s8 + $0x990] sm:$0xff]   ;;  %v5064_v22 = vrot.slane %v9761_v32, 3 }
 0x34f   : > { %4681 = vmatprep.subr.bf16.mxu0 %v8603_v60  ;;  %v4767_v33 = vsel %vm1459_vm3, %v4766_v19, %v4765_v18  ;;  %v5376_v18 = vrot.slane %v9780_v39, 5  ;;  %v5377_v19 = vrot.slane %v9768_v38, 4 }
 0x350   : > { %v4773_v44 = vpack.c.b16 %v4767_v33, %v4767_v33  ;;  %v5674_v33 = vrot.slane %v9723_v53, 6 }
 0x351   : > { %7869 = vmatpush3.bf16.msra.mxu1 %v8354_v29  ;;  %v8379_v29 = vld [vmem:[%s8808_s8 + $0x958] sm:$0xff]   ;;  %v5378_v24 = vsel %vm1459_vm3, %v5377_v19, %v5376_v18  ;;  %v5978_v18 = vrot.slane %v9723_v53, 7  ;;  %v5979_v19 = vrot.slane %v9713_v40, 6 }
 0x352   : > { %4682 = vmatpush1.bf16.msra.mxu0 %v8355_v34  ;;  %4971 = vmatprep.subr.bf16.mxu1 %v8603_v60  ;;  %v5073_v34 = vrot.slane %v9768_v38, 3 }
 0x353   : > { %4683 = vmatprep.subr.bf16.mxu0 %v8603_v60 }
 0x354   : > { %4964 = vmatmul.mubr.bf16.vlgmr.msra.gmra.mrb[40].mxu1 %v4771_v37  ;;  %v5065_v37 = vsel %vm1459_vm3, %v5064_v22, %v5063_v21  ;;  %v8405_v22 = vld [vmem:[%s8808_s8 + $0xa18] sm:$0xff]  }
 0x355   : > { %4972 = vmatpush1.bf16.msra.mxu1 %v8356_v46  ;;  %7300 = vmatprep.mubr.msk.bf16.mxu1 %vm1624_vm4, %v4774_v51  ;;  %v8383_v46 = vld [vmem:[%s8808_s8 + $0xa28] sm:$0xff]   ;;  %v5075_v51 = vpack.c.b16 %v5065_v37, %v5065_v37 }
 0x356   : > { %4684 = vmatpush1.bf16.msra.mxu0 %v8357_v42  ;;  %4973 = vmatprep.subr.bf16.mxu1 %v8603_v60  ;;  %v5074_v42 = vsel %vm1459_vm3, %v5073_v34, %v5072_v25  ;;  %v5675_v25 = vrot.slane %v9713_v40, 5  ;;  %v8406_v34 = vld [vmem:[%s8808_s8 + $0xaa8] sm:$0xff]   ;;  %v5980_v40 = vsel %vm1459_vm3, %v5979_v19, %v5978_v18 }
 0x357   : > { %v2861_v50 = vpop.f32.mrb[16].mxu1  ;;  %7876 = vmatprep.subr.bf16.mxu0 %v8359_v47  ;;  %v8385_v47 = vld [vmem:[%s8808_s8 + $0xa70] sm:$0xff]  }
 0x358   : > { %v2862_v54 = vadd.f32 %v7718_v16, %v2861_v50  ;;  %v2863_v59 = vpop.f32.mrb[17].mxu1  ;;  %v8377_v16 = vld [vmem:[%s8808_s8 + $0x9d0] sm:$0xff]   ;;  %v8388_v50 = vld [vmem:[%s8808_s8 + $0xa78] sm:$0xff]   ;;  %v5676_v49 = vsel %vm1459_vm3, %v5675_v25, %v5674_v33 }
 0x359   : > { %v2864_v57 = vpop.f32.mrb[18].mxu1  ;;  %4700 = vmatmul.mubr.bf16.vlgmr.msra.gmra.mrb[44].mxu0 %v4469_v45  ;;  %4974 = vmatpush1.bf16.msra.mxu1 %v8358_v48  ;;  %v5078_v45 = vpack.c.b16 %v5074_v42, %v5074_v42  ;;  %v8386_v48 = vld [vmem:[%s8808_s8 + $0xa30] sm:$0xff]   ;;  %v8433_v33 = vld [vmem:[%s8808_s8 + $0xbb8] sm:$0xff]  }
 0x35a   : > { %v9955_v61 = vadd.f32 %v2862_v54, %v9903_v1  ;;  %v2865_v62 = vpop.f32.mrb[19].mxu1  ;;  %7877 = vmatpush3.bf16.msra.mxu0 %v8360_v52  ;;  %4975 = vmatprep.subr.bf16.mxu1 %v8603_v60  ;;  %v8367_v1 = vld [vmem:[%s8808_s8 + $0x938] sm:$0xff]   ;;  %v8387_v52 = vld [vmem:[%s8808_s8 + $0x9e8] sm:$0xff]   ;;  %v8410_v42 = vld [vmem:[%s8808_s8 + $0xaf0] sm:$0xff]  }
 0x35b   : > { %7878 = vmatprep.subr.bf16.mxu0 %v8362_v55  ;;  %5267 = vmatprep.mubr.bf16.mxu0 %v5076_v56  ;;  %v8389_v57 = vld [vmem:[%s8808_s8 + $0xa38] sm:$0xff]  }
 0x35d   : > { %4976 = vmatpush1.bf16.msra.mxu1 %v8361_v15 }
 0x35e   : > { %7879 = vmatpush3.bf16.msra.mxu0 %v8363_v63  ;;  %4977 = vmatprep.subr.bf16.mxu1 %v8603_v60  ;;  %v8390_v63 = vld [vmem:[%s8808_s8 + $0x9f0] sm:$0xff]  }
 0x35f   : > { %7880 = vmatprep.subr.bf16.mxu0 %v8365_v2  ;;  %v8391_v2 = vld [vmem:[%s8808_s8 + $0xa80] sm:$0xff]  }
 0x361   : > { %4978 = vmatpush1.bf16.msra.mxu1 %v8364_v3  ;;  %v8392_v3 = vld [vmem:[%s8808_s8 + $0xa40] sm:$0xff]  }
 0x362   : > { %7881 = vmatpush3.bf16.msra.mxu0 %v8366_v4  ;;  %4979 = vmatprep.subr.bf16.mxu1 %v8603_v60  ;;  %v8393_v4 = vld [vmem:[%s8808_s8 + $0x9f8] sm:$0xff]  }
 0x363   : > { %7882 = vmatprep.subr.bf16.mxu0 %v8368_v5  ;;  %v8395_v5 = vld [vmem:[%s8808_s8 + $0xa48] sm:$0xff]  }
 0x364   : > { %v7738_v26 = vpop.f32.mrb[20].mxu0 }
 0x365   : > { %4980 = vmatpush1.bf16.msra.mxu1 %v8367_v1  ;;  %v7739_v6 = vpop.f32.mrb[21].mxu0  ;;  %v8394_v1 = vld [vmem:[%s8808_s8 + $0xa88] sm:$0xff]  }
 0x366   : > { %7883 = vmatpush3.bf16.msra.mxu0 %v8369_v0  ;;  %4981 = vmatprep.subr.bf16.mxu1 %v8603_v60  ;;  %v7740_v9 = vadd.f32 %v7739_v6, %v7738_v26  ;;  %v7741_v10 = vpop.f32.mrb[22].mxu0  ;;  %v8397_v26 = vld [vmem:[%s8808_s8 + $0xa90] sm:$0xff]  }
 0x367   : > { %7884 = vmatprep.subr.bf16.mxu0 %v8371_v58  ;;  %v7742_v12 = vpop.f32.mrb[23].mxu0  ;;  %v8396_v58 = vld [vmem:[%s8808_s8 + $0xa00] sm:$0xff]   ;;  %v8399_v10 = vld [vmem:[%s8808_s8 + $0xa08] sm:$0xff]  }
 0x368   : > { %v8401_v12 = vld [vmem:[%s8808_s8 + $0xa58] sm:$0xff]  }
 0x369   : > { %4982 = vmatpush1.bf16.msra.mxu1 %v8370_v27 }
 0x36a   : > { %7885 = vmatpush3.bf16.msra.mxu0 %v8372_v7  ;;  %4983 = vmatprep.subr.bf16.mxu1 %v8603_v60 }
 0x36b   : > { %7886 = vmatprep.subr.bf16.mxu0 %v8374_v11  ;;  %v8400_v11 = vld [vmem:[%s8808_s8 + $0xa98] sm:$0xff]  }
 0x36d   : > { %4984 = vmatpush1.bf16.msra.mxu1 %v8373_v13  ;;  %v5367_v13 = vrot.slane %v9771_v31, 5 }
 0x36e   : > { %7887 = vmatpush3.bf16.msra.mxu0 %v8375_v14  ;;  %4985 = vmatprep.subr.bf16.mxu1 %v8603_v60  ;;  %v5368_v14 = vrot.slane %v9761_v32, 4 }
 0x36f   : > { %7888 = vmatprep.subr.bf16.mxu0 %v8377_v16  ;;  %v8402_v16 = vld [vmem:[%s8808_s8 + $0xa10] sm:$0xff]  }
 0x370   : > { %v5369_v21 = vsel %vm1459_vm3, %v5368_v14, %v5367_v13  ;;  %v8428_v13 = vld [vmem:[%s8808_s8 + $0xb20] sm:$0xff]   ;;  %v5671_v14 = vrot.slane %v9771_v31, 6 }
 0x371   : > { %4986 = vmatpush1.bf16.msra.mxu1 %v8376_v17  ;;  %v8403_v17 = vld [vmem:[%s8808_s8 + $0xaa0] sm:$0xff]  }
 0x372   : > { %7889 = vmatpush3.bf16.msra.mxu0 %v8378_v20  ;;  %4987 = vmatprep.subr.bf16.mxu1 %v8603_v60  ;;  %v8404_v20 = vld [vmem:[%s8808_s8 + $0xa60] sm:$0xff]  }
 0x373   : > { %7890 = vmatprep.subr.bf16.mxu0 %v8380_v30  ;;  %v5069_v30 = vrot.slane %v9832_v41, 4 }
 0x375   : > { %4988 = vmatpush1.bf16.msra.mxu1 %v8379_v29  ;;  %v5379_v29 = vpack.c.b16 %v5369_v21, %v5369_v21  ;;  %v5071_v37 = vsel %vm1459_vm3, %v5070_v23, %v5069_v30  ;;  %v5681_v30 = vrot.slane %v9768_v38, 5  ;;  %v8431_v23 = vld [vmem:[%s8808_s8 + $0xb28] sm:$0xff]  }
 0x376   : > { %7891 = vmatpush3.bf16.msra.mxu0 %v8381_v28  ;;  %7898 = vmatprep.subr.bf16.mxu1 %v8382_v36  ;;  %v5382_v28 = vpack.c.b16 %v5378_v24, %v5378_v24  ;;  %v8407_v36 = vld [vmem:[%s8808_s8 + $0xa20] sm:$0xff]   ;;  %v8432_v24 = vld [vmem:[%s8808_s8 + $0xbf8] sm:$0xff]  }
 0x377   : > { %5275 = vmatprep.subr.bf16.mxu0 %v8603_v60 }
 0x378   : > { %5004 = vmatmul.mubr.bf16.vlgmr.msra.gmra.mrb[44].mxu1 %v4773_v44  ;;  %v8409_v44 = vld [vmem:[%s8808_s8 + $0xb30] sm:$0xff]  }
 0x379   : > { %7899 = vmatpush3.bf16.msra.mxu1 %v8383_v46  ;;  %5268 = vmatmul.mubr.bf16.vlgmr.msra.gmra.mrb[48].mxu0 %v5075_v51  ;;  %v5077_v46 = vpack.c.b16 %v5071_v37, %v5071_v37  ;;  %v8408_v51 = vld [vmem:[%s8808_s8 + $0xab0] sm:$0xff]   ;;  %v5988_v37 = vpack.c.b16 %v5980_v40, %v5980_v40 }
 0x37a   : > { %5276 = vmatpush1.bf16.msra.mxu0 %v8384_v43  ;;  %7900 = vmatprep.subr.bf16.mxu1 %v8385_v47  ;;  %v8412_v43 = vld [vmem:[%s8808_s8 + $0xb38] sm:$0xff]   ;;  %v5684_v47 = vpack.c.b16 %v5676_v49, %v5676_v49  ;;  %v8436_v49 = vld [vmem:[%s8808_s8 + $0xbc0] sm:$0xff]  }
 0x37b   : > { %v3165_v55 = vpop.f32.mrb[20].mxu1  ;;  %5277 = vmatprep.subr.bf16.mxu0 %v8603_v60  ;;  %5571 = vmatprep.mubr.bf16.mxu1 %v5380_v8  ;;  %v8411_v8 = vld [vmem:[%s8808_s8 + $0xab8] sm:$0xff]  }
 0x37c   : > { %v3166_v56 = vadd.f32 %v7740_v9, %v3165_v55  ;;  %v3167_v54 = vpop.f32.mrb[21].mxu1  ;;  %7376 = vmatprep.mubr.msk.bf16.mxu0 %vm1624_vm4, %v5078_v45  ;;  %v8398_v9 = vld [vmem:[%s8808_s8 + $0xa50] sm:$0xff]   ;;  %v8413_v45 = vld [vmem:[%s8808_s8 + $0xaf8] sm:$0xff]  }
 0x37d   : > { %v3168_v59 = vpop.f32.mrb[22].mxu1  ;;  %7901 = vmatpush3.bf16.msra.mxu1 %v8386_v48  ;;  %v8414_v54 = vld [vmem:[%s8808_s8 + $0xac0] sm:$0xff]  }
 0x37e   : > { %v10007_v15 = vadd.f32 %v3166_v56, %v9955_v61  ;;  %v3169_v62 = vpop.f32.mrb[23].mxu1  ;;  %5278 = vmatpush1.bf16.msra.mxu0 %v8387_v52  ;;  %7902 = vmatprep.subr.bf16.mxu1 %v8388_v50  ;;  %v8415_v52 = vld [vmem:[%s8808_s8 + $0xb40] sm:$0xff]  }
 0x37f   : > { %5279 = vmatprep.subr.bf16.mxu0 %v8603_v60  ;;  %v8416_v62 = vld [vmem:[%s8808_s8 + $0xb00] sm:$0xff]  }
 0x381   : > { %7903 = vmatpush3.bf16.msra.mxu1 %v8389_v57 }
 0x382   : > { %5280 = vmatpush1.bf16.msra.mxu0 %v8390_v63  ;;  %7904 = vmatprep.subr.bf16.mxu1 %v8391_v2  ;;  %v8418_v63 = vld [vmem:[%s8808_s8 + $0xb48] sm:$0xff]  }
 0x383   : > { %5281 = vmatprep.subr.bf16.mxu0 %v8603_v60 }
 0x384   : > { %v7760_v61 = vpop.f32.mrb[24].mxu0 }
 0x385   : > { %7905 = vmatpush3.bf16.msra.mxu1 %v8392_v3  ;;  %v7761_v0 = vpop.f32.mrb[25].mxu0  ;;  %v8417_v3 = vld [vmem:[%s8808_s8 + $0xac8] sm:$0xff]  }
 0x386   : > { %5282 = vmatpush1.bf16.msra.mxu0 %v8393_v4  ;;  %7906 = vmatprep.subr.bf16.mxu1 %v8394_v1  ;;  %v10019_v27 = vadd.f32 %v7761_v0, %v7760_v61  ;;  %v7763_v6 = vpop.f32.mrb[26].mxu0 }
 0x387   : > { %5283 = vmatprep.subr.bf16.mxu0 %v8603_v60  ;;  %v7764_v7 = vpop.f32.mrb[27].mxu0  ;;  %v8423_v6 = vld [vmem:[%s8808_s8 + $0xad8] sm:$0xff]  }
 0x388   : > { %v8425_v7 = vld [vmem:[%s8808_s8 + $0xb18] sm:$0xff]  }
 0x389   : > { %7907 = vmatpush3.bf16.msra.mxu1 %v8395_v5  ;;  %v8421_v5 = vld [vmem:[%s8808_s8 + $0xb50] sm:$0xff]  }
 0x38a   : > { %5284 = vmatpush1.bf16.msra.mxu0 %v8396_v58  ;;  %7908 = vmatprep.subr.bf16.mxu1 %v8397_v26  ;;  %v8420_v58 = vld [vmem:[%s8808_s8 + $0xad0] sm:$0xff]  }
 0x38b   : > { %5285 = vmatprep.subr.bf16.mxu0 %v8603_v60  ;;  %v8422_v26 = vld [vmem:[%s8808_s8 + $0xb10] sm:$0xff]  }
 0x38d   : > { %7909 = vmatpush3.bf16.msra.mxu1 %v8398_v9  ;;  %v8427_v9 = vld [vmem:[%s8808_s8 + $0xb60] sm:$0xff]  }
 0x38e   : > { %5286 = vmatpush1.bf16.msra.mxu0 %v8399_v10  ;;  %7910 = vmatprep.subr.bf16.mxu1 %v8400_v11  ;;  %v8426_v10 = vld [vmem:[%s8808_s8 + $0xae0] sm:$0xff]   ;;  %v5373_v11 = vrot.slane %v9832_v41, 5 }
 0x38f   : > { %5287 = vmatprep.subr.bf16.mxu0 %v8603_v60 }
 0x391   : > { %7911 = vmatpush3.bf16.msra.mxu1 %v8401_v12  ;;  %v5374_v12 = vrot.slane %v9824_v35, 4 }
 0x392   : > { %5288 = vmatpush1.bf16.msra.mxu0 %v8402_v16  ;;  %7912 = vmatprep.subr.bf16.mxu1 %v8403_v17  ;;  %v5672_v16 = vrot.slane %v9761_v32, 5  ;;  %v8430_v17 = vld [vmem:[%s8808_s8 + $0xb68] sm:$0xff]  }
 0x393   : > { %5289 = vmatprep.subr.bf16.mxu0 %v8603_v60  ;;  %v5375_v21 = vsel %vm1459_vm3, %v5374_v12, %v5373_v11  ;;  %v8454_v11 = vld [vmem:[%s8808_s8 + $0xbf0] sm:$0xff]  }
 0x394   : > { %v5673_v53 = vsel %vm1459_vm3, %v5672_v16, %v5671_v14 }
 0x395   : > { %7913 = vmatpush3.bf16.msra.mxu1 %v8404_v20  ;;  %v8429_v20 = vld [vmem:[%s8808_s8 + $0xae8] sm:$0xff]   ;;  %v5683_v25 = vpack.c.b16 %v5673_v53, %v5673_v53  ;;  %v8460_v53 = vld [vmem:[%s8808_s8 + $0xc50] sm:$0xff]  }
 0x396   : > { %5290 = vmatpush1.bf16.msra.mxu0 %v8405_v22  ;;  %5579 = vmatprep.subr.bf16.mxu1 %v8603_v60  ;;  %v5680_v22 = vrot.slane %v9780_v39, 6 }
 0x397   : > { %5291 = vmatprep.subr.bf16.mxu0 %v8603_v60 }
 0x398   : > { %5572 = vmatmul.mubr.bf16.vlgmr.msra.gmra.mrb[48].mxu1 %v5379_v29  ;;  %v5381_v29 = vpack.c.b16 %v5375_v21, %v5375_v21  ;;  %v8459_v21 = vld [vmem:[%s8808_s8 + $0xc48] sm:$0xff]  }
 0x399   : > { %5580 = vmatpush1.bf16.msra.mxu1 %v8406_v34  ;;  %7452 = vmatprep.mubr.msk.bf16.mxu1 %vm1624_vm4, %v5382_v28  ;;  %v5682_v34 = vsel %vm1459_vm3, %v5681_v30, %v5680_v22  ;;  %v8434_v28 = vld [vmem:[%s8808_s8 + $0xb70] sm:$0xff]  }
 0x39a   : > { %5292 = vmatpush1.bf16.msra.mxu0 %v8407_v36  ;;  %5581 = vmatprep.subr.bf16.mxu1 %v8603_v60  ;;  %v8435_v36 = vld [vmem:[%s8808_s8 + $0xc00] sm:$0xff]  }
 0x39b   : > { %7920 = vmatprep.subr.bf16.mxu0 %v8409_v44  ;;  %v5686_v44 = vpack.c.b16 %v5682_v34, %v5682_v34 }
 0x39d   : > { %5308 = vmatmul.mubr.bf16.vlgmr.msra.gmra.mrb[52].mxu0 %v5077_v46  ;;  %5582 = vmatpush1.bf16.msra.mxu1 %v8408_v51  ;;  %v8437_v46 = vld [vmem:[%s8808_s8 + $0xb78] sm:$0xff]   ;;  %v8438_v51 = vld [vmem:[%s8808_s8 + $0xc08] sm:$0xff]  }
 0x39e   : > { %7921 = vmatpush3.bf16.msra.mxu0 %v8410_v42  ;;  %5583 = vmatprep.subr.bf16.mxu1 %v8603_v60  ;;  %v8439_v42 = vld [vmem:[%s8808_s8 + $0xbc8] sm:$0xff]  }
 0x39f   : > { %v3469_v48 = vpop.f32.mrb[24].mxu1  ;;  %7922 = vmatprep.subr.bf16.mxu0 %v8412_v43  ;;  %5875 = vmatprep.mubr.bf16.mxu0 %v5684_v47  ;;  %v8440_v43 = vld [vmem:[%s8808_s8 + $0xb80] sm:$0xff]   ;;  %v8441_v47 = vld [vmem:[%s8808_s8 + $0xc10] sm:$0xff]  }
 0x3a0   : > { %v3470_v50 = vadd.f32 %v10019_v27, %v3469_v48  ;;  %v3471_v55 = vpop.f32.mrb[25].mxu1  ;;  %v8424_v27 = vld [vmem:[%s8808_s8 + $0xb58] sm:$0xff]  }
 0x3a1   : > { %v3472_v56 = vpop.f32.mrb[26].mxu1  ;;  %5584 = vmatpush1.bf16.msra.mxu1 %v8411_v8  ;;  %v8442_v55 = vld [vmem:[%s8808_s8 + $0xbd0] sm:$0xff]  }
 0x3a2   : > { %v10062_v59 = vadd.f32 %v3470_v50, %v10007_v15  ;;  %v3473_v57 = vpop.f32.mrb[27].mxu1  ;;  %7923 = vmatpush3.bf16.msra.mxu0 %v8413_v45  ;;  %5585 = vmatprep.subr.bf16.mxu1 %v8603_v60  ;;  %v8419_v15 = vld [vmem:[%s8808_s8 + $0xb08] sm:$0xff]  }
 0x3a3   : > { %7924 = vmatprep.subr.bf16.mxu0 %v8415_v52 }
 0x3a4   : > { %v7782_v2 = vpop.f32.mrb[28].mxu0 }
 0x3a5   : > { %5586 = vmatpush1.bf16.msra.mxu1 %v8414_v54  ;;  %v7783_v4 = vpop.f32.mrb[29].mxu0 }
 0x3a6   : > { %7925 = vmatpush3.bf16.msra.mxu0 %v8416_v62  ;;  %5587 = vmatprep.subr.bf16.mxu1 %v8603_v60  ;;  %v10070_v1 = vadd.f32 %v7783_v4, %v7782_v2  ;;  %v7785_v61 = vpop.f32.mrb[30].mxu0  ;;  %v8443_v62 = vld [vmem:[%s8808_s8 + $0xb88] sm:$0xff]  }
 0x3a7   : > { %7926 = vmatprep.subr.bf16.mxu0 %v8418_v63  ;;  %v7786_v0 = vpop.f32.mrb[31].mxu0  ;;  %v8444_v63 = vld [vmem:[%s8808_s8 + $0xc18] sm:$0xff]   ;;  %v8448_v61 = vld [vmem:[%s8808_s8 + $0xbe0] sm:$0xff]  }
 0x3a8   : > { %v8450_v0 = vld [vmem:[%s8808_s8 + $0xc28] sm:$0xff]  }
 0x3a9   : > { %5588 = vmatpush1.bf16.msra.mxu1 %v8417_v3 }
 0x3aa   : > { %7927 = vmatpush3.bf16.msra.mxu0 %v8419_v15  ;;  %5589 = vmatprep.subr.bf16.mxu1 %v8603_v60  ;;  %v8445_v15 = vld [vmem:[%s8808_s8 + $0xbd8] sm:$0xff]  }
 0x3ab   : > { %7928 = vmatprep.subr.bf16.mxu0 %v8421_v5  ;;  %v8449_v5 = vld [vmem:[%s8808_s8 + $0xb98] sm:$0xff]  }
 0x3ad   : > { %5590 = vmatpush1.bf16.msra.mxu1 %v8420_v58  ;;  %v8451_v58 = vld [vmem:[%s8808_s8 + $0xbe8] sm:$0xff]  }
 0x3ae   : > { %7929 = vmatpush3.bf16.msra.mxu0 %v8422_v26  ;;  %5591 = vmatprep.subr.bf16.mxu1 %v8603_v60  ;;  %v5975_v26 = vrot.slane %v9771_v31, 7  ;;  %v8455_v31 = vld [vmem:[%s8808_s8 + $0xba8] sm:$0xff]  }
 0x3af   : > { %7930 = vmatprep.subr.bf16.mxu0 %v8424_v27  ;;  %v5976_v27 = vrot.slane %v9761_v32, 6  ;;  %v5677_v32 = vrot.slane %v9832_v41, 6 }
 0x3b1   : > { %5592 = vmatpush1.bf16.msra.mxu1 %v8423_v6  ;;  %v8452_v6 = vld [vmem:[%s8808_s8 + $0xba0] sm:$0xff]   ;;  %v5977_v12 = vsel %vm1459_vm3, %v5976_v27, %v5975_v26 }
 0x3b2   : > { %7931 = vmatpush3.bf16.msra.mxu0 %v8425_v7  ;;  %5593 = vmatprep.subr.bf16.mxu1 %v8603_v60  ;;  %v8453_v7 = vld [vmem:[%s8808_s8 + $0xc30] sm:$0xff]  }
 0x3b3   : > { %7932 = vmatprep.subr.bf16.mxu0 %v8427_v9  ;;  %v5984_v9 = vrot.slane %v9780_v39, 7  ;;  %v8456_v39 = vld [vmem:[%s8808_s8 + $0xc38] sm:$0xff]  }
 0x3b5   : > { %5594 = vmatpush1.bf16.msra.mxu1 %v8426_v10  ;;  %v5985_v10 = vrot.slane %v9768_v38, 6  ;;  %v5987_v38 = vpack.c.b16 %v5977_v12, %v5977_v12 }
 0x3b6   : > { %7933 = vmatpush3.bf16.msra.mxu0 %v8428_v13  ;;  %5595 = vmatprep.subr.bf16.mxu1 %v8603_v60  ;;  %v5678_v13 = vrot.slane %v9824_v35, 5 }
 0x3b7   : > { %7934 = vmatprep.subr.bf16.mxu0 %v8430_v17  ;;  %v5986_v14 = vsel %vm1459_vm3, %v5985_v10, %v5984_v9  ;;  %v8457_v17 = vld [vmem:[%s8808_s8 + $0xbb0] sm:$0xff]  }
 0x3b8   : > { %v5990_v16 = vpack.c.b16 %v5986_v14, %v5986_v14  ;;  %v5679_v18 = vsel %vm1459_vm3, %v5678_v13, %v5677_v32 }
 0x3b9   : > { %5596 = vmatpush1.bf16.msra.mxu1 %v8429_v20  ;;  %v5685_v19 = vpack.c.b16 %v5679_v18, %v5679_v18  ;;  %v8458_v20 = vld [vmem:[%s8808_s8 + $0xc40] sm:$0xff]  }
 0x3ba   : > { %7935 = vmatpush3.bf16.msra.mxu0 %v8431_v23  ;;  %7942 = vmatprep.subr.bf16.mxu1 %v8432_v24 }
 0x3bb   : > { %5883 = vmatprep.subr.bf16.mxu0 %v8603_v60 }
 0x3bc   : > { %5612 = vmatmul.mubr.bf16.vlgmr.msra.gmra.mrb[52].mxu1 %v5381_v29 }
 0x3bd   : > { %7943 = vmatpush3.bf16.msra.mxu1 %v8433_v33  ;;  %5876 = vmatmul.mubr.bf16.vlgmr.msra.gmra.mrb[56].mxu0 %v5683_v25  ;;  %v8461_v25 = vld [vmem:[%s8808_s8 + $0xc58] sm:$0xff]  }
 0x3be   : > { %5884 = vmatpush1.bf16.msra.mxu0 %v8434_v28  ;;  %7944 = vmatprep.subr.bf16.mxu1 %v8435_v36 }
 0x3bf   : > { %5885 = vmatprep.subr.bf16.mxu0 %v8603_v60  ;;  %6179 = vmatprep.mubr.bf16.mxu1 %v5988_v37 }
 0x3c0   : > { %7528 = vmatprep.mubr.msk.bf16.mxu0 %vm1624_vm4, %v5686_v44  ;;  %v8462_v44 = vld [vmem:[%s8808_s8 + $0xc60] sm:$0xff]  }
 0x3c1   : > { %7945 = vmatpush3.bf16.msra.mxu1 %v8436_v49  ;;  %v8463_v49 = vld [vmem:[%s8808_s8 + $0xc68] sm:$0xff]  }
 0x3c2   : > { %5886 = vmatpush1.bf16.msra.mxu0 %v8437_v46  ;;  %7946 = vmatprep.subr.bf16.mxu1 %v8438_v51  ;;  %v8464_v46 = vld [vmem:[%s8808_s8 + $0xc70] sm:$0xff]   ;;  %v5981_v51 = vrot.slane %v9832_v41, 7 }
 0x3c3   : > { %v3773_v8 = vpop.f32.mrb[28].mxu1  ;;  %5887 = vmatprep.subr.bf16.mxu0 %v8603_v60 }
 0x3c4   : > { %v3774_v45 = vadd.f32 %v10070_v1, %v3773_v8  ;;  %v3775_v48 = vpop.f32.mrb[29].mxu1  ;;  %v7804_v52 = vpop.f32.mrb[32].mxu0  ;;  %v8447_v1 = vld [vmem:[%s8808_s8 + $0xc20] sm:$0xff]  }
 0x3c5   : > { %v3776_v50 = vpop.f32.mrb[30].mxu1  ;;  %7947 = vmatpush3.bf16.msra.mxu1 %v8439_v42  ;;  %v7805_v56 = vpop.f32.mrb[33].mxu0  ;;  %v5982_v42 = vrot.slane %v9824_v35, 6 }
 0x3c6   : > { %v10117_v54 = vadd.f32 %v3774_v45, %v10062_v59  ;;  %v3777_v57 = vpop.f32.mrb[31].mxu1  ;;  %5888 = vmatpush1.bf16.msra.mxu0 %v8440_v43  ;;  %7948 = vmatprep.subr.bf16.mxu1 %v8441_v47  ;;  %v10121_v2 = vadd.f32 %v7805_v56, %v7804_v52  ;;  %v7807_v3 = vpop.f32.mrb[34].mxu0  ;;  %v8446_v59 = vld [vmem:[%s8808_s8 + $0xb90] sm:$0xff]   ;;  %v8465_v43 = vld [vmem:[%s8808_s8 + $0xc78] sm:$0xff]  }
 0x3c7   : > { %5889 = vmatprep.subr.bf16.mxu0 %v8603_v60  ;;  %v7808_v4 = vpop.f32.mrb[35].mxu0  ;;  %v5983_v47 = vsel %vm1459_vm3, %v5982_v42, %v5981_v51 }
 0x3c8   : > { %v5989_v8 = vpack.c.b16 %v5983_v47, %v5983_v47 }
 0x3c9   : > { %7949 = vmatpush3.bf16.msra.mxu1 %v8442_v55 }
 0x3ca   : > { %5890 = vmatpush1.bf16.msra.mxu0 %v8443_v62  ;;  %7950 = vmatprep.subr.bf16.mxu1 %v8444_v63 }
 0x3cb   : > { %5891 = vmatprep.subr.bf16.mxu0 %v8603_v60 }
 0x3cd   : > { %7951 = vmatpush3.bf16.msra.mxu1 %v8445_v15 }
 0x3ce   : > { %5892 = vmatpush1.bf16.msra.mxu0 %v8446_v59  ;;  %7952 = vmatprep.subr.bf16.mxu1 %v8447_v1 }
 0x3cf   : > { %5893 = vmatprep.subr.bf16.mxu0 %v8603_v60 }
 0x3d1   : > { %7953 = vmatpush3.bf16.msra.mxu1 %v8448_v61 }
 0x3d2   : > { %5894 = vmatpush1.bf16.msra.mxu0 %v8449_v5  ;;  %7954 = vmatprep.subr.bf16.mxu1 %v8450_v0 }
 0x3d3   : > { %5895 = vmatprep.subr.bf16.mxu0 %v8603_v60 }
 0x3d5   : > { %7955 = vmatpush3.bf16.msra.mxu1 %v8451_v58 }
 0x3d6   : > { %5896 = vmatpush1.bf16.msra.mxu0 %v8452_v6  ;;  %7956 = vmatprep.subr.bf16.mxu1 %v8453_v7 }
 0x3d7   : > { %5897 = vmatprep.subr.bf16.mxu0 %v8603_v60 }
 0x3d9   : > { %7957 = vmatpush3.bf16.msra.mxu1 %v8454_v11 }
 0x3da   : > { %5898 = vmatpush1.bf16.msra.mxu0 %v8455_v31  ;;  %6187 = vmatprep.subr.bf16.mxu1 %v8603_v60 }
 0x3db   : > { %5899 = vmatprep.subr.bf16.mxu0 %v8603_v60 }
 0x3dc   : > { %6180 = vmatmul.mubr.bf16.vlgmr.msra.gmra.mrb[56].mxu1 %v5987_v38 }
 0x3dd   : > { %6188 = vmatpush1.bf16.msra.mxu1 %v8456_v39  ;;  %7604 = vmatprep.mubr.msk.bf16.mxu1 %vm1624_vm4, %v5990_v16 }
 0x3de   : > { %5900 = vmatpush1.bf16.msra.mxu0 %v8457_v17  ;;  %6189 = vmatprep.subr.bf16.mxu1 %v8603_v60 }
 0x3e1   : > { %5916 = vmatmul.mubr.bf16.vlgmr.msra.gmra.mrb[60].mxu0 %v5685_v19  ;;  %6190 = vmatpush1.bf16.msra.mxu1 %v8458_v20 }
 0x3e2   : > { %6191 = vmatprep.subr.bf16.mxu1 %v8603_v60 }
 0x3e3   : > { %v7826_v22 = vpop.f32.mrb[32].mxu1 }
 0x3e4   : > { %v7827_v30 = vpop.f32.mrb[33].mxu1 }
 0x3e5   : > { %v7828_v23 = vadd.f32 %v7827_v30, %v7826_v22  ;;  %v7829_v24 = vpop.f32.mrb[34].mxu1  ;;  %6192 = vmatpush1.bf16.msra.mxu1 %v8459_v21 }
 0x3e6   : > { %v7830_v29 = vpop.f32.mrb[35].mxu1  ;;  %6193 = vmatprep.subr.bf16.mxu1 %v8603_v60 }
 0x3e8   : > { %v4097_v40 = vpop.f32.mrb[36].mxu0 }
 0x3e9   : > { %v4098_v33 = vadd.f32 %v10121_v2, %v4097_v40  ;;  %6194 = vmatpush1.bf16.msra.mxu1 %v8460_v53  ;;  %v4099_v34 = vpop.f32.mrb[37].mxu0 }
 0x3ea   : > { %6195 = vmatprep.subr.bf16.mxu1 %v8603_v60  ;;  %v4100_v28 = vpop.f32.mrb[38].mxu0 }
 0x3eb   : > { %v4103_v36 = vadd.f32 %v4098_v33, %v10117_v54  ;;  %v4101_v37 = vpop.f32.mrb[39].mxu0 }
 0x3ed   : > { %6196 = vmatpush1.bf16.msra.mxu1 %v8461_v25 }
 0x3ee   : > { %6197 = vmatprep.subr.bf16.mxu1 %v8603_v60 }
 0x3f1   : > { %6198 = vmatpush1.bf16.msra.mxu1 %v8462_v44 }
 0x3f2   : > { %6199 = vmatprep.subr.bf16.mxu1 %v8603_v60 }
 0x3f5   : > { %6200 = vmatpush1.bf16.msra.mxu1 %v8463_v49 }
 0x3f6   : > { %6201 = vmatprep.subr.bf16.mxu1 %v8603_v60 }
 0x3f9   : > { %6202 = vmatpush1.bf16.msra.mxu1 %v8464_v46 }
 0x3fa   : > { %6203 = vmatprep.subr.bf16.mxu1 %v8603_v60 }
 0x3fd   : > { %6204 = vmatpush1.bf16.msra.mxu1 %v8465_v43 }
 0x400   : > { %6220 = vmatmul.mubr.bf16.vlgmr.msra.gmra.mrb[60].mxu1 %v5989_v8 }
 0x407   : > { %v4397_v45 = vpop.f32.mrb[36].mxu1 }
 0x408   : > { %v4398_v48 = vadd.f32 %v7828_v23, %v4397_v45  ;;  %v4399_v52 = vpop.f32.mrb[37].mxu1  ;;  %v7848_v50 = vpop.f32.mrb[40].mxu0 }
 0x409   : > { %v4400_v55 = vpop.f32.mrb[38].mxu1  ;;  %v7849_v56 = vpop.f32.mrb[41].mxu0 }
 0x40a   : > { %v4403_v41 = vadd.f32 %v4398_v48, %v4103_v36  ;;  %v4401_v54 = vpop.f32.mrb[39].mxu1  ;;  %v7850_v35 = vadd.f32 %v7849_v56, %v7848_v50  ;;  %v7851_v57 = vpop.f32.mrb[42].mxu0  ;;  %v6228_v56 = vld [vmem:[#allocation3] sm:$0x3] }
 0x40b   : > { %v7852_v62 = vpop.f32.mrb[43].mxu0 }
 0x427   : > { %v7870_v63 = vpop.f32.mrb[40].mxu1 }
 0x428   : > { %v7871_v2 = vpop.f32.mrb[41].mxu1 }
 0x429   : > { %v7872_v3 = vadd.f32 %v7871_v2, %v7870_v63  ;;  %v7873_v4 = vpop.f32.mrb[42].mxu1  ;;  %v7606_v63 = vld [vmem:[#allocation7] ss:$0 sm:$0xff] (!%p7605_p4) }
 0x42a   : > { %v7874_v15 = vpop.f32.mrb[43].mxu1 }
 0x42c   : > { %v4701_v60 = vpop.f32.mrb[44].mxu0 }
 0x42d   : > { %v4702_v59 = vadd.f32 %v7850_v35, %v4701_v60  ;;  %v4703_v1 = vpop.f32.mrb[45].mxu0 }
 0x42e   : > { %v4704_v61 = vpop.f32.mrb[46].mxu0 }
 0x42f   : > { %v4707_v5 = vadd.f32 %v4702_v59, %v4403_v41  ;;  %v4705_v0 = vpop.f32.mrb[47].mxu0  ;;  %v7608_v59 = vld [vmem:[#allocation4] ss:$0 sm:$0xff] (!%p7605_p4) }
 0x44b   : > { %v5005_v58 = vpop.f32.mrb[44].mxu1 }
 0x44c   : > { %v5006_v26 = vadd.f32 %v7872_v3, %v5005_v58  ;;  %v5007_v27 = vpop.f32.mrb[45].mxu1  ;;  %v7892_v6 = vpop.f32.mrb[48].mxu0  ;;  %v7607_v3 = vld [vmem:[#allocation9] ss:$0 sm:$0xff] (!%p7605_p4) }
 0x44d   : > { %v5008_v7 = vpop.f32.mrb[46].mxu1  ;;  %v7893_v9 = vpop.f32.mrb[49].mxu0 }
 0x44e   : > { %v5011_v10 = vadd.f32 %v5006_v26, %v4707_v5  ;;  %v5009_v11 = vpop.f32.mrb[47].mxu1  ;;  %v7894_v12 = vadd.f32 %v7893_v9, %v7892_v6  ;;  %v7895_v31 = vpop.f32.mrb[50].mxu0 }
 0x44f   : > { %v7896_v32 = vpop.f32.mrb[51].mxu0 }
 0x46b   : > { %v7914_v13 = vpop.f32.mrb[48].mxu1 }
 0x46c   : > { %v7915_v14 = vpop.f32.mrb[49].mxu1 }
 0x46d   : > { %v7916_v38 = vadd.f32 %v7915_v14, %v7914_v13  ;;  %v7917_v39 = vpop.f32.mrb[50].mxu1 }
 0x46e   : > { %v7918_v16 = vpop.f32.mrb[51].mxu1 }
 0x470   : > { %v5309_v17 = vpop.f32.mrb[52].mxu0 }
 0x471   : > { %v5310_v18 = vadd.f32 %v7894_v12, %v5309_v17  ;;  %v5311_v19 = vpop.f32.mrb[53].mxu0 }
 0x472   : > { %v5312_v20 = vpop.f32.mrb[54].mxu0 }
 0x473   : > { %v5315_v21 = vadd.f32 %v5310_v18, %v5011_v10  ;;  %v5313_v22 = vpop.f32.mrb[55].mxu0 }
 0x48f   : > { %v5613_v30 = vpop.f32.mrb[52].mxu1 }
 0x490   : > { %v5614_v23 = vadd.f32 %v7916_v38, %v5613_v30  ;;  %v5615_v24 = vpop.f32.mrb[53].mxu1  ;;  %v7936_v53 = vpop.f32.mrb[56].mxu0 }
 0x491   : > { %v5616_v29 = vpop.f32.mrb[54].mxu1  ;;  %v7937_v40 = vpop.f32.mrb[57].mxu0 }
 0x492   : > { %v5619_v33 = vadd.f32 %v5614_v23, %v5315_v21  ;;  %v5617_v25 = vpop.f32.mrb[55].mxu1  ;;  %v7938_v34 = vadd.f32 %v7937_v40, %v7936_v53  ;;  %v7939_v28 = vpop.f32.mrb[58].mxu0 }
 0x493   : > { %v7940_v36 = vpop.f32.mrb[59].mxu0 }
 0x4af   : > { %v7958_v37 = vpop.f32.mrb[56].mxu1 }
 0x4b0   : > { %v7959_v44 = vpop.f32.mrb[57].mxu1 }
 0x4b1   : > { %v7960_v49 = vadd.f32 %v7959_v44, %v7958_v37  ;;  %v7961_v46 = vpop.f32.mrb[58].mxu1 }
 0x4b2   : > { %v7962_v51 = vpop.f32.mrb[59].mxu1 }
 0x4b4   : > { %v5917_v42 = vpop.f32.mrb[60].mxu0 }
 0x4b5   : > { %v5918_v43 = vadd.f32 %v7938_v34, %v5917_v42  ;;  %v5919_v47 = vpop.f32.mrb[61].mxu0 }
 0x4b6   : > { %v5920_v8 = vpop.f32.mrb[62].mxu0 }
 0x4b7   : > { %v5923_v45 = vadd.f32 %v5918_v43, %v5619_v33  ;;  %v5921_v48 = vpop.f32.mrb[63].mxu0 }
 0x4d3   : > { %v6221_v52 = vpop.f32.mrb[60].mxu1 }
 0x4d4   : > { %v6222_v50 = vadd.f32 %v7960_v49, %v6221_v52  ;;  %v6223_v55 = vpop.f32.mrb[61].mxu1  ;;  %6234 = sbr.rel (%p7605_p4) target bundleno = 1430 (0x596), region = 68 }
 0x4d5   : > { %v6224_v41 = vpop.f32.mrb[62].mxu1 }
 0x4d6   : > { %v6227_v54 = vadd.f32 %v6222_v50, %v5923_v45  ;;  %v6225_v35 = vpop.f32.mrb[63].mxu1 }
 0x4d8   : > { %v6229_v57 = vadd.f32 %v6228_v56, %v6227_v54 }
 0x4da   : > { %6230 = vst [vmem:[#allocation3] sm:$0x3] %v6229_v57 }
 0x4e1   : > { %v6235_v62 = vld [vmem:[#allocation3] sm:$0x3] }
 0x4e2   : > { %v6243_v2 = vadd.f32 %v7606_v63, %v6235_v62 }
 0x4e4   : > { %v6244_v4 = vmax.f32 %v6243_v2, 0.0 }
 0x4e6   : > { %v6252_v15 = vmul.f32 %v7607_v3, %v6244_v4 }
 0x4e8   : > { %v6254_v60 = vsel %vm6253_vm5, %v6252_v15, 0.0 }
 0x4e9   : > { %6255 = vadd.xlane.f32.xlu0 %v6254_v60 }
 0x576   : > { %v6256_v1 = vpop.xlane.xlu0 %6255 }
 0x577   : > { %v6264_v61 = vadd.f32 %v7608_v59, %v6256_v1 }
 0x579   : > { %v6265_v5 = vsub.f32 0.0, %v6264_v61 }
 0x57b   : > { %v6266_v0 = vmul.f32 1.442695, %v6265_v5 }
 0x57d   : > { %8466 = vpow2.f32 %v6266_v0 }
 0x587   : > { %v8467_v58 = vpop.eup %8466 }
 0x588   : > { %v6268_v26 = vadd.f32 1.0, %v8467_v58 }
 0x58a   : > { %8468 = vrcp.f32 %v6268_v26 }
 0x594   : > { %v8469_v27 = vpop.eup %8468 }
 0x595   : > { %6272 = vst.msk [vmem:[%s10198_s7] sm:$0x3] %vm6271_vm6, %v8469_v27 }
 0x596 PF: > { %p20_p6 = scmp.ge.s32.totalorder %s8669_s30, 4   ;;  %s10214_s26 = smov %s8586_s27 }
 0x597   : > { %s10215_s27 = smov %s8590_s28  ;;  %s10216_s28 = smov %s8679_s10 }
 0x598   : > { %s10217_s29 = smov %s8669_s30  ;;  %22 = sbr.rel (!%p20_p6) target bundleno = 7 (0x7), region = 120 }
 0x59f   :  { %6284 = vsyncpa [#allocation6], 1 }
 0x5a0   :  { %6286 = vsyncpa [#allocation6 + $0x1], 1 }
 0x5a1   :  { %6287 = vsyncpa [#allocation8], 1 }

</bundles_post_ra>
